<compile_context>
chip_gen: v5e
topology: v5e:2x2
jax: 0.10.0
libtpu: 0.0.40
codegen_flags: <defaults>
</compile_context>

<pallas_src>
import functools

import jax
import jax.numpy as jnp
from jax import lax
from jax.experimental import pallas as pl
from jax.experimental.pallas import tpu as pltpu


# ---------------------------------------------------------------------------
# generation-aware budgets
# ---------------------------------------------------------------------------
@functools.lru_cache(maxsize=None)
def _tpu_vmem_capacity():
    try:
        return int(pltpu.get_tpu_info().vmem_capacity_bytes)
    except Exception:
        return 64 * 1024 * 1024          # conservative (v7x-sized) fallback


def _vmem_limit():
    # ~96 MiB on v5e/v6e (128 MiB VMEM), ~48 MiB on v7x (64 MiB VMEM)
    return int(min(_tpu_vmem_capacity() * 3 // 4, 112 * 1024 * 1024))


def _max_spatial_tile():
    return 8192 if _tpu_vmem_capacity() > (64 << 20) else 2048


# ---------------------------------------------------------------------------
# small helpers
# ---------------------------------------------------------------------------
def gelu_tanh(x):
    c0 = jnp.float32(0.7978845608028654)  # sqrt(2/pi)
    return 0.5 * x * (1.0 + jnp.tanh(c0 * (x + 0.044715 * x * x * x)))


def silu(x):
    return x * jax.nn.sigmoid(x)


def _bn_fold(w, b, rm, rv, eps=1e-5):
    sc = w / jnp.sqrt(rv + eps)
    return sc, b - rm * sc


def _pick_tile(S, max_tile):
    """Largest multiple of 128 that divides S (capped), else the full extent."""
    if S % 128 != 0:
        return S
    t = min(max_tile, S)
    t -= t % 128
    while t > 128 and S % t != 0:
        t -= 128
    return t if (t > 0 and S % t == 0) else S


def _pick_cgroup(C, target=32):
    """Channel-group size for the token-mixer grid (full C or a multiple of 8)."""
    if C <= target:
        return C
    for g in range(target, 0, -1):
        if C % g == 0 and g % 8 == 0:
            return g
    return C


# ---------------------------------------------------------------------------
# Kernel 1: pointwise 1x1 conv (+ folded BN bias) + SiLU, channels-first.
#   All input channel segments are packed along K into a VMEM slab and consumed by
#   ONE (Cout, K) @ (K, tile) MXU dot; output heads are sliced from the result.
# ---------------------------------------------------------------------------
def _pw_kernel(*refs, n_in, n_heads, seg_sizes, head_sizes, act):
    w_ref = refs[n_in]
    b_ref = refs[n_in + 1]
    outs = refs[n_in + 2:n_in + 2 + n_heads]

    if n_in == 1:
        xk = refs[0][...]                               # (K, ts) bf16
    else:
        ks_ref = refs[n_in + 2 + n_heads]               # VMEM (K, ts) bf16
        off = 0
        for i in range(n_in):
            ks_ref[off:off + seg_sizes[i], :] = refs[i][...]
            off += seg_sizes[i]
        xk = ks_ref[...]

    y = jnp.dot(w_ref[...], xk, preferred_element_type=jnp.float32) + b_ref[...]
    if act == "silu":
        y = y * jax.nn.sigmoid(y)

    off = 0
    for j in range(n_heads):
        outs[j][...] = y[off:off + head_sizes[j], :].astype(outs[j].dtype)
        off += head_sizes[j]


def pointwise_cf(xs, w, b, head_sizes, *, act="silu", out_dtype=jnp.bfloat16):
    """xs: list of (N, Ci, S) channels-first segments (concat along K);
       w: (Cout_total, sum Ci); b: (Cout_total,); heads sliced from the Cout axis."""
    n_in = len(xs)
    N, _, S = xs[0].shape
    seg_sizes = [int(x.shape[1]) for x in xs]
    K = sum(seg_sizes)
    Co = int(w.shape[0])
    assert w.shape[1] == K and sum(head_sizes) == Co
    ts = _pick_tile(S, _max_spatial_tile())
    grid = (N, S // ts)

    in_specs, args = [], []
    for x in xs:
        Ci = int(x.shape[1])
        in_specs.append(pl.BlockSpec((None, Ci, ts), lambda n, s: (n, 0, s)))
        args.append(x.astype(jnp.bfloat16))
    in_specs.append(pl.BlockSpec((Co, K), lambda n, s: (0, 0)))
    args.append(w.astype(jnp.bfloat16))
    in_specs.append(pl.BlockSpec((Co, 1), lambda n, s: (0, 0)))
    args.append(b.reshape(Co, 1).astype(jnp.float32))

    out_shapes = [jax.ShapeDtypeStruct((N, h, S), out_dtype) for h in head_sizes]
    out_specs = [pl.BlockSpec((None, h, ts), lambda n, s: (n, 0, s)) for h in head_sizes]
    scratch = [] if n_in == 1 else [pltpu.VMEM((K, ts), jnp.bfloat16)]

    outs = pl.pallas_call(
        functools.partial(_pw_kernel, n_in=n_in, n_heads=len(head_sizes),
                          seg_sizes=tuple(seg_sizes), head_sizes=tuple(head_sizes),
                          act=act),
        out_shape=out_shapes,
        grid=grid,
        in_specs=in_specs,
        out_specs=out_specs,
        scratch_shapes=scratch,
        compiler_params=pltpu.CompilerParams(
            dimension_semantics=("parallel", "parallel"),
            vmem_limit_bytes=_vmem_limit()),
    )(*args)
    return list(outs)


# ---------------------------------------------------------------------------
# Kernel 2: RCA token mixer, tiled over (batch, channel group) -- everything is
# depthwise / per-channel so channel tiling is exact.
#   loc = dw 3x3 conv + bias
#   x_h = mean_W(x), x_w = mean_H(x)     (two thin MXU GEMMs, f32 rescale)
#   g   = ReLU(conv_(1,11)(x_h + x_w) + folded BN)   (separable -> 3 thin GEMMs)
#   att = sigmoid(conv_(11,1)(g) + bias)             (11 vertical shift-MACs)
#   out = att * loc
# ---------------------------------------------------------------------------
def _rca_kernel(x_ref, mh_ref, mw_ref, eh_ref, ew_ref, cm_ref,
                dww_ref, dwb_ref, e1t_ref, e1w_ref, e1b_ref, e2w_ref, e2b_ref,
                o_ref, pad_ref, wpad_ref, *, H, W, PAD):
    Cg, S = x_ref.shape
    x_bf = x_ref[...]                                    # (Cg, S) bf16

    # halo-only zeroing of the bf16 shift scratch; interior fully overwritten below
    pad_ref[:, :PAD] = jnp.zeros((Cg, PAD), pad_ref.dtype)
    pad_ref[:, PAD + S:] = jnp.zeros((Cg, PAD), pad_ref.dtype)
    pad_ref[:, PAD:PAD + S] = x_bf

    def shifted(s):                                      # value[:, p] == src[:, p + s]
        return pad_ref[:, PAD + s: PAD + s + S]

    cm = cm_ref[...]                                     # (2, S) f32 column masks
    m_neg, m_pos = cm[0:1], cm[1:2]
    dww = dww_ref[...]                                   # (9, Cg, 1) f32

    # ---- loc = depthwise 3x3 conv (pad 1) + bias -------------------------------
    loc = jnp.zeros((Cg, S), jnp.float32)
    for kh in range(3):
        for kw in range(3):
            dh, dw = kh - 1, kw - 1
            t = shifted(dh * W + dw)
            if dw == -1:
                t = t * m_neg
            elif dw == 1:
                t = t * m_pos
            loc = loc + dww[kh * 3 + kw] * t
    loc = loc + dwb_ref[...]

    # ---- separable strip pooling: row means (Cg,H), column means (Cg,W) --------
    xh = jnp.dot(x_bf, mh_ref[...], preferred_element_type=jnp.float32) * (1.0 / W)
    xw = jnp.dot(x_bf, mw_ref[...], preferred_element_type=jnp.float32) * (1.0 / H)

    # ---- excite conv1 (1,11) on xg = x_h + x_w (BN folded), ReLU ---------------
    # conv_W(xg)[c,h,w] = x_h[c,h] * T[c,w] + conv_W(x_w)[c,w]; T precomputed host-side
    e1w = e1w_ref[...]                                   # (11, Cg, 1) f32
    wpad_ref[...] = jnp.zeros_like(wpad_ref)             # tiny (Cg, W+16) f32 scratch
    wpad_ref[:, 8:8 + W] = xw
    u = jnp.zeros((Cg, W), jnp.float32)
    for k in range(11):
        u = u + e1w[k] * wpad_ref[:, 3 + k: 3 + k + W]
    u = u + e1b_ref[...]
    # broadcast back to the full (Cg, S) map with thin MXU GEMMs; ReLU only here
    bch = jnp.dot(xh.astype(jnp.bfloat16), eh_ref[...],
                  preferred_element_type=jnp.float32)
    bct = jnp.dot(e1t_ref[...], ew_ref[...], preferred_element_type=jnp.float32)
    bcu = jnp.dot(u.astype(jnp.bfloat16), ew_ref[...],
                  preferred_element_type=jnp.float32)
    g = jnp.maximum(bch * bct + bcu, 0.0)

    # ---- excite conv2 (11,1) over H + bias, sigmoid -----------------------------
    pad_ref[:, PAD:PAD + S] = g.astype(pad_ref.dtype)
    e2w = e2w_ref[...]                                   # (11, Cg, 1) f32
    a = jnp.zeros((Cg, S), jnp.float32)
    for k in range(11):
        a = a + e2w[k] * shifted((k - 5) * W)
    att = jax.nn.sigmoid(a + e2b_ref[...])

    o_ref[...] = (att * loc).astype(o_ref.dtype)


def rca_token_mixer(x, R, consts, H, W):
    """x: (N, C, S) bf16 channels-first; returns rca (N, C, S) bf16."""
    N, C, S = x.shape
    mh, mw, eh, ew, cm = consts
    cg = _pick_cgroup(C)
    PAD = ((5 * W + 127) // 128) * 128                   # lane-aligned halo
    grid = (N, C // cg)

    def const_spec(shape):
        return pl.BlockSpec(shape, lambda n, c, _s=len(shape): (0,) * _s)

    in_specs = [
        pl.BlockSpec((None, cg, S), lambda n, c: (n, c, 0)),      # x
        const_spec(mh.shape), const_spec(mw.shape),               # pooling (S,H)/(S,W)
        const_spec(eh.shape), const_spec(ew.shape),               # broadcast (H,S)/(W,S)
        const_spec(cm.shape),                                     # column masks (2,S)
        pl.BlockSpec((9, cg, 1), lambda n, c: (0, c, 0)),         # dw 3x3 weights
        pl.BlockSpec((cg, 1), lambda n, c: (c, 0)),               # dw bias
        pl.BlockSpec((cg, W), lambda n, c: (c, 0)),               # T (valid-tap sums)
        pl.BlockSpec((11, cg, 1), lambda n, c: (0, c, 0)),        # e1 weights (BN folded)
        pl.BlockSpec((cg, 1), lambda n, c: (c, 0)),               # e1 bias (BN folded)
        pl.BlockSpec((11, cg, 1), lambda n, c: (0, c, 0)),        # e2 weights
        pl.BlockSpec((cg, 1), lambda n, c: (c, 0)),               # e2 bias
    ]

    return pl.pallas_call(
        functools.partial(_rca_kernel, H=H, W=W, PAD=PAD),
        out_shape=jax.ShapeDtypeStruct((N, C, S), jnp.bfloat16),
        grid=grid,
        in_specs=in_specs,
        out_specs=pl.BlockSpec((None, cg, S), lambda n, c: (n, c, 0)),
        scratch_shapes=[pltpu.VMEM((cg, S + 2 * PAD), jnp.bfloat16),
                        pltpu.VMEM((cg, W + 16), jnp.float32)],
        compiler_params=pltpu.CompilerParams(
            dimension_semantics=("parallel", "parallel"),
            vmem_limit_bytes=_vmem_limit()),
    )(x, mh, mw, eh, ew, cm,
      R['dw_w'], R['dw_b'], R['e1_t'], R['e1_w'], R['e1_b'], R['e2_w'], R['e2_b'])


# ---------------------------------------------------------------------------
# Kernel 3: ConvMlp (norm folded into fc1, gamma into fc2) + residual,
#           spatially tiled so the 2C hidden never leaves VMEM/vregs.
# ---------------------------------------------------------------------------
def _mlp_kernel(rca_ref, x_ref, w1_ref, b1_ref, w2_ref, b2_ref, o_ref):
    h = jnp.dot(w1_ref[...], rca_ref[...], preferred_element_type=jnp.float32) + b1_ref[...]
    h = gelu_tanh(h)
    y = jnp.dot(w2_ref[...], h.astype(jnp.bfloat16),
                preferred_element_type=jnp.float32) + b2_ref[...]
    o_ref[...] = (y + x_ref[...].astype(jnp.float32)).astype(o_ref.dtype)


def conv_mlp_residual(rca, x, R):
    N, C, S = x.shape
    Ch = int(R['fc1_w'].shape[0])
    ts = _pick_tile(S, _max_spatial_tile())
    grid = (N, S // ts)
    in_specs = [
        pl.BlockSpec((None, C, ts), lambda n, s: (n, 0, s)),
        pl.BlockSpec((None, C, ts), lambda n, s: (n, 0, s)),
        pl.BlockSpec((Ch, C), lambda n, s: (0, 0)),
        pl.BlockSpec((Ch, 1), lambda n, s: (0, 0)),
        pl.BlockSpec((C, Ch), lambda n, s: (0, 0)),
        pl.BlockSpec((C, 1), lambda n, s: (0, 0)),
    ]
    return pl.pallas_call(
        _mlp_kernel,
        out_shape=jax.ShapeDtypeStruct((N, C, S), jnp.bfloat16),
        grid=grid,
        in_specs=in_specs,
        out_specs=pl.BlockSpec((None, C, ts), lambda n, s: (n, 0, s)),
        compiler_params=pltpu.CompilerParams(
            dimension_semantics=("parallel", "parallel"),
            vmem_limit_bytes=_vmem_limit()),
    )(rca, x, R['fc1_w'], R['fc1_b'], R['fc2_w'], R['fc2_b'])


# ---------------------------------------------------------------------------
# Host-side precompute: fold BNs / layer-scale into weights, precompute tap sums.
# ---------------------------------------------------------------------------
def fold_params(raw, H, W):
    C = raw['c']
    f32 = jnp.float32

    sc1, sh1 = _bn_fold(*raw['cv1_bn'])
    cv1_w = sc1[:, None] * raw['cv1_w']                          # (2C, C1)
    sc2, sh2 = _bn_fold(*raw['cv2_bn'])
    cv2_w = sc2[:, None] * raw['cv2_w']                          # (C2, (2+n)C)

    w_idx = jnp.arange(W)
    valid = jnp.stack([((w_idx + k - 5 >= 0) & (w_idx + k - 5 < W)).astype(f32)
                       for k in range(11)])                      # (11, W)

    P = dict(c=C,
             cv1_w=cv1_w.astype(jnp.bfloat16), cv1_b=sh1.astype(f32),
             cv2_w=cv2_w.astype(jnp.bfloat16), cv2_b=sh2.astype(f32),
             rcms=[])

    for R in raw['rcms']:
        esc, esh = _bn_fold(*R['ebn'])
        nsc, nsh = _bn_fold(*R['norm_bn'])
        e1f = esc[:, None] * R['e1_w']                    # excite-BN folded into conv w
        e1b = esc * R['e1_b'] + esh                       # excite-BN folded into bias
        fc1_w = R['fc1_w'] * nsc[None, :]                 # RCM.norm folded into fc1
        fc1_b = R['fc1_b'] + R['fc1_w'] @ nsh
        fc2_w = R['gamma'][:, None] * R['fc2_w']          # layer-scale folded into fc2
        fc2_b = R['gamma'] * R['fc2_b']
        P['rcms'].append(dict(
            dw_w=jnp.transpose(R['dw_w'].reshape(C, 9), (1, 0))[:, :, None].astype(f32),
            dw_b=R['dw_b'][:, None].astype(f32),
            e1_w=jnp.transpose(e1f, (1, 0))[:, :, None].astype(f32),
            e1_b=e1b[:, None].astype(f32),
            e1_t=(e1f @ valid).astype(jnp.bfloat16),      # (C, W) per-column tap sums
            e2_w=jnp.transpose(R['e2_w'], (1, 0))[:, :, None].astype(f32),
            e2_b=R['e2_b'][:, None].astype(f32),
            fc1_w=fc1_w.astype(jnp.bfloat16), fc1_b=fc1_b[:, None].astype(f32),
            fc2_w=fc2_w.astype(jnp.bfloat16), fc2_b=fc2_b[:, None].astype(f32),
        ))
    return P


# ---------------------------------------------------------------------------
# C2f_RCM forward (Pallas path): reshape once at entry/exit, no transposes.
# ---------------------------------------------------------------------------
def c2f_rcm_forward(x, P):
    N, C1, H, W = x.shape
    S = H * W
    C = P['c']
    x_cf = x.reshape(N, C1, S).astype(jnp.bfloat16)

    # cv1: one (2C, C1) GEMM, the two chunk(2) heads sliced inside the kernel
    y1, y2 = pointwise_cf([x_cf], P['cv1_w'], P['cv1_b'], head_sizes=[C, C],
                          act="silu", out_dtype=jnp.bfloat16)

    # spatial constants shared by all RCM blocks (constant-folded under jit):
    # 0/1 pooling matrices (S,H)/(S,W), broadcast matrices (H,S)/(W,S), column masks
    idx = jnp.arange(S, dtype=jnp.int32)
    row, col = idx // W, idx % W
    eh = (row[None, :] == jnp.arange(H, dtype=jnp.int32)[:, None]).astype(jnp.bfloat16)
    ew = (col[None, :] == jnp.arange(W, dtype=jnp.int32)[:, None]).astype(jnp.bfloat16)
    mh, mw = eh.T, ew.T
    cm = jnp.stack([(col > 0), (col < W - 1)]).astype(jnp.float32)
    consts = (mh, mw, eh, ew, cm)

    ys = [y1, y2]
    for R in P['rcms']:
        rca = rca_token_mixer(ys[-1], R, consts, H, W)
        ys.append(conv_mlp_residual(rca, ys[-1], R))

    # cv2 over the channel concat: segments packed along K inside the kernel,
    # one (C2, (2+n)C) GEMM, bf16 output
    C2 = int(P['cv2_w'].shape[0])
    (out_cf,) = pointwise_cf(ys, P['cv2_w'], P['cv2_b'], head_sizes=[C2],
                             act="silu", out_dtype=jnp.bfloat16)
    return out_cf.reshape(N, C2, H, W)


# ---------------------------------------------------------------------------
# Pure-JAX f32 reference (NCHW) for validation.
# ---------------------------------------------------------------------------
def ref_forward(x, raw):
    hp = lax.Precision.HIGHEST

    def pw(t, wmat, bias=None):
        y = jnp.einsum('nchw,oc->nohw', t, wmat, precision=hp)
        if bias is not None:
            y = y + bias[None, :, None, None]
        return y

    def chan_affine(t, sc, sh):
        return t * sc[None, :, None, None] + sh[None, :, None, None]

    def dwconv(t, wt, b, kh, kw):
        n, c, h, wd = t.shape
        ph, pw_ = kh // 2, kw // 2
        tp = jnp.pad(t, ((0, 0), (0, 0), (ph, ph), (pw_, pw_)))
        acc = jnp.zeros_like(t)
        for i in range(kh):
            for j in range(kw):
                acc = acc + wt[:, i, j][None, :, None, None] * tp[:, :, i:i + h, j:j + wd]
        return acc + b[None, :, None, None]

    C = raw['c']
    sc1, sh1 = _bn_fold(*raw['cv1_bn'])
    y = silu(chan_affine(pw(x, raw['cv1_w']), sc1, sh1))
    ys = [y[:, :C], y[:, C:]]
    for R in raw['rcms']:
        xin = ys[-1]
        loc = dwconv(xin, R['dw_w'], R['dw_b'], 3, 3)
        x_h = jnp.mean(xin, axis=3, keepdims=True)
        x_w = jnp.mean(xin, axis=2, keepdims=True)
        xg = x_h + x_w
        g = dwconv(xg, R['e1_w'][:, None, :], R['e1_b'], 1, 11)
        esc, esh = _bn_fold(*R['ebn'])
        g = jnp.maximum(chan_affine(g, esc, esh), 0.0)
        att = jax.nn.sigmoid(dwconv(g, R['e2_w'][:, :, None], R['e2_b'], 11, 1))
        rca = att * loc
        nsc, nsh = _bn_fold(*R['norm_bn'])
        hm = chan_affine(rca, nsc, nsh)
        hm = gelu_tanh(pw(hm, R['fc1_w'], R['fc1_b']))
        hm = pw(hm, R['fc2_w'], R['fc2_b'])
        ys.append(hm * R['gamma'][None, :, None, None] + xin)
    cat = jnp.concatenate(ys, axis=1)
    sc2, sh2 = _bn_fold(*raw['cv2_bn'])
    return silu(chan_affine(pw(cat, raw['cv2_w']), sc2, sh2))


# ---------------------------------------------------------------------------
# test harness
# ---------------------------------------------------------------------------
def make_raw(key, C1, C2, n_blocks, e):
    C = int(C2 * e)
    kit = iter(jax.random.split(key, 256))

    def rand(shape, scale=0.2):
        return (scale * jax.random.normal(next(kit), shape)).astype(jnp.float32)

    def bn(c):
        w = (1.0 + 0.1 * jax.random.normal(next(kit), (c,))).astype(jnp.float32)
        b = (0.1 * jax.random.normal(next(kit), (c,))).astype(jnp.float32)
        rm = (0.1 * jax.random.normal(next(kit), (c,))).astype(jnp.float32)
        rv = (1.0 + 0.2 * jax.random.uniform(next(kit), (c,))).astype(jnp.float32)
        return (w, b, rm, rv)

    rcms = []
    for _ in range(n_blocks):
        rcms.append(dict(
            dw_w=rand((C, 3, 3)), dw_b=rand((C,)),           # RCA.dwconv_hw
            e1_w=rand((C, 11)), e1_b=rand((C,)), ebn=bn(C),  # excite (1,11) dw conv + BN
            e2_w=rand((C, 11)), e2_b=rand((C,)),             # excite (11,1) dw conv
            norm_bn=bn(C),                                   # RCM.norm (BN)
            fc1_w=rand((2 * C, C)), fc1_b=rand((2 * C,)),    # ConvMlp fc1
            fc2_w=rand((C, 2 * C)), fc2_b=rand((C,)),        # ConvMlp fc2
            # PyTorch init is 1e-6; random gamma so the RCM path is exercised.
            gamma=rand((C,), scale=0.5),
        ))
    return dict(c=C,
                cv1_w=rand((2 * C, C1)), cv1_bn=bn(2 * C),
                cv2_w=rand((C2, (2 + n_blocks) * C)), cv2_bn=bn(C2),
                rcms=rcms)


def run_case(key, B, C1, C2, H, W, n_blocks, e=0.5, tol=5e-2):
    kx, kp = jax.random.split(key)
    raw = make_raw(kp, C1, C2, n_blocks, e)
    x = jax.random.normal(kx, (B, C1, H, W), jnp.float32)
    P = fold_params(raw, H, W)
    fwd = jax.jit(lambda inp: c2f_rcm_forward(inp, P))
    out = jax.block_until_ready(fwd(x))
    ref = jax.block_until_ready(ref_forward(x, raw))
    assert out.shape == ref.shape, (out.shape, ref.shape)
    err = float(jnp.max(jnp.abs(out.astype(jnp.float32) - ref)))
    assert err < tol, f"max abs err {err}"
    return err


if __name__ == "__main__":
    root = jax.random.PRNGKey(0)
    k1, k2 = jax.random.split(root)
    # main case (matches the module defaults: e=0.5, n=1)
    run_case(k1, B=2, C1=8, C2=8, H=16, W=16, n_blocks=1)
    # ragged case: S % 128 != 0, odd C1, two RCM blocks (4-segment K-packed cv2)
    run_case(k2, B=1, C1=5, C2=16, H=10, W=12, n_blocks=2)
    print("KERNEL_OK")
</pallas_src>

<mosaic_0001>
module attributes {stable_mosaic.version = 11 : i64} {
  func.func @_pw_kernel(%arg0: i32, %arg1: i32, %arg2: memref<1x8x256xbf16, #tpu.memory_space<vmem>>, %arg3: memref<8x8xbf16, #tpu.memory_space<vmem>>, %arg4: memref<8x1xf32, #tpu.memory_space<vmem>>, %arg5: memref<1x4x256xbf16, #tpu.memory_space<vmem>>, %arg6: memref<1x4x256xbf16, #tpu.memory_space<vmem>>) attributes {dimension_semantics = [#tpu.dimension_semantics<parallel>, #tpu.dimension_semantics<parallel>], iteration_bounds = array<i64: 2, 1>, scalar_prefetch = 0 : i64, scratch_operands = 0 : i64, tpu.core_type = #tpu.core_type<tc>, window_params = [{transform_indices = @transform_0, window_bounds = array<i64: 1, 8, 256>}, {pipeline_mode = #tpu.pipeline_mode<synchronous>, transform_indices = @transform_1, window_bounds = array<i64: 8, 8>}, {pipeline_mode = #tpu.pipeline_mode<synchronous>, transform_indices = @transform_2, window_bounds = array<i64: 8, 1>}, {transform_indices = @transform_3, window_bounds = array<i64: 1, 4, 256>}, {transform_indices = @transform_4, window_bounds = array<i64: 1, 4, 256>}]} {
    %c0 = arith.constant 0 : index
    %c0_0 = arith.constant 0 : index
    %c0_1 = arith.constant 0 : index
    %0 = vector.load %arg2[%c0, %c0_0, %c0_1] : memref<1x8x256xbf16, #tpu.memory_space<vmem>>, vector<1x8x256xbf16>
    %1 = vector.shape_cast %0 : vector<1x8x256xbf16> to vector<8x256xbf16>
    %c0_2 = arith.constant 0 : index
    %c0_3 = arith.constant 0 : index
    %2 = vector.load %arg3[%c0_2, %c0_3] : memref<8x8xbf16, #tpu.memory_space<vmem>>, vector<8x8xbf16>
    %cst = arith.constant dense<0.000000e+00> : vector<8x256xf32>
    %3 = tpu.matmul %2, %1, %cst {dimension_numbers = #tpu.dot_dimension_numbers<[1], [0], [0], [1], [0, 0, 1, 1], [], []>} : vector<8x8xbf16>, vector<8x256xbf16>, vector<8x256xf32> -> vector<8x256xf32>
    %c0_4 = arith.constant 0 : index
    %c0_5 = arith.constant 0 : index
    %4 = vector.load %arg4[%c0_4, %c0_5] : memref<8x1xf32, #tpu.memory_space<vmem>>, vector<8x1xf32>
    %5 = vector.broadcast %4 : vector<8x1xf32> to vector<8x256xf32>
    %6 = arith.addf %3, %5 : vector<8x256xf32>
    %7 = arith.negf %6 : vector<8x256xf32>
    %8 = math.exp %7 : vector<8x256xf32>
    %cst_6 = arith.constant 1.000000e+00 : f32
    %9 = vector.broadcast %cst_6 : f32 to vector<8x256xf32>
    %10 = arith.addf %9, %8 : vector<8x256xf32>
    %11 = arith.divf %9, %10 : vector<8x256xf32>
    %12 = arith.mulf %6, %11 : vector<8x256xf32>
    %13 = vector.extract_strided_slice %12 {offsets = [0, 0], sizes = [4, 256], strides = [1, 1]} : vector<8x256xf32> to vector<4x256xf32>
    %14 = arith.truncf %13 : vector<4x256xf32> to vector<4x256xbf16>
    %c0_7 = arith.constant 0 : index
    %c0_8 = arith.constant 0 : index
    %c0_9 = arith.constant 0 : index
    %15 = vector.load %arg5[%c0_7, %c0_8, %c0_9] : memref<1x4x256xbf16, #tpu.memory_space<vmem>>, vector<1x4x256xbf16>
    %16 = vector.shape_cast %15 : vector<1x4x256xbf16> to vector<4x256xbf16>
    %17 = vector.shape_cast %14 : vector<4x256xbf16> to vector<1x4x256xbf16>
    tpu.vector_store %arg5[%c0_7, %c0_8, %c0_9], %17 {strides = array<i32>} : memref<1x4x256xbf16, #tpu.memory_space<vmem>>, vector<1x4x256xbf16>,
    %18 = vector.extract_strided_slice %12 {offsets = [4, 0], sizes = [4, 256], strides = [1, 1]} : vector<8x256xf32> to vector<4x256xf32>
    %19 = arith.truncf %18 : vector<4x256xf32> to vector<4x256xbf16>
    %c0_10 = arith.constant 0 : index
    %c0_11 = arith.constant 0 : index
    %c0_12 = arith.constant 0 : index
    %20 = vector.load %arg6[%c0_10, %c0_11, %c0_12] : memref<1x4x256xbf16, #tpu.memory_space<vmem>>, vector<1x4x256xbf16>
    %21 = vector.shape_cast %20 : vector<1x4x256xbf16> to vector<4x256xbf16>
    %22 = vector.shape_cast %19 : vector<4x256xbf16> to vector<1x4x256xbf16>
    tpu.vector_store %arg6[%c0_10, %c0_11, %c0_12], %22 {strides = array<i32>} : memref<1x4x256xbf16, #tpu.memory_space<vmem>>, vector<1x4x256xbf16>,
    return
  }
  func.func @transform_0(%arg0: i32, %arg1: i32) -> (i32, i32, i32) {
    %c0_i32 = arith.constant 0 : i32
    %c0_i32_0 = arith.constant 0 : i32
    return %arg0, %c0_i32, %arg1 : i32, i32, i32
  }
  func.func @transform_1(%arg0: i32, %arg1: i32) -> (i32, i32) {
    %c0_i32 = arith.constant 0 : i32
    %c0_i32_0 = arith.constant 0 : i32
    %c0_i32_1 = arith.constant 0 : i32
    return %c0_i32, %c0_i32_0 : i32, i32
  }
  func.func @transform_2(%arg0: i32, %arg1: i32) -> (i32, i32) {
    %c0_i32 = arith.constant 0 : i32
    %c0_i32_0 = arith.constant 0 : i32
    %c0_i32_1 = arith.constant 0 : i32
    return %c0_i32, %c0_i32_0 : i32, i32
  }
  func.func @transform_3(%arg0: i32, %arg1: i32) -> (i32, i32, i32) {
    %c0_i32 = arith.constant 0 : i32
    %c0_i32_0 = arith.constant 0 : i32
    return %arg0, %c0_i32, %arg1 : i32, i32, i32
  }
  func.func @transform_4(%arg0: i32, %arg1: i32) -> (i32, i32, i32) {
    %c0_i32 = arith.constant 0 : i32
    %c0_i32_0 = arith.constant 0 : i32
    return %arg0, %c0_i32, %arg1 : i32, i32, i32
  }
}

module attributes {stable_mosaic.version = 11 : i64} {
  func.func @_pw_kernel(%arg0: i32, %arg1: i32, %arg2: memref<1x4x256xbf16, #tpu.memory_space<vmem>>, %arg3: memref<1x4x256xbf16, #tpu.memory_space<vmem>>, %arg4: memref<1x4x256xbf16, #tpu.memory_space<vmem>>, %arg5: memref<8x12xbf16, #tpu.memory_space<vmem>>, %arg6: memref<8x1xf32, #tpu.memory_space<vmem>>, %arg7: memref<1x8x256xbf16, #tpu.memory_space<vmem>>, %arg8: memref<12x256xbf16, #tpu.memory_space<vmem>>) attributes {dimension_semantics = [#tpu.dimension_semantics<parallel>, #tpu.dimension_semantics<parallel>], iteration_bounds = array<i64: 2, 1>, scalar_prefetch = 0 : i64, scratch_operands = 1 : i64, tpu.core_type = #tpu.core_type<tc>, window_params = [{transform_indices = @transform_0, window_bounds = array<i64: 1, 4, 256>}, {transform_indices = @transform_1, window_bounds = array<i64: 1, 4, 256>}, {transform_indices = @transform_2, window_bounds = array<i64: 1, 4, 256>}, {pipeline_mode = #tpu.pipeline_mode<synchronous>, transform_indices = @transform_3, window_bounds = array<i64: 8, 12>}, {pipeline_mode = #tpu.pipeline_mode<synchronous>, transform_indices = @transform_4, window_bounds = array<i64: 8, 1>}, {transform_indices = @transform_5, window_bounds = array<i64: 1, 8, 256>}]} {
    %c0 = arith.constant 0 : index
    %c0_0 = arith.constant 0 : index
    %c0_1 = arith.constant 0 : index
    %0 = vector.load %arg2[%c0, %c0_0, %c0_1] : memref<1x4x256xbf16, #tpu.memory_space<vmem>>, vector<1x4x256xbf16>
    %1 = vector.shape_cast %0 : vector<1x4x256xbf16> to vector<4x256xbf16>
    %c0_2 = arith.constant 0 : index
    %c0_3 = arith.constant 0 : index
    %2 = vector.load %arg8[%c0_2, %c0_3] : memref<12x256xbf16, #tpu.memory_space<vmem>>, vector<4x256xbf16>
    tpu.vector_store %arg8[%c0_2, %c0_3], %1 {strides = array<i32>} : memref<12x256xbf16, #tpu.memory_space<vmem>>, vector<4x256xbf16>,
    %c0_4 = arith.constant 0 : index
    %c0_5 = arith.constant 0 : index
    %c0_6 = arith.constant 0 : index
    %3 = vector.load %arg3[%c0_4, %c0_5, %c0_6] : memref<1x4x256xbf16, #tpu.memory_space<vmem>>, vector<1x4x256xbf16>
    %4 = vector.shape_cast %3 : vector<1x4x256xbf16> to vector<4x256xbf16>
    %c4 = arith.constant 4 : index
    %c0_7 = arith.constant 0 : index
    %5 = vector.load %arg8[%c4, %c0_7] : memref<12x256xbf16, #tpu.memory_space<vmem>>, vector<4x256xbf16>
    tpu.vector_store %arg8[%c4, %c0_7], %4 {strides = array<i32>} : memref<12x256xbf16, #tpu.memory_space<vmem>>, vector<4x256xbf16>,
    %c0_8 = arith.constant 0 : index
    %c0_9 = arith.constant 0 : index
    %c0_10 = arith.constant 0 : index
    %6 = vector.load %arg4[%c0_8, %c0_9, %c0_10] : memref<1x4x256xbf16, #tpu.memory_space<vmem>>, vector<1x4x256xbf16>
    %7 = vector.shape_cast %6 : vector<1x4x256xbf16> to vector<4x256xbf16>
    %c8 = arith.constant 8 : index
    %c0_11 = arith.constant 0 : index
    %8 = vector.load %arg8[%c8, %c0_11] : memref<12x256xbf16, #tpu.memory_space<vmem>>, vector<4x256xbf16>
    tpu.vector_store %arg8[%c8, %c0_11], %7 {strides = array<i32>} : memref<12x256xbf16, #tpu.memory_space<vmem>>, vector<4x256xbf16>,
    %c0_12 = arith.constant 0 : index
    %c0_13 = arith.constant 0 : index
    %9 = vector.load %arg8[%c0_12, %c0_13] : memref<12x256xbf16, #tpu.memory_space<vmem>>, vector<12x256xbf16>
    %c0_14 = arith.constant 0 : index
    %c0_15 = arith.constant 0 : index
    %10 = vector.load %arg5[%c0_14, %c0_15] : memref<8x12xbf16, #tpu.memory_space<vmem>>, vector<8x12xbf16>
    %cst = arith.constant dense<0.000000e+00> : vector<8x256xf32>
    %11 = tpu.matmul %10, %9, %cst {dimension_numbers = #tpu.dot_dimension_numbers<[1], [0], [0], [1], [0, 0, 1, 1], [], []>} : vector<8x12xbf16>, vector<12x256xbf16>, vector<8x256xf32> -> vector<8x256xf32>
    %c0_16 = arith.constant 0 : index
    %c0_17 = arith.constant 0 : index
    %12 = vector.load %arg6[%c0_16, %c0_17] : memref<8x1xf32, #tpu.memory_space<vmem>>, vector<8x1xf32>
    %13 = vector.broadcast %12 : vector<8x1xf32> to vector<8x256xf32>
    %14 = arith.addf %11, %13 : vector<8x256xf32>
    %15 = arith.negf %14 : vector<8x256xf32>
    %16 = math.exp %15 : vector<8x256xf32>
    %cst_18 = arith.constant 1.000000e+00 : f32
    %17 = vector.broadcast %cst_18 : f32 to vector<8x256xf32>
    %18 = arith.addf %17, %16 : vector<8x256xf32>
    %19 = arith.divf %17, %18 : vector<8x256xf32>
    %20 = arith.mulf %14, %19 : vector<8x256xf32>
    %21 = arith.truncf %20 : vector<8x256xf32> to vector<8x256xbf16>
    %c0_19 = arith.constant 0 : index
    %c0_20 = arith.constant 0 : index
    %c0_21 = arith.constant 0 : index
    %22 = vector.load %arg7[%c0_19, %c0_20, %c0_21] : memref<1x8x256xbf16, #tpu.memory_space<vmem>>, vector<1x8x256xbf16>
    %23 = vector.shape_cast %22 : vector<1x8x256xbf16> to vector<8x256xbf16>
    %24 = vector.shape_cast %21 : vector<8x256xbf16> to vector<1x8x256xbf16>
    tpu.vector_store %arg7[%c0_19, %c0_20, %c0_21], %24 {strides = array<i32>} : memref<1x8x256xbf16, #tpu.memory_space<vmem>>, vector<1x8x256xbf16>,
    return
  }
  func.func @transform_0(%arg0: i32, %arg1: i32) -> (i32, i32, i32) {
    %c0_i32 = arith.constant 0 : i32
    %c0_i32_0 = arith.constant 0 : i32
    return %arg0, %c0_i32, %arg1 : i32, i32, i32
  }
  func.func @transform_1(%arg0: i32, %arg1: i32) -> (i32, i32, i32) {
    %c0_i32 = arith.constant 0 : i32
    %c0_i32_0 = arith.constant 0 : i32
    return %arg0, %c0_i32, %arg1 : i32, i32, i32
  }
  func.func @transform_2(%arg0: i32, %arg1: i32) -> (i32, i32, i32) {
    %c0_i32 = arith.constant 0 : i32
    %c0_i32_0 = arith.constant 0 : i32
    return %arg0, %c0_i32, %arg1 : i32, i32, i32
  }
  func.func @transform_3(%arg0: i32, %arg1: i32) -> (i32, i32) {
    %c0_i32 = arith.constant 0 : i32
    %c0_i32_0 = arith.constant 0 : i32
    %c0_i32_1 = arith.constant 0 : i32
    return %c0_i32, %c0_i32_0 : i32, i32
  }
  func.func @transform_4(%arg0: i32, %arg1: i32) -> (i32, i32) {
    %c0_i32 = arith.constant 0 : i32
    %c0_i32_0 = arith.constant 0 : i32
    %c0_i32_1 = arith.constant 0 : i32
    return %c0_i32, %c0_i32_0 : i32, i32
  }
  func.func @transform_5(%arg0: i32, %arg1: i32) -> (i32, i32, i32) {
    %c0_i32 = arith.constant 0 : i32
    %c0_i32_0 = arith.constant 0 : i32
    return %arg0, %c0_i32, %arg1 : i32, i32, i32
  }
}

module attributes {stable_mosaic.version = 11 : i64} {
  func.func @_rca_kernel(%arg0: i32, %arg1: i32, %arg2: memref<1x4x256xbf16, #tpu.memory_space<vmem>>, %arg3: memref<256x16xbf16, #tpu.memory_space<vmem>>, %arg4: memref<256x16xbf16, #tpu.memory_space<vmem>>, %arg5: memref<16x256xbf16, #tpu.memory_space<vmem>>, %arg6: memref<16x256xbf16, #tpu.memory_space<vmem>>, %arg7: memref<2x256xf32, #tpu.memory_space<vmem>>, %arg8: memref<9x4x1xf32, #tpu.memory_space<vmem>>, %arg9: memref<4x1xf32, #tpu.memory_space<vmem>>, %arg10: memref<4x16xbf16, #tpu.memory_space<vmem>>, %arg11: memref<11x4x1xf32, #tpu.memory_space<vmem>>, %arg12: memref<4x1xf32, #tpu.memory_space<vmem>>, %arg13: memref<11x4x1xf32, #tpu.memory_space<vmem>>, %arg14: memref<4x1xf32, #tpu.memory_space<vmem>>, %arg15: memref<1x4x256xbf16, #tpu.memory_space<vmem>>, %arg16: memref<4x512xbf16, #tpu.memory_space<vmem>>, %arg17: memref<4x32xf32, #tpu.memory_space<vmem>>) attributes {dimension_semantics = [#tpu.dimension_semantics<parallel>, #tpu.dimension_semantics<parallel>], iteration_bounds = array<i64: 2, 1>, scalar_prefetch = 0 : i64, scratch_operands = 2 : i64, tpu.core_type = #tpu.core_type<tc>, window_params = [{transform_indices = @transform_0, window_bounds = array<i64: 1, 4, 256>}, {pipeline_mode = #tpu.pipeline_mode<synchronous>, transform_indices = @transform_1, window_bounds = array<i64: 256, 16>}, {pipeline_mode = #tpu.pipeline_mode<synchronous>, transform_indices = @transform_2, window_bounds = array<i64: 256, 16>}, {pipeline_mode = #tpu.pipeline_mode<synchronous>, transform_indices = @transform_3, window_bounds = array<i64: 16, 256>}, {pipeline_mode = #tpu.pipeline_mode<synchronous>, transform_indices = @transform_4, window_bounds = array<i64: 16, 256>}, {pipeline_mode = #tpu.pipeline_mode<synchronous>, transform_indices = @transform_5, window_bounds = array<i64: 2, 256>}, {transform_indices = @transform_6, window_bounds = array<i64: 9, 4, 1>}, {transform_indices = @transform_7, window_bounds = array<i64: 4, 1>}, {transform_indices = @transform_8, window_bounds = array<i64: 4, 16>}, {transform_indices = @transform_9, window_bounds = array<i64: 11, 4, 1>}, {transform_indices = @transform_10, window_bounds = array<i64: 4, 1>}, {transform_indices = @transform_11, window_bounds = array<i64: 11, 4, 1>}, {transform_indices = @transform_12, window_bounds = array<i64: 4, 1>}, {transform_indices = @transform_13, window_bounds = array<i64: 1, 4, 256>}]} {
    %c0 = arith.constant 0 : index
    %c0_0 = arith.constant 0 : index
    %c0_1 = arith.constant 0 : index
    %0 = vector.load %arg2[%c0, %c0_0, %c0_1] : memref<1x4x256xbf16, #tpu.memory_space<vmem>>, vector<1x4x256xbf16>
    %1 = vector.shape_cast %0 : vector<1x4x256xbf16> to vector<4x256xbf16>
    %cst = arith.constant 0.000000e+00 : bf16
    %2 = vector.broadcast %cst : bf16 to vector<4x128xbf16>
    %c0_2 = arith.constant 0 : index
    %c0_3 = arith.constant 0 : index
    %3 = vector.load %arg16[%c0_2, %c0_3] : memref<4x512xbf16, #tpu.memory_space<vmem>>, vector<4x128xbf16>
    tpu.vector_store %arg16[%c0_2, %c0_3], %2 {strides = array<i32>} : memref<4x512xbf16, #tpu.memory_space<vmem>>, vector<4x128xbf16>,
    %cst_4 = arith.constant 0.000000e+00 : bf16
    %4 = vector.broadcast %cst_4 : bf16 to vector<4x128xbf16>
    %c0_5 = arith.constant 0 : index
    %c384 = arith.constant 384 : index
    %5 = vector.load %arg16[%c0_5, %c384] : memref<4x512xbf16, #tpu.memory_space<vmem>>, vector<4x128xbf16>
    tpu.vector_store %arg16[%c0_5, %c384], %4 {strides = array<i32>} : memref<4x512xbf16, #tpu.memory_space<vmem>>, vector<4x128xbf16>,
    %c0_6 = arith.constant 0 : index
    %c128 = arith.constant 128 : index
    %6 = vector.load %arg16[%c0_6, %c128] : memref<4x512xbf16, #tpu.memory_space<vmem>>, vector<4x256xbf16>
    tpu.vector_store %arg16[%c0_6, %c128], %1 {strides = array<i32>} : memref<4x512xbf16, #tpu.memory_space<vmem>>, vector<4x256xbf16>,
    %c0_7 = arith.constant 0 : index
    %c0_8 = arith.constant 0 : index
    %7 = vector.load %arg7[%c0_7, %c0_8] : memref<2x256xf32, #tpu.memory_space<vmem>>, vector<2x256xf32>
    %8 = vector.extract_strided_slice %7 {offsets = [0, 0], sizes = [1, 256], strides = [1, 1]} : vector<2x256xf32> to vector<1x256xf32>
    %9 = vector.extract_strided_slice %7 {offsets = [1, 0], sizes = [1, 256], strides = [1, 1]} : vector<2x256xf32> to vector<1x256xf32>
    %c0_9 = arith.constant 0 : index
    %c0_10 = arith.constant 0 : index
    %c0_11 = arith.constant 0 : index
    %10 = vector.load %arg8[%c0_9, %c0_10, %c0_11] : memref<9x4x1xf32, #tpu.memory_space<vmem>>, vector<9x4x1xf32>
    %cst_12 = arith.constant 0.000000e+00 : f32
    %11 = vector.broadcast %cst_12 : f32 to vector<4x256xf32>
    %c0_13 = arith.constant 0 : index
    %c111 = arith.constant 111 : index
    %12 = vector.load %arg16[%c0_13, %c111] : memref<4x512xbf16, #tpu.memory_space<vmem>>, vector<4x256xbf16>
    %13 = arith.extf %12 : vector<4x256xbf16> to vector<4x256xf32>
    %14 = vector.broadcast %8 : vector<1x256xf32> to vector<4x256xf32>
    %15 = arith.mulf %13, %14 : vector<4x256xf32>
    %16 = vector.extract_strided_slice %10 {offsets = [0, 0, 0], sizes = [1, 4, 1], strides = [1, 1, 1]} : vector<9x4x1xf32> to vector<1x4x1xf32>
    %17 = vector.shape_cast %16 : vector<1x4x1xf32> to vector<4x1xf32>
    %18 = vector.broadcast %17 : vector<4x1xf32> to vector<4x256xf32>
    %19 = arith.mulf %18, %15 : vector<4x256xf32>
    %20 = arith.addf %11, %19 : vector<4x256xf32>
    %c0_14 = arith.constant 0 : index
    %c112 = arith.constant 112 : index
    %21 = vector.load %arg16[%c0_14, %c112] : memref<4x512xbf16, #tpu.memory_space<vmem>>, vector<4x256xbf16>
    %22 = vector.extract_strided_slice %10 {offsets = [1, 0, 0], sizes = [1, 4, 1], strides = [1, 1, 1]} : vector<9x4x1xf32> to vector<1x4x1xf32>
    %23 = vector.shape_cast %22 : vector<1x4x1xf32> to vector<4x1xf32>
    %24 = arith.extf %21 : vector<4x256xbf16> to vector<4x256xf32>
    %25 = vector.broadcast %23 : vector<4x1xf32> to vector<4x256xf32>
    %26 = arith.mulf %25, %24 : vector<4x256xf32>
    %27 = arith.addf %20, %26 : vector<4x256xf32>
    %c0_15 = arith.constant 0 : index
    %c113 = arith.constant 113 : index
    %28 = vector.load %arg16[%c0_15, %c113] : memref<4x512xbf16, #tpu.memory_space<vmem>>, vector<4x256xbf16>
    %29 = arith.extf %28 : vector<4x256xbf16> to vector<4x256xf32>
    %30 = vector.broadcast %9 : vector<1x256xf32> to vector<4x256xf32>
    %31 = arith.mulf %29, %30 : vector<4x256xf32>
    %32 = vector.extract_strided_slice %10 {offsets = [2, 0, 0], sizes = [1, 4, 1], strides = [1, 1, 1]} : vector<9x4x1xf32> to vector<1x4x1xf32>
    %33 = vector.shape_cast %32 : vector<1x4x1xf32> to vector<4x1xf32>
    %34 = vector.broadcast %33 : vector<4x1xf32> to vector<4x256xf32>
    %35 = arith.mulf %34, %31 : vector<4x256xf32>
    %36 = arith.addf %27, %35 : vector<4x256xf32>
    %c0_16 = arith.constant 0 : index
    %c127 = arith.constant 127 : index
    %37 = vector.load %arg16[%c0_16, %c127] : memref<4x512xbf16, #tpu.memory_space<vmem>>, vector<4x256xbf16>
    %38 = arith.extf %37 : vector<4x256xbf16> to vector<4x256xf32>
    %39 = vector.broadcast %8 : vector<1x256xf32> to vector<4x256xf32>
    %40 = arith.mulf %38, %39 : vector<4x256xf32>
    %41 = vector.extract_strided_slice %10 {offsets = [3, 0, 0], sizes = [1, 4, 1], strides = [1, 1, 1]} : vector<9x4x1xf32> to vector<1x4x1xf32>
    %42 = vector.shape_cast %41 : vector<1x4x1xf32> to vector<4x1xf32>
    %43 = vector.broadcast %42 : vector<4x1xf32> to vector<4x256xf32>
    %44 = arith.mulf %43, %40 : vector<4x256xf32>
    %45 = arith.addf %36, %44 : vector<4x256xf32>
    %c0_17 = arith.constant 0 : index
    %c128_18 = arith.constant 128 : index
    %46 = vector.load %arg16[%c0_17, %c128_18] : memref<4x512xbf16, #tpu.memory_space<vmem>>, vector<4x256xbf16>
    %47 = vector.extract_strided_slice %10 {offsets = [4, 0, 0], sizes = [1, 4, 1], strides = [1, 1, 1]} : vector<9x4x1xf32> to vector<1x4x1xf32>
    %48 = vector.shape_cast %47 : vector<1x4x1xf32> to vector<4x1xf32>
    %49 = arith.extf %46 : vector<4x256xbf16> to vector<4x256xf32>
    %50 = vector.broadcast %48 : vector<4x1xf32> to vector<4x256xf32>
    %51 = arith.mulf %50, %49 : vector<4x256xf32>
    %52 = arith.addf %45, %51 : vector<4x256xf32>
    %c0_19 = arith.constant 0 : index
    %c129 = arith.constant 129 : index
    %53 = vector.load %arg16[%c0_19, %c129] : memref<4x512xbf16, #tpu.memory_space<vmem>>, vector<4x256xbf16>
    %54 = arith.extf %53 : vector<4x256xbf16> to vector<4x256xf32>
    %55 = vector.broadcast %9 : vector<1x256xf32> to vector<4x256xf32>
    %56 = arith.mulf %54, %55 : vector<4x256xf32>
    %57 = vector.extract_strided_slice %10 {offsets = [5, 0, 0], sizes = [1, 4, 1], strides = [1, 1, 1]} : vector<9x4x1xf32> to vector<1x4x1xf32>
    %58 = vector.shape_cast %57 : vector<1x4x1xf32> to vector<4x1xf32>
    %59 = vector.broadcast %58 : vector<4x1xf32> to vector<4x256xf32>
    %60 = arith.mulf %59, %56 : vector<4x256xf32>
    %61 = arith.addf %52, %60 : vector<4x256xf32>
    %c0_20 = arith.constant 0 : index
    %c143 = arith.constant 143 : index
    %62 = vector.load %arg16[%c0_20, %c143] : memref<4x512xbf16, #tpu.memory_space<vmem>>, vector<4x256xbf16>
    %63 = arith.extf %62 : vector<4x256xbf16> to vector<4x256xf32>
    %64 = vector.broadcast %8 : vector<1x256xf32> to vector<4x256xf32>
    %65 = arith.mulf %63, %64 : vector<4x256xf32>
    %66 = vector.extract_strided_slice %10 {offsets = [6, 0, 0], sizes = [1, 4, 1], strides = [1, 1, 1]} : vector<9x4x1xf32> to vector<1x4x1xf32>
    %67 = vector.shape_cast %66 : vector<1x4x1xf32> to vector<4x1xf32>
    %68 = vector.broadcast %67 : vector<4x1xf32> to vector<4x256xf32>
    %69 = arith.mulf %68, %65 : vector<4x256xf32>
    %70 = arith.addf %61, %69 : vector<4x256xf32>
    %c0_21 = arith.constant 0 : index
    %c144 = arith.constant 144 : index
    %71 = vector.load %arg16[%c0_21, %c144] : memref<4x512xbf16, #tpu.memory_space<vmem>>, vector<4x256xbf16>
    %72 = vector.extract_strided_slice %10 {offsets = [7, 0, 0], sizes = [1, 4, 1], strides = [1, 1, 1]} : vector<9x4x1xf32> to vector<1x4x1xf32>
    %73 = vector.shape_cast %72 : vector<1x4x1xf32> to vector<4x1xf32>
    %74 = arith.extf %71 : vector<4x256xbf16> to vector<4x256xf32>
    %75 = vector.broadcast %73 : vector<4x1xf32> to vector<4x256xf32>
    %76 = arith.mulf %75, %74 : vector<4x256xf32>
    %77 = arith.addf %70, %76 : vector<4x256xf32>
    %c0_22 = arith.constant 0 : index
    %c145 = arith.constant 145 : index
    %78 = vector.load %arg16[%c0_22, %c145] : memref<4x512xbf16, #tpu.memory_space<vmem>>, vector<4x256xbf16>
    %79 = arith.extf %78 : vector<4x256xbf16> to vector<4x256xf32>
    %80 = vector.broadcast %9 : vector<1x256xf32> to vector<4x256xf32>
    %81 = arith.mulf %79, %80 : vector<4x256xf32>
    %82 = vector.extract_strided_slice %10 {offsets = [8, 0, 0], sizes = [1, 4, 1], strides = [1, 1, 1]} : vector<9x4x1xf32> to vector<1x4x1xf32>
    %83 = vector.shape_cast %82 : vector<1x4x1xf32> to vector<4x1xf32>
    %84 = vector.broadcast %83 : vector<4x1xf32> to vector<4x256xf32>
    %85 = arith.mulf %84, %81 : vector<4x256xf32>
    %86 = arith.addf %77, %85 : vector<4x256xf32>
    %c0_23 = arith.constant 0 : index
    %c0_24 = arith.constant 0 : index
    %87 = vector.load %arg9[%c0_23, %c0_24] : memref<4x1xf32, #tpu.memory_space<vmem>>, vector<4x1xf32>
    %88 = vector.broadcast %87 : vector<4x1xf32> to vector<4x256xf32>
    %89 = arith.addf %86, %88 : vector<4x256xf32>
    %c0_25 = arith.constant 0 : index
    %c0_26 = arith.constant 0 : index
    %90 = vector.load %arg3[%c0_25, %c0_26] : memref<256x16xbf16, #tpu.memory_space<vmem>>, vector<256x16xbf16>
    %cst_27 = arith.constant dense<0.000000e+00> : vector<4x16xf32>
    %91 = tpu.matmul %1, %90, %cst_27 {dimension_numbers = #tpu.dot_dimension_numbers<[1], [0], [0], [1], [0, 0, 1, 1], [], []>} : vector<4x256xbf16>, vector<256x16xbf16>, vector<4x16xf32> -> vector<4x16xf32>
    %cst_28 = arith.constant 6.250000e-02 : f32
    %92 = vector.broadcast %cst_28 : f32 to vector<4x16xf32>
    %93 = arith.mulf %91, %92 : vector<4x16xf32>
    %c0_29 = arith.constant 0 : index
    %c0_30 = arith.constant 0 : index
    %94 = vector.load %arg4[%c0_29, %c0_30] : memref<256x16xbf16, #tpu.memory_space<vmem>>, vector<256x16xbf16>
    %cst_31 = arith.constant dense<0.000000e+00> : vector<4x16xf32>
    %95 = tpu.matmul %1, %94, %cst_31 {dimension_numbers = #tpu.dot_dimension_numbers<[1], [0], [0], [1], [0, 0, 1, 1], [], []>} : vector<4x256xbf16>, vector<256x16xbf16>, vector<4x16xf32> -> vector<4x16xf32>
    %cst_32 = arith.constant 6.250000e-02 : f32
    %96 = vector.broadcast %cst_32 : f32 to vector<4x16xf32>
    %97 = arith.mulf %95, %96 : vector<4x16xf32>
    %c0_33 = arith.constant 0 : index
    %c0_34 = arith.constant 0 : index
    %c0_35 = arith.constant 0 : index
    %98 = vector.load %arg11[%c0_33, %c0_34, %c0_35] : memref<11x4x1xf32, #tpu.memory_space<vmem>>, vector<11x4x1xf32>
    %cst_36 = arith.constant 0.000000e+00 : f32
    %99 = vector.broadcast %cst_36 : f32 to vector<4x32xf32>
    %c0_37 = arith.constant 0 : index
    %c0_38 = arith.constant 0 : index
    %100 = vector.load %arg17[%c0_37, %c0_38] : memref<4x32xf32, #tpu.memory_space<vmem>>, vector<4x32xf32>
    tpu.vector_store %arg17[%c0_37, %c0_38], %99 {strides = array<i32>} : memref<4x32xf32, #tpu.memory_space<vmem>>, vector<4x32xf32>,
    %c0_39 = arith.constant 0 : index
    %c8 = arith.constant 8 : index
    %101 = vector.load %arg17[%c0_39, %c8] : memref<4x32xf32, #tpu.memory_space<vmem>>, vector<4x16xf32>
    tpu.vector_store %arg17[%c0_39, %c8], %97 {strides = array<i32>} : memref<4x32xf32, #tpu.memory_space<vmem>>, vector<4x16xf32>,
    %cst_40 = arith.constant 0.000000e+00 : f32
    %102 = vector.broadcast %cst_40 : f32 to vector<4x16xf32>
    %103 = vector.extract_strided_slice %98 {offsets = [0, 0, 0], sizes = [1, 4, 1], strides = [1, 1, 1]} : vector<11x4x1xf32> to vector<1x4x1xf32>
    %104 = vector.shape_cast %103 : vector<1x4x1xf32> to vector<4x1xf32>
    %c0_41 = arith.constant 0 : index
    %c3 = arith.constant 3 : index
    %105 = vector.load %arg17[%c0_41, %c3] : memref<4x32xf32, #tpu.memory_space<vmem>>, vector<4x16xf32>
    %106 = vector.broadcast %104 : vector<4x1xf32> to vector<4x16xf32>
    %107 = arith.mulf %106, %105 : vector<4x16xf32>
    %108 = arith.addf %102, %107 : vector<4x16xf32>
    %109 = vector.extract_strided_slice %98 {offsets = [1, 0, 0], sizes = [1, 4, 1], strides = [1, 1, 1]} : vector<11x4x1xf32> to vector<1x4x1xf32>
    %110 = vector.shape_cast %109 : vector<1x4x1xf32> to vector<4x1xf32>
    %c0_42 = arith.constant 0 : index
    %c4 = arith.constant 4 : index
    %111 = vector.load %arg17[%c0_42, %c4] : memref<4x32xf32, #tpu.memory_space<vmem>>, vector<4x16xf32>
    %112 = vector.broadcast %110 : vector<4x1xf32> to vector<4x16xf32>
    %113 = arith.mulf %112, %111 : vector<4x16xf32>
    %114 = arith.addf %108, %113 : vector<4x16xf32>
    %115 = vector.extract_strided_slice %98 {offsets = [2, 0, 0], sizes = [1, 4, 1], strides = [1, 1, 1]} : vector<11x4x1xf32> to vector<1x4x1xf32>
    %116 = vector.shape_cast %115 : vector<1x4x1xf32> to vector<4x1xf32>
    %c0_43 = arith.constant 0 : index
    %c5 = arith.constant 5 : index
    %117 = vector.load %arg17[%c0_43, %c5] : memref<4x32xf32, #tpu.memory_space<vmem>>, vector<4x16xf32>
    %118 = vector.broadcast %116 : vector<4x1xf32> to vector<4x16xf32>
    %119 = arith.mulf %118, %117 : vector<4x16xf32>
    %120 = arith.addf %114, %119 : vector<4x16xf32>
    %121 = vector.extract_strided_slice %98 {offsets = [3, 0, 0], sizes = [1, 4, 1], strides = [1, 1, 1]} : vector<11x4x1xf32> to vector<1x4x1xf32>
    %122 = vector.shape_cast %121 : vector<1x4x1xf32> to vector<4x1xf32>
    %c0_44 = arith.constant 0 : index
    %c6 = arith.constant 6 : index
    %123 = vector.load %arg17[%c0_44, %c6] : memref<4x32xf32, #tpu.memory_space<vmem>>, vector<4x16xf32>
    %124 = vector.broadcast %122 : vector<4x1xf32> to vector<4x16xf32>
    %125 = arith.mulf %124, %123 : vector<4x16xf32>
    %126 = arith.addf %120, %125 : vector<4x16xf32>
    %127 = vector.extract_strided_slice %98 {offsets = [4, 0, 0], sizes = [1, 4, 1], strides = [1, 1, 1]} : vector<11x4x1xf32> to vector<1x4x1xf32>
    %128 = vector.shape_cast %127 : vector<1x4x1xf32> to vector<4x1xf32>
    %c0_45 = arith.constant 0 : index
    %c7 = arith.constant 7 : index
    %129 = vector.load %arg17[%c0_45, %c7] : memref<4x32xf32, #tpu.memory_space<vmem>>, vector<4x16xf32>
    %130 = vector.broadcast %128 : vector<4x1xf32> to vector<4x16xf32>
    %131 = arith.mulf %130, %129 : vector<4x16xf32>
    %132 = arith.addf %126, %131 : vector<4x16xf32>
    %133 = vector.extract_strided_slice %98 {offsets = [5, 0, 0], sizes = [1, 4, 1], strides = [1, 1, 1]} : vector<11x4x1xf32> to vector<1x4x1xf32>
    %134 = vector.shape_cast %133 : vector<1x4x1xf32> to vector<4x1xf32>
    %c0_46 = arith.constant 0 : index
    %c8_47 = arith.constant 8 : index
    %135 = vector.load %arg17[%c0_46, %c8_47] : memref<4x32xf32, #tpu.memory_space<vmem>>, vector<4x16xf32>
    %136 = vector.broadcast %134 : vector<4x1xf32> to vector<4x16xf32>
    %137 = arith.mulf %136, %135 : vector<4x16xf32>
    %138 = arith.addf %132, %137 : vector<4x16xf32>
    %139 = vector.extract_strided_slice %98 {offsets = [6, 0, 0], sizes = [1, 4, 1], strides = [1, 1, 1]} : vector<11x4x1xf32> to vector<1x4x1xf32>
    %140 = vector.shape_cast %139 : vector<1x4x1xf32> to vector<4x1xf32>
    %c0_48 = arith.constant 0 : index
    %c9 = arith.constant 9 : index
    %141 = vector.load %arg17[%c0_48, %c9] : memref<4x32xf32, #tpu.memory_space<vmem>>, vector<4x16xf32>
    %142 = vector.broadcast %140 : vector<4x1xf32> to vector<4x16xf32>
    %143 = arith.mulf %142, %141 : vector<4x16xf32>
    %144 = arith.addf %138, %143 : vector<4x16xf32>
    %145 = vector.extract_strided_slice %98 {offsets = [7, 0, 0], sizes = [1, 4, 1], strides = [1, 1, 1]} : vector<11x4x1xf32> to vector<1x4x1xf32>
    %146 = vector.shape_cast %145 : vector<1x4x1xf32> to vector<4x1xf32>
    %c0_49 = arith.constant 0 : index
    %c10 = arith.constant 10 : index
    %147 = vector.load %arg17[%c0_49, %c10] : memref<4x32xf32, #tpu.memory_space<vmem>>, vector<4x16xf32>
    %148 = vector.broadcast %146 : vector<4x1xf32> to vector<4x16xf32>
    %149 = arith.mulf %148, %147 : vector<4x16xf32>
    %150 = arith.addf %144, %149 : vector<4x16xf32>
    %151 = vector.extract_strided_slice %98 {offsets = [8, 0, 0], sizes = [1, 4, 1], strides = [1, 1, 1]} : vector<11x4x1xf32> to vector<1x4x1xf32>
    %152 = vector.shape_cast %151 : vector<1x4x1xf32> to vector<4x1xf32>
    %c0_50 = arith.constant 0 : index
    %c11 = arith.constant 11 : index
    %153 = vector.load %arg17[%c0_50, %c11] : memref<4x32xf32, #tpu.memory_space<vmem>>, vector<4x16xf32>
    %154 = vector.broadcast %152 : vector<4x1xf32> to vector<4x16xf32>
    %155 = arith.mulf %154, %153 : vector<4x16xf32>
    %156 = arith.addf %150, %155 : vector<4x16xf32>
    %157 = vector.extract_strided_slice %98 {offsets = [9, 0, 0], sizes = [1, 4, 1], strides = [1, 1, 1]} : vector<11x4x1xf32> to vector<1x4x1xf32>
    %158 = vector.shape_cast %157 : vector<1x4x1xf32> to vector<4x1xf32>
    %c0_51 = arith.constant 0 : index
    %c12 = arith.constant 12 : index
    %159 = vector.load %arg17[%c0_51, %c12] : memref<4x32xf32, #tpu.memory_space<vmem>>, vector<4x16xf32>
    %160 = vector.broadcast %158 : vector<4x1xf32> to vector<4x16xf32>
    %161 = arith.mulf %160, %159 : vector<4x16xf32>
    %162 = arith.addf %156, %161 : vector<4x16xf32>
    %163 = vector.extract_strided_slice %98 {offsets = [10, 0, 0], sizes = [1, 4, 1], strides = [1, 1, 1]} : vector<11x4x1xf32> to vector<1x4x1xf32>
    %164 = vector.shape_cast %163 : vector<1x4x1xf32> to vector<4x1xf32>
    %c0_52 = arith.constant 0 : index
    %c13 = arith.constant 13 : index
    %165 = vector.load %arg17[%c0_52, %c13] : memref<4x32xf32, #tpu.memory_space<vmem>>, vector<4x16xf32>
    %166 = vector.broadcast %164 : vector<4x1xf32> to vector<4x16xf32>
    %167 = arith.mulf %166, %165 : vector<4x16xf32>
    %168 = arith.addf %162, %167 : vector<4x16xf32>
    %c0_53 = arith.constant 0 : index
    %c0_54 = arith.constant 0 : index
    %169 = vector.load %arg12[%c0_53, %c0_54] : memref<4x1xf32, #tpu.memory_space<vmem>>, vector<4x1xf32>
    %170 = vector.broadcast %169 : vector<4x1xf32> to vector<4x16xf32>
    %171 = arith.addf %168, %170 : vector<4x16xf32>
    %172 = arith.truncf %93 : vector<4x16xf32> to vector<4x16xbf16>
    %c0_55 = arith.constant 0 : index
    %c0_56 = arith.constant 0 : index
    %173 = vector.load %arg5[%c0_55, %c0_56] : memref<16x256xbf16, #tpu.memory_space<vmem>>, vector<16x256xbf16>
    %cst_57 = arith.constant dense<0.000000e+00> : vector<4x256xf32>
    %174 = tpu.matmul %172, %173, %cst_57 {dimension_numbers = #tpu.dot_dimension_numbers<[1], [0], [0], [1], [0, 0, 1, 1], [], []>} : vector<4x16xbf16>, vector<16x256xbf16>, vector<4x256xf32> -> vector<4x256xf32>
    %c0_58 = arith.constant 0 : index
    %c0_59 = arith.constant 0 : index
    %175 = vector.load %arg10[%c0_58, %c0_59] : memref<4x16xbf16, #tpu.memory_space<vmem>>, vector<4x16xbf16>
    %c0_60 = arith.constant 0 : index
    %c0_61 = arith.constant 0 : index
    %176 = vector.load %arg6[%c0_60, %c0_61] : memref<16x256xbf16, #tpu.memory_space<vmem>>, vector<16x256xbf16>
    %cst_62 = arith.constant dense<0.000000e+00> : vector<4x256xf32>
    %177 = tpu.matmul %175, %176, %cst_62 {dimension_numbers = #tpu.dot_dimension_numbers<[1], [0], [0], [1], [0, 0, 1, 1], [], []>} : vector<4x16xbf16>, vector<16x256xbf16>, vector<4x256xf32> -> vector<4x256xf32>
    %178 = arith.truncf %171 : vector<4x16xf32> to vector<4x16xbf16>
    %c0_63 = arith.constant 0 : index
    %c0_64 = arith.constant 0 : index
    %179 = vector.load %arg6[%c0_63, %c0_64] : memref<16x256xbf16, #tpu.memory_space<vmem>>, vector<16x256xbf16>
    %cst_65 = arith.constant dense<0.000000e+00> : vector<4x256xf32>
    %180 = tpu.matmul %178, %179, %cst_65 {dimension_numbers = #tpu.dot_dimension_numbers<[1], [0], [0], [1], [0, 0, 1, 1], [], []>} : vector<4x16xbf16>, vector<16x256xbf16>, vector<4x256xf32> -> vector<4x256xf32>
    %181 = arith.mulf %174, %177 : vector<4x256xf32>
    %182 = arith.addf %181, %180 : vector<4x256xf32>
    %cst_66 = arith.constant 0.000000e+00 : f32
    %183 = vector.broadcast %cst_66 : f32 to vector<4x256xf32>
    %184 = arith.maximumf %182, %183 : vector<4x256xf32>
    %185 = arith.truncf %184 : vector<4x256xf32> to vector<4x256xbf16>
    %c0_67 = arith.constant 0 : index
    %c128_68 = arith.constant 128 : index
    %186 = vector.load %arg16[%c0_67, %c128_68] : memref<4x512xbf16, #tpu.memory_space<vmem>>, vector<4x256xbf16>
    tpu.vector_store %arg16[%c0_67, %c128_68], %185 {strides = array<i32>} : memref<4x512xbf16, #tpu.memory_space<vmem>>, vector<4x256xbf16>,
    %c0_69 = arith.constant 0 : index
    %c0_70 = arith.constant 0 : index
    %c0_71 = arith.constant 0 : index
    %187 = vector.load %arg13[%c0_69, %c0_70, %c0_71] : memref<11x4x1xf32, #tpu.memory_space<vmem>>, vector<11x4x1xf32>
    %cst_72 = arith.constant 0.000000e+00 : f32
    %188 = vector.broadcast %cst_72 : f32 to vector<4x256xf32>
    %189 = vector.extract_strided_slice %187 {offsets = [0, 0, 0], sizes = [1, 4, 1], strides = [1, 1, 1]} : vector<11x4x1xf32> to vector<1x4x1xf32>
    %190 = vector.shape_cast %189 : vector<1x4x1xf32> to vector<4x1xf32>
    %c0_73 = arith.constant 0 : index
    %c48 = arith.constant 48 : index
    %191 = vector.load %arg16[%c0_73, %c48] : memref<4x512xbf16, #tpu.memory_space<vmem>>, vector<4x256xbf16>
    %192 = arith.extf %191 : vector<4x256xbf16> to vector<4x256xf32>
    %193 = vector.broadcast %190 : vector<4x1xf32> to vector<4x256xf32>
    %194 = arith.mulf %193, %192 : vector<4x256xf32>
    %195 = arith.addf %188, %194 : vector<4x256xf32>
    %196 = vector.extract_strided_slice %187 {offsets = [1, 0, 0], sizes = [1, 4, 1], strides = [1, 1, 1]} : vector<11x4x1xf32> to vector<1x4x1xf32>
    %197 = vector.shape_cast %196 : vector<1x4x1xf32> to vector<4x1xf32>
    %c0_74 = arith.constant 0 : index
    %c64 = arith.constant 64 : index
    %198 = vector.load %arg16[%c0_74, %c64] : memref<4x512xbf16, #tpu.memory_space<vmem>>, vector<4x256xbf16>
    %199 = arith.extf %198 : vector<4x256xbf16> to vector<4x256xf32>
    %200 = vector.broadcast %197 : vector<4x1xf32> to vector<4x256xf32>
    %201 = arith.mulf %200, %199 : vector<4x256xf32>
    %202 = arith.addf %195, %201 : vector<4x256xf32>
    %203 = vector.extract_strided_slice %187 {offsets = [2, 0, 0], sizes = [1, 4, 1], strides = [1, 1, 1]} : vector<11x4x1xf32> to vector<1x4x1xf32>
    %204 = vector.shape_cast %203 : vector<1x4x1xf32> to vector<4x1xf32>
    %c0_75 = arith.constant 0 : index
    %c80 = arith.constant 80 : index
    %205 = vector.load %arg16[%c0_75, %c80] : memref<4x512xbf16, #tpu.memory_space<vmem>>, vector<4x256xbf16>
    %206 = arith.extf %205 : vector<4x256xbf16> to vector<4x256xf32>
    %207 = vector.broadcast %204 : vector<4x1xf32> to vector<4x256xf32>
    %208 = arith.mulf %207, %206 : vector<4x256xf32>
    %209 = arith.addf %202, %208 : vector<4x256xf32>
    %210 = vector.extract_strided_slice %187 {offsets = [3, 0, 0], sizes = [1, 4, 1], strides = [1, 1, 1]} : vector<11x4x1xf32> to vector<1x4x1xf32>
    %211 = vector.shape_cast %210 : vector<1x4x1xf32> to vector<4x1xf32>
    %c0_76 = arith.constant 0 : index
    %c96 = arith.constant 96 : index
    %212 = vector.load %arg16[%c0_76, %c96] : memref<4x512xbf16, #tpu.memory_space<vmem>>, vector<4x256xbf16>
    %213 = arith.extf %212 : vector<4x256xbf16> to vector<4x256xf32>
    %214 = vector.broadcast %211 : vector<4x1xf32> to vector<4x256xf32>
    %215 = arith.mulf %214, %213 : vector<4x256xf32>
    %216 = arith.addf %209, %215 : vector<4x256xf32>
    %217 = vector.extract_strided_slice %187 {offsets = [4, 0, 0], sizes = [1, 4, 1], strides = [1, 1, 1]} : vector<11x4x1xf32> to vector<1x4x1xf32>
    %218 = vector.shape_cast %217 : vector<1x4x1xf32> to vector<4x1xf32>
    %c0_77 = arith.constant 0 : index
    %c112_78 = arith.constant 112 : index
    %219 = vector.load %arg16[%c0_77, %c112_78] : memref<4x512xbf16, #tpu.memory_space<vmem>>, vector<4x256xbf16>
    %220 = arith.extf %219 : vector<4x256xbf16> to vector<4x256xf32>
    %221 = vector.broadcast %218 : vector<4x1xf32> to vector<4x256xf32>
    %222 = arith.mulf %221, %220 : vector<4x256xf32>
    %223 = arith.addf %216, %222 : vector<4x256xf32>
    %224 = vector.extract_strided_slice %187 {offsets = [5, 0, 0], sizes = [1, 4, 1], strides = [1, 1, 1]} : vector<11x4x1xf32> to vector<1x4x1xf32>
    %225 = vector.shape_cast %224 : vector<1x4x1xf32> to vector<4x1xf32>
    %c0_79 = arith.constant 0 : index
    %c128_80 = arith.constant 128 : index
    %226 = vector.load %arg16[%c0_79, %c128_80] : memref<4x512xbf16, #tpu.memory_space<vmem>>, vector<4x256xbf16>
    %227 = arith.extf %226 : vector<4x256xbf16> to vector<4x256xf32>
    %228 = vector.broadcast %225 : vector<4x1xf32> to vector<4x256xf32>
    %229 = arith.mulf %228, %227 : vector<4x256xf32>
    %230 = arith.addf %223, %229 : vector<4x256xf32>
    %231 = vector.extract_strided_slice %187 {offsets = [6, 0, 0], sizes = [1, 4, 1], strides = [1, 1, 1]} : vector<11x4x1xf32> to vector<1x4x1xf32>
    %232 = vector.shape_cast %231 : vector<1x4x1xf32> to vector<4x1xf32>
    %c0_81 = arith.constant 0 : index
    %c144_82 = arith.constant 144 : index
    %233 = vector.load %arg16[%c0_81, %c144_82] : memref<4x512xbf16, #tpu.memory_space<vmem>>, vector<4x256xbf16>
    %234 = arith.extf %233 : vector<4x256xbf16> to vector<4x256xf32>
    %235 = vector.broadcast %232 : vector<4x1xf32> to vector<4x256xf32>
    %236 = arith.mulf %235, %234 : vector<4x256xf32>
    %237 = arith.addf %230, %236 : vector<4x256xf32>
    %238 = vector.extract_strided_slice %187 {offsets = [7, 0, 0], sizes = [1, 4, 1], strides = [1, 1, 1]} : vector<11x4x1xf32> to vector<1x4x1xf32>
    %239 = vector.shape_cast %238 : vector<1x4x1xf32> to vector<4x1xf32>
    %c0_83 = arith.constant 0 : index
    %c160 = arith.constant 160 : index
    %240 = vector.load %arg16[%c0_83, %c160] : memref<4x512xbf16, #tpu.memory_space<vmem>>, vector<4x256xbf16>
    %241 = arith.extf %240 : vector<4x256xbf16> to vector<4x256xf32>
    %242 = vector.broadcast %239 : vector<4x1xf32> to vector<4x256xf32>
    %243 = arith.mulf %242, %241 : vector<4x256xf32>
    %244 = arith.addf %237, %243 : vector<4x256xf32>
    %245 = vector.extract_strided_slice %187 {offsets = [8, 0, 0], sizes = [1, 4, 1], strides = [1, 1, 1]} : vector<11x4x1xf32> to vector<1x4x1xf32>
    %246 = vector.shape_cast %245 : vector<1x4x1xf32> to vector<4x1xf32>
    %c0_84 = arith.constant 0 : index
    %c176 = arith.constant 176 : index
    %247 = vector.load %arg16[%c0_84, %c176] : memref<4x512xbf16, #tpu.memory_space<vmem>>, vector<4x256xbf16>
    %248 = arith.extf %247 : vector<4x256xbf16> to vector<4x256xf32>
    %249 = vector.broadcast %246 : vector<4x1xf32> to vector<4x256xf32>
    %250 = arith.mulf %249, %248 : vector<4x256xf32>
    %251 = arith.addf %244, %250 : vector<4x256xf32>
    %252 = vector.extract_strided_slice %187 {offsets = [9, 0, 0], sizes = [1, 4, 1], strides = [1, 1, 1]} : vector<11x4x1xf32> to vector<1x4x1xf32>
    %253 = vector.shape_cast %252 : vector<1x4x1xf32> to vector<4x1xf32>
    %c0_85 = arith.constant 0 : index
    %c192 = arith.constant 192 : index
    %254 = vector.load %arg16[%c0_85, %c192] : memref<4x512xbf16, #tpu.memory_space<vmem>>, vector<4x256xbf16>
    %255 = arith.extf %254 : vector<4x256xbf16> to vector<4x256xf32>
    %256 = vector.broadcast %253 : vector<4x1xf32> to vector<4x256xf32>
    %257 = arith.mulf %256, %255 : vector<4x256xf32>
    %258 = arith.addf %251, %257 : vector<4x256xf32>
    %259 = vector.extract_strided_slice %187 {offsets = [10, 0, 0], sizes = [1, 4, 1], strides = [1, 1, 1]} : vector<11x4x1xf32> to vector<1x4x1xf32>
    %260 = vector.shape_cast %259 : vector<1x4x1xf32> to vector<4x1xf32>
    %c0_86 = arith.constant 0 : index
    %c208 = arith.constant 208 : index
    %261 = vector.load %arg16[%c0_86, %c208] : memref<4x512xbf16, #tpu.memory_space<vmem>>, vector<4x256xbf16>
    %262 = arith.extf %261 : vector<4x256xbf16> to vector<4x256xf32>
    %263 = vector.broadcast %260 : vector<4x1xf32> to vector<4x256xf32>
    %264 = arith.mulf %263, %262 : vector<4x256xf32>
    %265 = arith.addf %258, %264 : vector<4x256xf32>
    %c0_87 = arith.constant 0 : index
    %c0_88 = arith.constant 0 : index
    %266 = vector.load %arg14[%c0_87, %c0_88] : memref<4x1xf32, #tpu.memory_space<vmem>>, vector<4x1xf32>
    %267 = vector.broadcast %266 : vector<4x1xf32> to vector<4x256xf32>
    %268 = arith.addf %265, %267 : vector<4x256xf32>
    %269 = arith.negf %268 : vector<4x256xf32>
    %270 = math.exp %269 : vector<4x256xf32>
    %cst_89 = arith.constant 1.000000e+00 : f32
    %271 = vector.broadcast %cst_89 : f32 to vector<4x256xf32>
    %272 = arith.addf %271, %270 : vector<4x256xf32>
    %273 = arith.divf %271, %272 : vector<4x256xf32>
    %274 = arith.mulf %273, %89 : vector<4x256xf32>
    %275 = arith.truncf %274 : vector<4x256xf32> to vector<4x256xbf16>
    %c0_90 = arith.constant 0 : index
    %c0_91 = arith.constant 0 : index
    %c0_92 = arith.constant 0 : index
    %276 = vector.load %arg15[%c0_90, %c0_91, %c0_92] : memref<1x4x256xbf16, #tpu.memory_space<vmem>>, vector<1x4x256xbf16>
    %277 = vector.shape_cast %276 : vector<1x4x256xbf16> to vector<4x256xbf16>
    %278 = vector.shape_cast %275 : vector<4x256xbf16> to vector<1x4x256xbf16>
    tpu.vector_store %arg15[%c0_90, %c0_91, %c0_92], %278 {strides = array<i32>} : memref<1x4x256xbf16, #tpu.memory_space<vmem>>, vector<1x4x256xbf16>,
    return
  }
  func.func @transform_0(%arg0: i32, %arg1: i32) -> (i32, i32, i32) {
    %c0_i32 = arith.constant 0 : i32
    %c0_i32_0 = arith.constant 0 : i32
    return %arg0, %arg1, %c0_i32 : i32, i32, i32
  }
  func.func @transform_1(%arg0: i32, %arg1: i32) -> (i32, i32) {
    %c0_i32 = arith.constant 0 : i32
    %c0_i32_0 = arith.constant 0 : i32
    %c0_i32_1 = arith.constant 0 : i32
    return %c0_i32, %c0_i32_0 : i32, i32
  }
  func.func @transform_2(%arg0: i32, %arg1: i32) -> (i32, i32) {
    %c0_i32 = arith.constant 0 : i32
    %c0_i32_0 = arith.constant 0 : i32
    %c0_i32_1 = arith.constant 0 : i32
    return %c0_i32, %c0_i32_0 : i32, i32
  }
  func.func @transform_3(%arg0: i32, %arg1: i32) -> (i32, i32) {
    %c0_i32 = arith.constant 0 : i32
    %c0_i32_0 = arith.constant 0 : i32
    %c0_i32_1 = arith.constant 0 : i32
    return %c0_i32, %c0_i32_0 : i32, i32
  }
  func.func @transform_4(%arg0: i32, %arg1: i32) -> (i32, i32) {
    %c0_i32 = arith.constant 0 : i32
    %c0_i32_0 = arith.constant 0 : i32
    %c0_i32_1 = arith.constant 0 : i32
    return %c0_i32, %c0_i32_0 : i32, i32
  }
  func.func @transform_5(%arg0: i32, %arg1: i32) -> (i32, i32) {
    %c0_i32 = arith.constant 0 : i32
    %c0_i32_0 = arith.constant 0 : i32
    %c0_i32_1 = arith.constant 0 : i32
    return %c0_i32, %c0_i32_0 : i32, i32
  }
  func.func @transform_6(%arg0: i32, %arg1: i32) -> (i32, i32, i32) {
    %c0_i32 = arith.constant 0 : i32
    %c0_i32_0 = arith.constant 0 : i32
    %c0_i32_1 = arith.constant 0 : i32
    return %c0_i32, %arg1, %c0_i32_0 : i32, i32, i32
  }
  func.func @transform_7(%arg0: i32, %arg1: i32) -> (i32, i32) {
    %c0_i32 = arith.constant 0 : i32
    %c0_i32_0 = arith.constant 0 : i32
    return %arg1, %c0_i32 : i32, i32
  }
  func.func @transform_8(%arg0: i32, %arg1: i32) -> (i32, i32) {
    %c0_i32 = arith.constant 0 : i32
    %c0_i32_0 = arith.constant 0 : i32
    return %arg1, %c0_i32 : i32, i32
  }
  func.func @transform_9(%arg0: i32, %arg1: i32) -> (i32, i32, i32) {
    %c0_i32 = arith.constant 0 : i32
    %c0_i32_0 = arith.constant 0 : i32
    %c0_i32_1 = arith.constant 0 : i32
    return %c0_i32, %arg1, %c0_i32_0 : i32, i32, i32
  }
  func.func @transform_10(%arg0: i32, %arg1: i32) -> (i32, i32) {
    %c0_i32 = arith.constant 0 : i32
    %c0_i32_0 = arith.constant 0 : i32
    return %arg1, %c0_i32 : i32, i32
  }
  func.func @transform_11(%arg0: i32, %arg1: i32) -> (i32, i32, i32) {
    %c0_i32 = arith.constant 0 : i32
    %c0_i32_0 = arith.constant 0 : i32
    %c0_i32_1 = arith.constant 0 : i32
    return %c0_i32, %arg1, %c0_i32_0 : i32, i32, i32
  }
  func.func @transform_12(%arg0: i32, %arg1: i32) -> (i32, i32) {
    %c0_i32 = arith.constant 0 : i32
    %c0_i32_0 = arith.constant 0 : i32
    return %arg1, %c0_i32 : i32, i32
  }
  func.func @transform_13(%arg0: i32, %arg1: i32) -> (i32, i32, i32) {
    %c0_i32 = arith.constant 0 : i32
    %c0_i32_0 = arith.constant 0 : i32
    return %arg0, %arg1, %c0_i32 : i32, i32, i32
  }
}

module attributes {stable_mosaic.version = 11 : i64} {
  func.func @_mlp_kernel(%arg0: i32, %arg1: i32, %arg2: memref<1x4x256xbf16, #tpu.memory_space<vmem>>, %arg3: memref<1x4x256xbf16, #tpu.memory_space<vmem>>, %arg4: memref<8x4xbf16, #tpu.memory_space<vmem>>, %arg5: memref<8x1xf32, #tpu.memory_space<vmem>>, %arg6: memref<4x8xbf16, #tpu.memory_space<vmem>>, %arg7: memref<4x1xf32, #tpu.memory_space<vmem>>, %arg8: memref<1x4x256xbf16, #tpu.memory_space<vmem>>) attributes {dimension_semantics = [#tpu.dimension_semantics<parallel>, #tpu.dimension_semantics<parallel>], iteration_bounds = array<i64: 2, 1>, scalar_prefetch = 0 : i64, scratch_operands = 0 : i64, tpu.core_type = #tpu.core_type<tc>, window_params = [{transform_indices = @transform_0, window_bounds = array<i64: 1, 4, 256>}, {transform_indices = @transform_1, window_bounds = array<i64: 1, 4, 256>}, {pipeline_mode = #tpu.pipeline_mode<synchronous>, transform_indices = @transform_2, window_bounds = array<i64: 8, 4>}, {pipeline_mode = #tpu.pipeline_mode<synchronous>, transform_indices = @transform_3, window_bounds = array<i64: 8, 1>}, {pipeline_mode = #tpu.pipeline_mode<synchronous>, transform_indices = @transform_4, window_bounds = array<i64: 4, 8>}, {pipeline_mode = #tpu.pipeline_mode<synchronous>, transform_indices = @transform_5, window_bounds = array<i64: 4, 1>}, {transform_indices = @transform_6, window_bounds = array<i64: 1, 4, 256>}]} {
    %c0 = arith.constant 0 : index
    %c0_0 = arith.constant 0 : index
    %0 = vector.load %arg4[%c0, %c0_0] : memref<8x4xbf16, #tpu.memory_space<vmem>>, vector<8x4xbf16>
    %c0_1 = arith.constant 0 : index
    %c0_2 = arith.constant 0 : index
    %c0_3 = arith.constant 0 : index
    %1 = vector.load %arg2[%c0_1, %c0_2, %c0_3] : memref<1x4x256xbf16, #tpu.memory_space<vmem>>, vector<1x4x256xbf16>
    %2 = vector.shape_cast %1 : vector<1x4x256xbf16> to vector<4x256xbf16>
    %cst = arith.constant dense<0.000000e+00> : vector<8x256xf32>
    %3 = tpu.matmul %0, %2, %cst {dimension_numbers = #tpu.dot_dimension_numbers<[1], [0], [0], [1], [0, 0, 1, 1], [], []>} : vector<8x4xbf16>, vector<4x256xbf16>, vector<8x256xf32> -> vector<8x256xf32>
    %c0_4 = arith.constant 0 : index
    %c0_5 = arith.constant 0 : index
    %4 = vector.load %arg5[%c0_4, %c0_5] : memref<8x1xf32, #tpu.memory_space<vmem>>, vector<8x1xf32>
    %5 = vector.broadcast %4 : vector<8x1xf32> to vector<8x256xf32>
    %6 = arith.addf %3, %5 : vector<8x256xf32>
    %cst_6 = arith.constant 5.000000e-01 : f32
    %7 = vector.broadcast %cst_6 : f32 to vector<8x256xf32>
    %8 = arith.mulf %7, %6 : vector<8x256xf32>
    %cst_7 = arith.constant 4.471500e-02 : f32
    %9 = vector.broadcast %cst_7 : f32 to vector<8x256xf32>
    %10 = arith.mulf %9, %6 : vector<8x256xf32>
    %11 = arith.mulf %10, %6 : vector<8x256xf32>
    %12 = arith.mulf %11, %6 : vector<8x256xf32>
    %13 = arith.addf %6, %12 : vector<8x256xf32>
    %cst_8 = arith.constant 0.797884583 : f32
    %14 = vector.broadcast %cst_8 : f32 to vector<8x256xf32>
    %15 = arith.mulf %14, %13 : vector<8x256xf32>
    %16 = math.tanh %15 : vector<8x256xf32>
    %cst_9 = arith.constant 1.000000e+00 : f32
    %17 = vector.broadcast %cst_9 : f32 to vector<8x256xf32>
    %18 = arith.addf %17, %16 : vector<8x256xf32>
    %19 = arith.mulf %8, %18 : vector<8x256xf32>
    %c0_10 = arith.constant 0 : index
    %c0_11 = arith.constant 0 : index
    %20 = vector.load %arg6[%c0_10, %c0_11] : memref<4x8xbf16, #tpu.memory_space<vmem>>, vector<4x8xbf16>
    %21 = arith.truncf %19 : vector<8x256xf32> to vector<8x256xbf16>
    %cst_12 = arith.constant dense<0.000000e+00> : vector<4x256xf32>
    %22 = tpu.matmul %20, %21, %cst_12 {dimension_numbers = #tpu.dot_dimension_numbers<[1], [0], [0], [1], [0, 0, 1, 1], [], []>} : vector<4x8xbf16>, vector<8x256xbf16>, vector<4x256xf32> -> vector<4x256xf32>
    %c0_13 = arith.constant 0 : index
    %c0_14 = arith.constant 0 : index
    %23 = vector.load %arg7[%c0_13, %c0_14] : memref<4x1xf32, #tpu.memory_space<vmem>>, vector<4x1xf32>
    %24 = vector.broadcast %23 : vector<4x1xf32> to vector<4x256xf32>
    %25 = arith.addf %22, %24 : vector<4x256xf32>
    %c0_15 = arith.constant 0 : index
    %c0_16 = arith.constant 0 : index
    %c0_17 = arith.constant 0 : index
    %26 = vector.load %arg3[%c0_15, %c0_16, %c0_17] : memref<1x4x256xbf16, #tpu.memory_space<vmem>>, vector<1x4x256xbf16>
    %27 = vector.shape_cast %26 : vector<1x4x256xbf16> to vector<4x256xbf16>
    %28 = arith.extf %27 : vector<4x256xbf16> to vector<4x256xf32>
    %29 = arith.addf %25, %28 : vector<4x256xf32>
    %30 = arith.truncf %29 : vector<4x256xf32> to vector<4x256xbf16>
    %c0_18 = arith.constant 0 : index
    %c0_19 = arith.constant 0 : index
    %c0_20 = arith.constant 0 : index
    %31 = vector.load %arg8[%c0_18, %c0_19, %c0_20] : memref<1x4x256xbf16, #tpu.memory_space<vmem>>, vector<1x4x256xbf16>
    %32 = vector.shape_cast %31 : vector<1x4x256xbf16> to vector<4x256xbf16>
    %33 = vector.shape_cast %30 : vector<4x256xbf16> to vector<1x4x256xbf16>
    tpu.vector_store %arg8[%c0_18, %c0_19, %c0_20], %33 {strides = array<i32>} : memref<1x4x256xbf16, #tpu.memory_space<vmem>>, vector<1x4x256xbf16>,
    return
  }
  func.func @transform_0(%arg0: i32, %arg1: i32) -> (i32, i32, i32) {
    %c0_i32 = arith.constant 0 : i32
    %c0_i32_0 = arith.constant 0 : i32
    return %arg0, %c0_i32, %arg1 : i32, i32, i32
  }
  func.func @transform_1(%arg0: i32, %arg1: i32) -> (i32, i32, i32) {
    %c0_i32 = arith.constant 0 : i32
    %c0_i32_0 = arith.constant 0 : i32
    return %arg0, %c0_i32, %arg1 : i32, i32, i32
  }
  func.func @transform_2(%arg0: i32, %arg1: i32) -> (i32, i32) {
    %c0_i32 = arith.constant 0 : i32
    %c0_i32_0 = arith.constant 0 : i32
    %c0_i32_1 = arith.constant 0 : i32
    return %c0_i32, %c0_i32_0 : i32, i32
  }
  func.func @transform_3(%arg0: i32, %arg1: i32) -> (i32, i32) {
    %c0_i32 = arith.constant 0 : i32
    %c0_i32_0 = arith.constant 0 : i32
    %c0_i32_1 = arith.constant 0 : i32
    return %c0_i32, %c0_i32_0 : i32, i32
  }
  func.func @transform_4(%arg0: i32, %arg1: i32) -> (i32, i32) {
    %c0_i32 = arith.constant 0 : i32
    %c0_i32_0 = arith.constant 0 : i32
    %c0_i32_1 = arith.constant 0 : i32
    return %c0_i32, %c0_i32_0 : i32, i32
  }
  func.func @transform_5(%arg0: i32, %arg1: i32) -> (i32, i32) {
    %c0_i32 = arith.constant 0 : i32
    %c0_i32_0 = arith.constant 0 : i32
    %c0_i32_1 = arith.constant 0 : i32
    return %c0_i32, %c0_i32_0 : i32, i32
  }
  func.func @transform_6(%arg0: i32, %arg1: i32) -> (i32, i32, i32) {
    %c0_i32 = arith.constant 0 : i32
    %c0_i32_0 = arith.constant 0 : i32
    return %arg0, %c0_i32, %arg1 : i32, i32, i32
  }
}

</mosaic_0001>

<bundles_post_ra>
// kernel: _lambda_.4
= control target key start
LH: loop header
LB: loop body
LE: loop exit
PB: predicated region body
PF: predicated region fallthrough
CT: control target
= control target key end

     0   :  { %s607_s15 = smov 0   ;;  %s609_s16 = smov 0   ;;  %s653_s0 = inlined_call_operand.vmem [shape: bf16[2,8,256], index: 0, kind: input, shape index: {}]   ;;  %s654_s1 = inlined_call_operand.vmem [shape: bf16[8,8], index: 1, kind: input, shape index: {}]   ;;  %s655_s2 = inlined_call_operand.vmem [shape: f32[8,1], index: 2, kind: input, shape index: {}]   ;;  %s656_s3 = inlined_call_operand.vmem [shape: bf16[2,4,256], index: 3, kind: output, shape index: {0}]   ;;  %s657_s4 = inlined_call_operand.vmem [shape: bf16[2,4,256], index: 4, kind: output, shape index: {1}]  }
   0x1   :  { %s611_s17 = smov 0  }
   0x2 LB: > { %s27_s18 = sadd.s32 1, %s575_s16  ;;  %p507_p0 = scmp.ge.s32.totalorder %s579_s17, 1  ;;  %s579_s17 = sphi %s611_s17, %s15_s17   ;;  %s575_s16 = sphi %s609_s16, %s659_s16   ;;  %s571_s15 = sphi %s607_s15, %s658_s15  }
   0x3   : > { %p29_p1 = scmp.ge.s32.totalorder %s27_s18, 2  ;;  %p188_p2 = scmp.lt.s32.totalorder %s579_s17, 3 }
   0x5   : > { %s661_s18 = smov (%p29_p1, %s27_s18), 0  ;;  %p189_p3 = pnand %p507_p0, %p188_p2 }
   0x6   : > { %p232_p4 = scmp.lt.s32.totalorder (!%p189_p3), %s571_s15, 1 }
   0x7   : > { %192 = sbr.rel (%p189_p3) target bundleno = 194 (0xc2), region = 32 }
   0xc   : > { %v581_v0 = vmov 0   ;;  %v264_v1 = vld [vmem:[%s655_s2] sm:$0xff]  ;;  %s663_s15 = smov (!%p232_p4, %s571_s15), 1  ;;  %vm279_vm0 = vcmask 1043456   ;;  %vm275_vm1 = vcmask 64512   ;;  %vm355_vm10 = vcmask 1041408  }
   0xd   : > { %548 = vset.pattern.permute.xlu0 %v581_v0  ;;  %s520_s21 = sshll.u32 %s663_s15, 3  ;;  %v263_v9 = vld [vmem:[%s654_s1] sm:$0xf]  ;;  %s521_s27 = sshll.u32 %s663_s15, 2 }
   0xe   : > { %267 = vperm.xlu0 %548, %v264_v1   ;;  %s239_s24 = scalar_lea.vmem %s653_s0, %s520_s21  ;;  %s249_s30 = scalar_lea.vmem %s656_s3, %s521_s27 }
   0xf   : > { %v262_v2 = vld [vmem:[%s239_s24] sm:$0xff]  ;;  %s259_s7 = scalar_lea.vmem %s657_s4, %s521_s27 }
  0x10   : > { %v271_v3 = vunpack.c.l.b16 %v262_v2  ;;  %v272_v4 = vunpack.c.h.b16 %v262_v2 }
  0x12   : > { %v273_v5 = vpack.c.b16 %v271_v3, %v271_v3  ;;  %v274_v6 = vpack.c.b16 %v272_v4, %v272_v4 }
  0x14   : > { %v281_v7 = vsel %vm279_vm0, %v273_v5, 0  ;;  %v284_v8 = vsel %vm279_vm0, %v274_v6, 0 }
  0x15   : > { %293 = vmatpush.bf16.msra.mxu0 %v281_v7  ;;  %306 = vmatpush.bf16.msra.mxu1 %v284_v8 }
  0x18   : > { %514 = vmatmul.msk.bf16.vlgmr.msra.gmra.mxu0 %vm275_vm1, %v263_v9  ;;  %515 = vmatmul.msk.bf16.vlgmr.msra.gmra.mxu1 %vm275_vm1, %v263_v9 }
  0x80   : > { %v268_v10 = vpop.permute.xlu0 %267 }
  0x95   : > { %v295_v11 = vpop.f32.mrf.mxu0  ;;  %v308_v12 = vpop.f32.mrf.mxu1 }
  0x96   : > { %v296_v13 = vadd.f32 %v295_v11, %v268_v10  ;;  %v309_v14 = vadd.f32 %v308_v12, %v268_v10 }
  0x98   : > { %v516_v15 = vmul.f32 -1.442695, %v296_v13  ;;  %v517_v16 = vmul.f32 -1.442695, %v309_v14 }
  0x9a   : > { %549 = vpow2.f32 %v516_v15 }
  0x9b   : > { %551 = vpow2.f32 %v517_v16 }
  0x9d   : > { %v297_v17 = vpop.f32.mrf.mxu0  ;;  %v310_v18 = vpop.f32.mrf.mxu1 }
  0xa0   : > { %v550_v19 = vpop.eup %549 }
  0xa1   : > { %v552_v20 = vpop.eup %551  ;;  %v318_v21 = vadd.f32 1.0, %v550_v19 }
  0xa2   : > { %v319_v22 = vadd.f32 1.0, %v552_v20 }
  0xa3   : > { %553 = vrcp.f32 %v318_v21  ;;  %v331_v28 = vand.u32 2147483648, %v318_v21  ;;  %v329_v31 = vand.u32 2147483647, %v318_v21  ;;  %vm325_vm4 = vweird.f32 %v318_v21 }
  0xa4   : > { %555 = vrcp.f32 %v319_v22  ;;  %v346_v32 = vand.u32 2147483648, %v319_v22  ;;  %v344_v34 = vand.u32 2147483647, %v319_v22  ;;  %vm340_vm6 = vweird.f32 %v319_v22 }
  0xa5   : > { %v332_v36 = vor.u32 1.1754944e-38, %v331_v28  ;;  %vm330_vm7 = vcmp.eq.f32.partialorder %v329_v31, 8.507059e+37 }
  0xa6   : > { %v347_v39 = vor.u32 1.1754944e-38, %v346_v32  ;;  %vm345_vm9 = vcmp.eq.f32.partialorder %v344_v34, 8.507059e+37 }
  0xa9   : > { %v554_v23 = vpop.eup %553 }
  0xaa   : > { %v556_v24 = vpop.eup %555  ;;  %v321_v25 = vmul.f32 %v554_v23, %v318_v21  ;;  %vm326_vm2 = vweird.f32 %v554_v23 }
  0xab   : > { %v336_v26 = vmul.f32 %v556_v24, %v319_v22  ;;  %vm341_vm3 = vweird.f32 %v556_v24  ;;  %vm327_vm5 = vmor %vm325_vm4, %vm326_vm2 }
  0xac   : > { %v322_v27 = vsub.f32 1.0, %v321_v25  ;;  %vm342_vm8 = vmor %vm340_vm6, %vm341_vm3 }
  0xad   : > { %v337_v29 = vsub.f32 1.0, %v336_v26 }
  0xae   : > { %v323_v30 = vmul.f32 %v554_v23, %v322_v27 }
  0xaf   : > { %v338_v33 = vmul.f32 %v556_v24, %v337_v29 }
  0xb0   : > { %v324_v35 = vadd.f32 %v554_v23, %v323_v30 }
  0xb1   : > { %v339_v37 = vadd.f32 %v556_v24, %v338_v33 }
  0xb2   : > { %v328_v38 = vsel %vm327_vm5, %v554_v23, %v324_v35 }
  0xb3   : > { %v333_v40 = vsel %vm330_vm7, %v332_v36, %v328_v38  ;;  %v343_v41 = vsel %vm342_vm8, %v556_v24, %v339_v37 }
  0xb4   : > { %v350_v42 = vmul.f32 %v333_v40, %v296_v13  ;;  %v348_v43 = vsel %vm345_vm9, %v347_v39, %v343_v41 }
  0xb5   : > { %v351_v44 = vmul.f32 %v348_v43, %v309_v14 }
  0xb7   : > { %v352_v45 = vpack.c.bf16 %v351_v44, %v350_v42 }
  0xb9   : > { %v354_v46 = vrot.slane %v352_v45, 2  ;;  %361 = vst.sshfl [vmem:[#allocation1] sm:$0xff pattern:$0x75643120] %v352_v45 }
  0xbb   : > { %v358_v47 = vsel %vm355_vm10, %v352_v45, %v354_v46 }
  0xbc   : > { %360 = vst [vmem:[%s249_s30] sm:$0xf] %v358_v47 }
  0xc0   : > { %v363_v48 = vld [vmem:[#allocation1 + $0x1] ss:$2 sm:$0xff] }
  0xc1   : > { %365 = vst [vmem:[%s259_s7] sm:$0xf] %v363_v48 }
  0xc2 PF: > { %s15_s17 = sadd.s32 1, %s579_s17   ;;  %s658_s15 = smov %s575_s16 }
  0xc3   : > { %p12_p5 = scmp.ge.s32.totalorder %s15_s17, 4   ;;  %s659_s16 = smov %s661_s18 }
  0xc5   :  { %14 = sbr.rel (!%p12_p5) target bundleno = 2 (0x2), region = 75 }

// kernel: _lambda_.7
= control target key start
LH: loop header
LB: loop body
LE: loop exit
PB: predicated region body
PF: predicated region fallthrough
CT: control target
= control target key end

     0   :  { %s697_s18 = smov 0   ;;  %s699_s19 = smov 0   ;;  %s746_s0 = inlined_call_operand.vmem [shape: bf16[2,4,256], index: 0, kind: input, shape index: {}]   ;;  %s747_s1 = inlined_call_operand.vmem [shape: bf16[2,4,256], index: 1, kind: input, shape index: {}]   ;;  %s748_s2 = inlined_call_operand.vmem [shape: bf16[2,4,256], index: 2, kind: input, shape index: {}]   ;;  %s749_s3 = inlined_call_operand.vmem [shape: bf16[8,12], index: 3, kind: input, shape index: {}]   ;;  %s750_s4 = inlined_call_operand.vmem [shape: f32[8,1], index: 4, kind: input, shape index: {}]   ;;  %s751_s5 = inlined_call_operand.vmem [shape: bf16[2,8,256], index: 5, kind: output, shape index: {}]  }
   0x1   :  { %s701_s20 = smov 0  }
   0x2 LB: > { %s27_s21 = sadd.s32 1, %s660_s19  ;;  %p579_p0 = scmp.ge.s32.totalorder %s664_s20, 1  ;;  %s664_s20 = sphi %s701_s20, %s15_s20   ;;  %s660_s19 = sphi %s699_s19, %s753_s19   ;;  %s656_s18 = sphi %s697_s18, %s752_s18  }
   0x3   : > { %p29_p1 = scmp.ge.s32.totalorder %s27_s21, 2  ;;  %p242_p2 = scmp.lt.s32.totalorder %s664_s20, 3 }
   0x5   : > { %s755_s21 = smov (%p29_p1, %s27_s21), 0  ;;  %p243_p3 = pnand %p579_p0, %p242_p2 }
   0x6   : > { %p297_p4 = scmp.lt.s32.totalorder (!%p243_p3), %s656_s18, 1 }
   0x7   : > { %246 = sbr.rel (%p243_p3) target bundleno = 218 (0xda), region = 40 }
   0xc   : > { %s757_s18 = smov (!%p297_p4, %s656_s18), 1  ;;  %v359_v3 = vld [vmem:[%s750_s4] sm:$0xff]  ;;  %v666_v4 = vmov 0   ;;  %vm377_vm0 = vcmask 1045504   ;;  %vm373_vm1 = vcmask 97280  }
   0xd   : > { %s602_s22 = sshll.u32 %s757_s18, 2  ;;  %633 = vset.pattern.permute.xlu0 %v666_v4  ;;  %v358_v16 = vld [vmem:[%s749_s3] sm:$0xf]  ;;  %s605_s11 = sshll.u32 %s757_s18, 3 }
   0xe   : > { %s304_s25 = scalar_lea.vmem %s746_s0, %s602_s22  ;;  %s314_s28 = scalar_lea.vmem %s747_s1, %s602_s22  ;;  %362 = vperm.xlu0 %633, %v359_v3  }
   0xf   : > { %v337_v0 = vld [vmem:[%s304_s25] sm:$0xf]  ;;  %s324_s8 = scalar_lea.vmem %s748_s2, %s602_s22  ;;  %s334_s14 = scalar_lea.vmem %s751_s5, %s605_s11 }
  0x10   : > { %339 = vst [vmem:[#allocation1] ss:$2 sm:$0xff] %v337_v0  ;;  %v343_v1 = vld [vmem:[%s314_s28] sm:$0xf] }
  0x11   : > { %v350_v5 = vld [vmem:[%s324_s8] sm:$0xf] }
  0x17   : > { %v340_v2 = vld.sshfl [vmem:[#allocation1] sm:$0xff pattern:$0x75643120] }
  0x18   : > { %342 = vst [vmem:[#allocation2] sm:$0x33] %v340_v2 }
  0x19   : > { %346 = vst [vmem:[#allocation1 + $0x1] ss:$2 sm:$0xff] %v343_v1 }
  0x20   : > { %v347_v6 = vld.sshfl [vmem:[#allocation1] sm:$0xff pattern:$0x75643120] }
  0x21   : > { %349 = vst [vmem:[#allocation2] sm:$0xcc] %v347_v6 }
  0x22   : > { %352 = vst [vmem:[#allocation1] ss:$2 sm:$0xff] %v350_v5 }
  0x28   : > { %v590_v8 = vld [vmem:[#allocation2] sm:$0xf]  ;;  %v606_v9 = vld [vmem:[#allocation2 + $0x4] sm:$0xf] }
  0x29   : > { %v353_v7 = vld.sshfl [vmem:[#allocation1] sm:$0xff pattern:$0x75643120] }
  0x2a   : > { %355 = vst [vmem:[#allocation2 + $0x8] sm:$0x33] %v353_v7 }
  0x31   : > { %v607_v10 = vld [vmem:[#allocation2 + $0x4] sm:$0x30]  ;;  %v592_v11 = vld [vmem:[#allocation2 + $0x8] sm:$0x30] }
  0x32   : > { %v591_v12 = vor.u32 %v607_v10, %v590_v8  ;;  %v595_v13 = vor.u32 %v606_v9, %v592_v11 }
  0x34   : > { %v379_v14 = vsel %vm377_vm0, %v591_v12, 0  ;;  %v382_v15 = vsel %vm377_vm0, %v595_v13, 0 }
  0x35   : > { %391 = vmatpush.bf16.msra.mxu0 %v379_v14  ;;  %404 = vmatpush.bf16.msra.mxu1 %v382_v15 }
  0x38   : > { %596 = vmatmul.msk.bf16.vlgmr.msra.gmra.mxu0 %vm373_vm1, %v358_v16  ;;  %597 = vmatmul.msk.bf16.vlgmr.msra.gmra.mxu1 %vm373_vm1, %v358_v16 }
  0x80   : > { %v363_v17 = vpop.permute.xlu0 %362 }
  0xb5   : > { %v393_v18 = vpop.f32.mrf.mxu0  ;;  %v406_v19 = vpop.f32.mrf.mxu1 }
  0xb6   : > { %v394_v20 = vadd.f32 %v393_v18, %v363_v17  ;;  %v407_v21 = vadd.f32 %v406_v19, %v363_v17 }
  0xb8   : > { %v598_v22 = vmul.f32 -1.442695, %v394_v20  ;;  %v599_v23 = vmul.f32 -1.442695, %v407_v21 }
  0xba   : > { %634 = vpow2.f32 %v598_v22 }
  0xbb   : > { %636 = vpow2.f32 %v599_v23 }
  0xbd   : > { %v395_v24 = vpop.f32.mrf.mxu0  ;;  %v408_v25 = vpop.f32.mrf.mxu1 }
  0xc0   : > { %v635_v26 = vpop.eup %634 }
  0xc1   : > { %v637_v27 = vpop.eup %636  ;;  %v416_v28 = vadd.f32 1.0, %v635_v26 }
  0xc2   : > { %v417_v29 = vadd.f32 1.0, %v637_v27 }
  0xc3   : > { %638 = vrcp.f32 %v416_v28  ;;  %v429_v35 = vand.u32 2147483648, %v416_v28  ;;  %v427_v38 = vand.u32 2147483647, %v416_v28  ;;  %vm423_vm4 = vweird.f32 %v416_v28 }
  0xc4   : > { %640 = vrcp.f32 %v417_v29  ;;  %v444_v39 = vand.u32 2147483648, %v417_v29  ;;  %v442_v41 = vand.u32 2147483647, %v417_v29  ;;  %vm438_vm6 = vweird.f32 %v417_v29 }
  0xc5   : > { %v430_v43 = vor.u32 1.1754944e-38, %v429_v35  ;;  %vm428_vm7 = vcmp.eq.f32.partialorder %v427_v38, 8.507059e+37 }
  0xc6   : > { %v445_v46 = vor.u32 1.1754944e-38, %v444_v39  ;;  %vm443_vm9 = vcmp.eq.f32.partialorder %v442_v41, 8.507059e+37 }
  0xc9   : > { %v639_v30 = vpop.eup %638 }
  0xca   : > { %v641_v31 = vpop.eup %640  ;;  %v419_v32 = vmul.f32 %v639_v30, %v416_v28  ;;  %vm424_vm2 = vweird.f32 %v639_v30 }
  0xcb   : > { %v434_v33 = vmul.f32 %v641_v31, %v417_v29  ;;  %vm439_vm3 = vweird.f32 %v641_v31  ;;  %vm425_vm5 = vmor %vm423_vm4, %vm424_vm2 }
  0xcc   : > { %v420_v34 = vsub.f32 1.0, %v419_v32  ;;  %vm440_vm8 = vmor %vm438_vm6, %vm439_vm3 }
  0xcd   : > { %v435_v36 = vsub.f32 1.0, %v434_v33 }
  0xce   : > { %v421_v37 = vmul.f32 %v639_v30, %v420_v34 }
  0xcf   : > { %v436_v40 = vmul.f32 %v641_v31, %v435_v36 }
  0xd0   : > { %v422_v42 = vadd.f32 %v639_v30, %v421_v37 }
  0xd1   : > { %v437_v44 = vadd.f32 %v641_v31, %v436_v40 }
  0xd2   : > { %v426_v45 = vsel %vm425_vm5, %v639_v30, %v422_v42 }
  0xd3   : > { %v431_v47 = vsel %vm428_vm7, %v430_v43, %v426_v45  ;;  %v441_v48 = vsel %vm440_vm8, %v641_v31, %v437_v44 }
  0xd4   : > { %v448_v49 = vmul.f32 %v431_v47, %v394_v20  ;;  %v446_v50 = vsel %vm443_vm9, %v445_v46, %v441_v48 }
  0xd5   : > { %v449_v51 = vmul.f32 %v446_v50, %v407_v21 }
  0xd7   : > { %v450_v52 = vpack.c.bf16 %v449_v51, %v448_v49 }
  0xd9   : > { %451 = vst [vmem:[%s334_s14] sm:$0xff] %v450_v52 }
  0xda PF: > { %s15_s20 = sadd.s32 1, %s664_s20   ;;  %s752_s18 = smov %s660_s19 }
  0xdb   : > { %p12_p5 = scmp.ge.s32.totalorder %s15_s20, 4   ;;  %s753_s19 = smov %s755_s21 }
  0xdd   :  { %14 = sbr.rel (!%p12_p5) target bundleno = 2 (0x2), region = 77 }

// kernel: _lambda_.6
= control target key start
LH: loop header
LB: loop body
LE: loop exit
PB: predicated region body
PF: predicated region fallthrough
CT: control target
= control target key end

     0   :  { %s672_s21 = smov 0   ;;  %s674_s22 = smov 0   ;;  %s728_s0 = inlined_call_operand.vmem [shape: bf16[2,4,256], index: 0, kind: input, shape index: {}]   ;;  %s729_s1 = inlined_call_operand.vmem [shape: bf16[2,4,256], index: 1, kind: input, shape index: {}]   ;;  %s730_s2 = inlined_call_operand.vmem [shape: bf16[8,4], index: 2, kind: input, shape index: {}]   ;;  %s731_s3 = inlined_call_operand.vmem [shape: f32[8,1], index: 3, kind: input, shape index: {}]   ;;  %s732_s4 = inlined_call_operand.vmem [shape: bf16[4,8], index: 4, kind: input, shape index: {}]   ;;  %s733_s5 = inlined_call_operand.vmem [shape: f32[4,1], index: 5, kind: input, shape index: {}]   ;;  %s734_s6 = inlined_call_operand.vmem [shape: bf16[2,4,256], index: 6, kind: output, shape index: {}]  }
   0x1   :  { %s676_s23 = smov 0  }
   0x2 LB: > { %s28_s24 = sadd.s32 1, %s630_s22  ;;  %p566_p0 = scmp.ge.s32.totalorder %s634_s23, 1  ;;  %s634_s23 = sphi %s676_s23, %s16_s23   ;;  %s630_s22 = sphi %s674_s22, %s736_s22   ;;  %s626_s21 = sphi %s672_s21, %s735_s21  }
   0x3   : > { %p30_p1 = scmp.ge.s32.totalorder %s28_s24, 2  ;;  %p250_p2 = scmp.lt.s32.totalorder %s634_s23, 3 }
   0x5   : > { %s738_s24 = smov (%p30_p1, %s28_s24), 0  ;;  %p251_p3 = pnand %p566_p0, %p250_p2 }
   0x6   : > { %p298_p4 = scmp.lt.s32.totalorder (!%p251_p3), %s626_s21, 1 }
   0x7   : > { %254 = sbr.rel (%p251_p3) target bundleno = 326 (0x146), region = 44 }
   0xc   : > { %v636_v0 = vmov 0   ;;  %v330_v1 = vld [vmem:[%s731_s3] sm:$0xff]  ;;  %s740_s21 = smov (!%p298_p4, %s626_s21), 1  ;;  %vm344_vm0 = vcmask 1041408   ;;  %vm340_vm1 = vcmask 31744   ;;  %vm406_vm2 = vcmask 1043456  }
   0xd   : > { %607 = vset.pattern.permute.xlu0 %v636_v0  ;;  %s693_s27 = sshll.u32 %s740_s21, 2  ;;  %v396_v3 = vld [vmem:[%s733_s5] sm:$0xf]  ;;  %vm402_vm3 = vcmask 64512  }
   0xe   : > { %333 = vperm.xlu0 %607, %v330_v1   ;;  %s305_s30 = scalar_lea.vmem %s728_s0, %s693_s27  ;;  %s315_s9 = scalar_lea.vmem %s729_s1, %s693_s27  ;;  %v328_v10 = vld [vmem:[%s730_s2] sm:$0xf] }
   0xf   : > { %v329_v2 = vld [vmem:[%s305_s30] sm:$0xf]  ;;  %s325_s18 = scalar_lea.vmem %s734_s6, %s693_s27 }
  0x10   : > { %337 = vst [vmem:[#allocation1] ss:$4 sm:$0xff] %v329_v2  ;;  %v439_v4 = vld [vmem:[%s315_s9] sm:$0xf] }
  0x11   : > { %v440_v5 = vunpack.c.l.bf16 %v439_v4  ;;  %v393_v40 = vld [vmem:[%s732_s4] sm:$0x3] }
  0x16   : > { %399 = vperm.xlu0 %607, %v396_v3  }
  0x17   : > { %v338_v6 = vld.sshfl [vmem:[#allocation1] sm:$0xff pattern:$0x73625140]  ;;  %v339_v7 = vld.sshfl [vmem:[#allocation1 + $0x8] sm:$0xff pattern:$0x73625140] }
  0x18   : > { %v345_v8 = vsel %vm344_vm0, %v338_v6, 0  ;;  %v347_v9 = vsel %vm344_vm0, %v339_v7, 0  ;;  %442 = vst [vmem:[#allocation1] ss:$2 sm:$0xff] %v440_v5 }
  0x19   : > { %356 = vmatpush.bf16.msra.mxu0 %v345_v8  ;;  %369 = vmatpush.bf16.msra.mxu1 %v347_v9 }
  0x1c   : > { %573 = vmatmul.msk.bf16.vlgmr.msra.gmra.mxu0 %vm340_vm1, %v328_v10  ;;  %574 = vmatmul.msk.bf16.vlgmr.msra.gmra.mxu1 %vm340_vm1, %v328_v10 }
  0x1f   : > { %v443_v43 = vld.sshfl [vmem:[#allocation1] sm:$0xff pattern:$0x75316420]  ;;  %v444_v46 = vld.sshfl [vmem:[#allocation1 + $0x8] sm:$0xff pattern:$0x75316420] }
  0x80   : > { %v334_v11 = vpop.permute.xlu0 %333 }
  0x88   : > { %v400_v41 = vpop.permute.xlu0 %399 }
  0x99   : > { %v358_v12 = vpop.f32.mrf.mxu0  ;;  %v371_v13 = vpop.f32.mrf.mxu1 }
  0x9a   : > { %v359_v14 = vadd.f32 %v358_v12, %v334_v11  ;;  %v372_v15 = vadd.f32 %v371_v13, %v334_v11 }
  0x9c   : > { %v377_v16 = vmul.f32 0.044715, %v359_v14  ;;  %v378_v17 = vmul.f32 0.044715, %v372_v15  ;;  %v375_v30 = vmul.f32 0.5, %v359_v14  ;;  %v376_v32 = vmul.f32 0.5, %v372_v15 }
  0x9e   : > { %v379_v18 = vmul.f32 %v377_v16, %v359_v14  ;;  %v380_v19 = vmul.f32 %v378_v17, %v372_v15 }
  0xa0   : > { %v381_v20 = vmul.f32 %v379_v18, %v359_v14  ;;  %v382_v21 = vmul.f32 %v380_v19, %v372_v15 }
  0xa1   : > { %v360_v22 = vpop.f32.mrf.mxu0  ;;  %v373_v23 = vpop.f32.mrf.mxu1 }
  0xa2   : > { %v383_v24 = vadd.f32 %v381_v20, %v359_v14  ;;  %v384_v25 = vadd.f32 %v382_v21, %v372_v15 }
  0xa4   : > { %v385_v26 = vmul.f32 0.7978846, %v383_v24  ;;  %v386_v27 = vmul.f32 0.7978846, %v384_v25 }
  0xa6   : > { %608 = vtanh.f32 %v385_v26 }
  0xa7   : > { %610 = vtanh.f32 %v386_v27 }
  0xac   : > { %v609_v28 = vpop.eup %608 }
  0xad   : > { %v611_v29 = vpop.eup %610  ;;  %v389_v31 = vadd.f32 1.0, %v609_v28 }
  0xae   : > { %v390_v33 = vadd.f32 1.0, %v611_v29 }
  0xaf   : > { %v391_v34 = vmul.f32 %v389_v31, %v375_v30 }
  0xb0   : > { %v392_v35 = vmul.f32 %v390_v33, %v376_v32 }
  0xb1   : > { %v394_v36 = vpack.c.bf16 %v391_v34, %v391_v34 }
  0xb2   : > { %v395_v37 = vpack.c.bf16 %v392_v35, %v392_v35 }
  0xb3   : > { %v408_v38 = vsel %vm406_vm2, %v394_v36, 0 }
  0xb4   : > { %420 = vmatpush.bf16.msra.mxu2 %v408_v38  ;;  %v411_v39 = vsel %vm406_vm2, %v395_v37, 0 }
  0xb5   : > { %433 = vmatpush.bf16.msra.mxu3 %v411_v39 }
  0xb7   : > { %575 = vmatmul.msk.bf16.vlgmr.msra.gmra.mxu2 %vm402_vm3, %v393_v40 }
  0xb8   : > { %576 = vmatmul.msk.bf16.vlgmr.msra.gmra.mxu3 %vm402_vm3, %v393_v40 }
 0x13a   : > { %v422_v42 = vpop.f32.mrf.mxu2 }
 0x13b   : > { %v423_v44 = vadd.f32 %v422_v42, %v400_v41  ;;  %v435_v45 = vpop.f32.mrf.mxu3 }
 0x13c   : > { %v436_v47 = vadd.f32 %v435_v45, %v400_v41 }
 0x13d   : > { %v447_v48 = vadd.f32 %v443_v43, %v423_v44 }
 0x13e   : > { %v448_v49 = vadd.f32 %v444_v46, %v436_v47 }
 0x140   : > { %v449_v50 = vpack.c.bf16 %v448_v49, %v447_v48 }
 0x142   : > { %v451_v51 = vrot.slane %v449_v50, 2  ;;  %v424_v52 = vpop.f32.mrf.mxu2 }
 0x143   : > { %v437_v53 = vpop.f32.mrf.mxu3 }
 0x144   : > { %v454_v54 = vsel %vm344_vm0, %v449_v50, %v451_v51 }
 0x145   : > { %456 = vst [vmem:[%s325_s18] sm:$0xf] %v454_v54 }
 0x146 PF: > { %s16_s23 = sadd.s32 1, %s634_s23   ;;  %s735_s21 = smov %s630_s22 }
 0x147   : > { %p13_p5 = scmp.ge.s32.totalorder %s16_s23, 4   ;;  %s736_s22 = smov %s738_s24 }
 0x149   :  { %15 = sbr.rel (!%p13_p5) target bundleno = 2 (0x2), region = 77 }

// kernel: _lambda_.5
= control target key start
LH: loop header
LB: loop body
LE: loop exit
PB: predicated region body
PF: predicated region fallthrough
CT: control target
= control target key end

     0   :  { %s2525_s25 = smov 0   ;;  %s2527_s26 = smov 0   ;;  %s3030_s0 = inlined_call_operand.vmem [shape: bf16[2,4,256], index: 0, kind: input, shape index: {}]   ;;  %s3031_s1 = inlined_call_operand.vmem [shape: bf16[256,16], index: 1, kind: input, shape index: {}]   ;;  %s3032_s2 = inlined_call_operand.vmem [shape: bf16[256,16], index: 2, kind: input, shape index: {}]   ;;  %s3033_s3 = inlined_call_operand.vmem [shape: bf16[16,256], index: 3, kind: input, shape index: {}]   ;;  %s3034_s4 = inlined_call_operand.vmem [shape: bf16[16,256], index: 4, kind: input, shape index: {}]   ;;  %s3035_s5 = inlined_call_operand.vmem [shape: f32[2,256], index: 5, kind: input, shape index: {}]   ;;  %s3036_s6 = inlined_call_operand.vmem [shape: f32[9,4,1], index: 6, kind: input, shape index: {}]   ;;  %s3037_s7 = inlined_call_operand.vmem [shape: f32[4,1], index: 7, kind: input, shape index: {}]   ;;  %s3038_s8 = inlined_call_operand.vmem [shape: bf16[4,16], index: 8, kind: input, shape index: {}]   ;;  %s3039_s9 = inlined_call_operand.vmem [shape: f32[11,4,1], index: 9, kind: input, shape index: {}]   ;;  %s3040_s10 = inlined_call_operand.vmem [shape: f32[4,1], index: 10, kind: input, shape index: {}]   ;;  %s3041_s11 = inlined_call_operand.vmem [shape: f32[11,4,1], index: 11, kind: input, shape index: {}]   ;;  %s3042_s12 = inlined_call_operand.vmem [shape: f32[4,1], index: 12, kind: input, shape index: {}]   ;;  %s3043_s13 = inlined_call_operand.vmem [shape: bf16[2,4,256], index: 13, kind: output, shape index: {}]  }
   0x1   :  { %s2529_s27 = smov 0  }
   0x2 LB: > { %s35_s28 = sadd.s32 1, %s2424_s26  ;;  %p2149_p0 = scmp.ge.s32.totalorder %s2428_s27, 1  ;;  %s2428_s27 = sphi %s2529_s27, %s23_s27   ;;  %s2424_s26 = sphi %s2527_s26, %s3066_s26   ;;  %s2420_s25 = sphi %s2525_s25, %s3065_s25  }
   0x3   : > { %p37_p1 = scmp.ge.s32.totalorder %s35_s28, 2  ;;  %p470_p2 = scmp.lt.s32.totalorder %s2428_s27, 3 }
   0x5   : > { %s3068_s28 = smov (%p37_p1, %s35_s28), 0  ;;  %p471_p3 = pnand %p2149_p0, %p470_p2 }
   0x6   : > { %s3045_s14 = smov (!%p471_p3), 111   ;;  %s3053_s15 = smov (!%p471_p3), 127  }
   0x7   : > { %474 = sbr.rel (%p471_p3) target bundleno = 1150 (0x47e), region = 72  ;;  %s3054_s16 = smov (!%p471_p3), 15  }
   0x8   : > { %s3047_s17 = smov (!%p471_p3), 113   ;;  %s3049_s18 = smov (!%p471_p3), 1  }
   0x9   : > { %s2435_s19 = smov (!%p471_p3), 17   ;;  %p550_p4 = scmp.lt.s32.totalorder (!%p471_p3), %s2420_s25, 1 }
   0xa   : > { %s2440_s30 = smov (!%p471_p3), 125   ;;  %s2441_s21 = smov (!%p471_p3), 123  }
   0xb   : > { %s2444_s22 = smov (!%p471_p3), 119   ;;  %s2446_s24 = smov (!%p471_p3), 121  }
   0xc   : > { %v601_v0 = vld [vmem:[%s3035_s5] sm:$0xf]  ;;  %vm624_vm0 = vcmask 1043456   ;;  %s3070_s25 = smov (!%p550_p4, %s2420_s25), 1  ;;  %v2436_v14 = vmov 0   ;;  %vm629_vm1 = vcmask 908288  }
   0xd   : > { %v615_v1 = vperm.slane %v601_v0, 0  ;;  %v616_v2 = vperm.slane %v601_v0, 2  ;;  %v698_v3 = vperm.slane %v601_v0, 3  ;;  %v697_v7 = vperm.slane %v601_v0, 1  ;;  %s3044_s20 = sshll.u32 %s3070_s25, 2  ;;  %2395 = vset.pattern.permute.xlu1 %v2436_v14  ;;  %2397 = vset.pattern.permute.xlu0 %v2436_v14  ;;  %v2317_v44 = vld [vmem:[%s3031_s1 + $0x38] sm:$0xff] }
   0xe   : > { %s558_s23 = scalar_lea.vmem %s3030_s0, %s3044_s20  ;;  %598 = vst [vmem:[#allocation2] sm:$0x3] %v2436_v14  ;;  %2396 = vset.pattern.permute.xlu2 %v2436_v14  ;;  %vm710_vm2 = vcmask 924672   ;;  %vm750_vm3 = vcmask 1039360   ;;  %v2325_v45 = vld [vmem:[%s3031_s1 + $0x78] sm:$0xff]  ;;  %1088 = vmatpush.bf16.msra.mxu0 %v2317_v44  ;;  %v2316_v49 = vld [vmem:[%s3031_s1 + $0x30] sm:$0xff] }
   0xf   : > { %v619_v4 = vperm.slane %v615_v1, 0  ;;  %v620_v5 = vperm.slane %v616_v2, 0  ;;  %v702_v8 = vperm.slane %v698_v3, 1  ;;  %v701_v10 = vperm.slane %v697_v7, 1  ;;  %v2564_v13 = vld [vmem:[%s558_s23] sm:$0xf]  ;;  %1101 = vmatpush.bf16.msra.mxu1 %v2325_v45 }
  0x10   : > { %600 = vst [vmem:[#allocation2 + $0x2] sm:$0xf] %v2564_v13  ;;  %v2324_v50 = vld [vmem:[%s3031_s1 + $0x70] sm:$0xff]  ;;  %v2315_v59 = vld [vmem:[%s3031_s1 + $0x28] sm:$0xff]  ;;  %v2333_v61 = vld [vmem:[%s3032_s2 + $0x38] sm:$0xff]  ;;  %vm775_vm4 = vcmask 7168  }
  0x11   : > { %v623_v6 = vrot.slane %v620_v5, 4  ;;  %v705_v11 = vrot.slane %v702_v8, 4  ;;  %599 = vst [vmem:[#allocation2 + $0x6] sm:$0x3] %v2436_v14  ;;  %v2323_v60 = vld [vmem:[%s3031_s1 + $0x68] sm:$0xff]  ;;  %v2341_v62 = vld [vmem:[%s3032_s2 + $0x78] sm:$0xff]  ;;  %1248 = vmatpush.bf16.msra.mxu2 %v2333_v61 }
  0x12   : > { %1089 = vmatpush.bf16.msra.mxu0 %v2316_v49  ;;  %1261 = vmatpush.bf16.msra.mxu3 %v2341_v62  ;;  %v2314_v2 = vld [vmem:[%s3031_s1 + $0x20] sm:$0xff]  ;;  %v2321_v14 = vld [vmem:[%s3031_s1 + $0x58] sm:$0xff]  ;;  %vm735_vm5 = vcmask 121856   ;;  %v2328_v44 = vld [vmem:[%s3032_s2 + $0x10] sm:$0xff]  ;;  %vm654_vm6 = vcmask 138240   ;;  %vm685_vm7 = vcmask 130048  }
  0x13   : > { %v625_v9 = vsel %vm624_vm0, %v619_v4, %v623_v6  ;;  %v706_v12 = vsel %vm624_vm0, %v701_v10, %v705_v11  ;;  %1102 = vmatpush.bf16.msra.mxu1 %v2324_v50  ;;  %v2322_v3 = vld [vmem:[%s3031_s1 + $0x60] sm:$0xff]  ;;  %v2332_v4 = vld [vmem:[%s3032_s2 + $0x30] sm:$0xff]  ;;  %v2313_v11 = vld [vmem:[%s3031_s1 + $0x18] sm:$0xff]  ;;  %vm1286_vm8 = vcmask 257024   ;;  %vm1292_vm9 = vcmask 191552   ;;  %s2439_s20 = smov 126  }
  0x14   : > { %626 = vrot.lane.b32.xlu0 %v625_v9, %s3045_s14  ;;  %747 = vrot.lane.b32.xlu1 %v625_v9, %s3053_s15  ;;  %v2340_v6 = vld [vmem:[%s3032_s2 + $0x70] sm:$0xff]  ;;  %v2326_v61 = vld [vmem:[%s3032_s2] sm:$0xff]  ;;  %s2445_s23 = smov 120   ;;  %s3057_s14 = smov 1   ;;  %vm899_vm10 = vcmask 916480   ;;  %vm1545_vm11 = vcmask 1041408  }
  0x15   : > { %842 = vrot.lane.b32.xlu2 %v625_v9, %s3054_s16  ;;  %1249 = vmatpush.bf16.msra.mxu2 %v2332_v4  ;;  %v2345_v4 = vld [vmem:[%s3034_s4 + $0x4] sm:$0xf0]  ;;  %vm1615_vm12 = vcmask 523264   ;;  %vm1584_vm13 = vcmask 654336   ;;  %vm1646_vm14 = vcmask 392192   ;;  %vm1677_vm15 = vcmask 261120  }
  0x16   : > { %1090 = vmatpush.bf16.msra.mxu0 %v2315_v59  ;;  %1262 = vmatpush.bf16.msra.mxu3 %v2340_v6  ;;  %vm1785_vm0 = vcmask 785408  }
  0x17   : > { %v611_v15 = vld [vmem:[#allocation2] sm:$0x3f]  ;;  %1103 = vmatpush.bf16.msra.mxu1 %v2323_v60 }
  0x18   : > { %v613_v16 = vunpack.c.h.bf16 %v611_v15  ;;  %v612_v18 = vunpack.c.l.bf16 %v611_v15  ;;  %v663_v23 = vld [vmem:[#allocation2] sm:$0x3f] }
  0x19   : > { %v664_v25 = vunpack.c.l.bf16 %v663_v23  ;;  %v665_v26 = vunpack.c.h.bf16 %v663_v23  ;;  %v694_v28 = vld [vmem:[#allocation2] sm:$0x3f] }
  0x1a   : > { %v696_v32 = vunpack.c.h.bf16 %v694_v28  ;;  %v695_v33 = vunpack.c.l.bf16 %v694_v28  ;;  %v744_v38 = vld [vmem:[#allocation2] sm:$0x3f]  ;;  %1091 = vmatpush.bf16.msra.mxu0 %v2314_v2 }
  0x1b   : > { %v746_v43 = vunpack.c.h.bf16 %v744_v38  ;;  %v745_v46 = vunpack.c.l.bf16 %v744_v38  ;;  %v801_v52 = vld [vmem:[#allocation2 + $0x2] sm:$0x3f]  ;;  %1104 = vmatpush.bf16.msra.mxu1 %v2322_v3  ;;  %v2294_v3 = vld [vmem:[%s3034_s4] sm:$0xf] }
  0x1c   : > { %707 = vrot.lane.b32.xlu0 %v706_v12, %s3047_s17  ;;  %804 = vrot.lane.b32.xlu1 %v706_v12, %s3049_s18  ;;  %v784_v57 = vld [vmem:[#allocation2 + $0x2] sm:$0xf]  ;;  %v803_v58 = vunpack.c.h.bf16 %v801_v52  ;;  %v2295_v6 = vor.u32 %v2345_v4, %v2294_v3  ;;  %s2437_s17 = smov 8   ;;  %s2443_s18 = smov 124  }
  0x1d   : > { %911 = vrot.lane.b32.xlu2 %v706_v12, %s2435_s19  ;;  %v785_v0 = vunpack.c.l.bf16 %v784_v57  ;;  %v839_v5 = vld [vmem:[#allocation2 + $0x2] sm:$0x3f] }
  0x1e   : > { %v841_v12 = vunpack.c.h.bf16 %v839_v5  ;;  %v2331_v15 = vld [vmem:[%s3032_s2 + $0x28] sm:$0xff]  ;;  %1092 = vmatpush.bf16.msra.mxu0 %v2313_v11 }
  0x1f   : > { %1105 = vmatpush.bf16.msra.mxu1 %v2321_v14  ;;  %1250 = vmatpush.bf16.msra.mxu2 %v2331_v15  ;;  %v2319_v28 = vld [vmem:[%s3031_s1 + $0x48] sm:$0xff] }
  0x20   : > { %v2296_v11 = vld [vmem:[%s3034_s4 + $0x8] sm:$0xf0] }
  0x6f   : > { %v843_v10 = vpop.permute.xlu2 %842 }
  0x86   : > { %v627_v17 = vpop.permute.xlu0 %626  ;;  %v748_v35 = vpop.permute.xlu1 %747 }
  0x87   : > { %v628_v19 = vrot.slane %v627_v17, 4  ;;  %v749_v39 = vrot.slane %v748_v35, 4 }
  0x89   : > { %v630_v20 = vsel %vm629_vm1, %v628_v19, %v627_v17  ;;  %v634_v21 = vmul.f32 %v628_v19, %v613_v16  ;;  %v751_v47 = vsel %vm750_vm3, %v749_v39, %v748_v35  ;;  %v755_v48 = vmul.f32 %v749_v39, %v746_v43  ;;  %v2339_v16 = vld [vmem:[%s3032_s2 + $0x68] sm:$0xff]  ;;  %v2337_v35 = vld [vmem:[%s3032_s2 + $0x58] sm:$0xff]  ;;  %v2310_v39 = vld [vmem:[%s3031_s1] sm:$0xff] }
  0x8a   : > { %v633_v22 = vmul.f32 %v630_v20, %v612_v18  ;;  %v754_v51 = vmul.f32 %v751_v47, %v745_v46  ;;  %v802_v17 = vunpack.c.l.bf16 %v801_v52  ;;  %v844_v19 = vrot.slane %v843_v10, 4  ;;  %v2312_v20 = vld [vmem:[%s3031_s1 + $0x10] sm:$0xff]  ;;  %1263 = vmatpush.bf16.msra.mxu3 %v2339_v16  ;;  %v2318_v43 = vld [vmem:[%s3031_s1 + $0x40] sm:$0xff]  ;;  %v912_v52 = vpop.permute.xlu2 %911 }
  0x8b   : > { %644 = vst [vmem:[#allocation1 + $0x10] ss:$2 sm:$0xff] %v634_v21  ;;  %v2320_v21 = vld [vmem:[%s3031_s1 + $0x50] sm:$0xff]  ;;  %1093 = vmatpush.bf16.msra.mxu0 %v2312_v20  ;;  %v913_v59 = vrot.slane %v912_v52, 4 }
  0x8c   : > { %642 = vst [vmem:[#allocation1] ss:$2 sm:$0xff] %v633_v22  ;;  %v2330_v22 = vld [vmem:[%s3032_s2 + $0x20] sm:$0xff]  ;;  %v849_v23 = vmul.f32 %v844_v19, %v841_v12  ;;  %1106 = vmatpush.bf16.msra.mxu1 %v2320_v21  ;;  %v845_v38 = vsel %vm735_vm5, %v844_v19, %v843_v10  ;;  %v2336_v46 = vld [vmem:[%s3032_s2 + $0x50] sm:$0xff] }
  0x8d   : > { %1251 = vmatpush.bf16.msra.mxu2 %v2330_v22  ;;  %v2344_v10 = vld [vmem:[%s3034_s4 + $0x4] sm:$0xf]  ;;  %v914_v12 = vsel %vm654_vm6, %v913_v59, %v912_v52 }
  0x8e   : > { %v708_v24 = vpop.permute.xlu0 %707  ;;  %v805_v56 = vpop.permute.xlu1 %804  ;;  %v2299_v14 = vor.u32 %v2344_v10, %v2296_v11  ;;  %v1283_v10 = vld [vmem:[%s3039_s9 + $0x20] sm:$0xf] }
  0x8f   : > { %v709_v29 = vrot.slane %v708_v24, 4  ;;  %v806_v63 = vrot.slane %v805_v56, 4  ;;  %v1275_v11 = vld [vmem:[%s3039_s9] sm:$0xf] }
  0x90   : > { %1107 = vmatpush.bf16.msra.mxu1 %v2319_v28  ;;  %v2343_v28 = vld [vmem:[%s3033_s3 + $0x4] sm:$0xf0] }
  0x91   : > { %v711_v34 = vsel %vm710_vm2, %v709_v29, %v708_v24  ;;  %v715_v36 = vmul.f32 %v709_v29, %v696_v32  ;;  %v811_v1 = vmul.f32 %v806_v63, %v803_v58  ;;  %v807_v18 = vsel %vm775_vm4, %v806_v63, %v805_v56  ;;  %v2338_v24 = vld [vmem:[%s3032_s2 + $0x60] sm:$0xff]  ;;  %v2327_v56 = vld [vmem:[%s3032_s2 + $0x8] sm:$0xff] }
  0x92   : > { %v2568_v27 = vld.sshfl [vmem:[#allocation1 + $0x10] sm:$0xff pattern:$0x75316420]  ;;  %v714_v37 = vmul.f32 %v711_v34, %v695_v33  ;;  %v2329_v34 = vld [vmem:[%s3032_s2 + $0x18] sm:$0xff]  ;;  %1264 = vmatpush.bf16.msra.mxu3 %v2338_v24  ;;  %v2335_v58 = vld [vmem:[%s3032_s2 + $0x48] sm:$0xff] }
  0x93   : > { %v2570_v30 = vld.sshfl [vmem:[#allocation1] sm:$0xff pattern:$0x75316420]  ;;  %v2572_v31 = vld.sshfl [vmem:[#allocation1 + $0x8] sm:$0xff pattern:$0x75316420]  ;;  %1252 = vmatpush.bf16.msra.mxu2 %v2329_v34 }
  0x94   : > { %673 = vst [vmem:[#allocation1] ss:$2 sm:$0xff] %v664_v25  ;;  %v810_v25 = vmul.f32 %v807_v18, %v802_v17  ;;  %1108 = vmatpush.bf16.msra.mxu1 %v2318_v43  ;;  %v2334_v63 = vld [vmem:[%s3032_s2 + $0x40] sm:$0xff]  ;;  %v1277_v43 = vld [vmem:[%s3039_s9 + $0x8] sm:$0xf] }
  0x95   : > { %675 = vst [vmem:[#allocation1 + $0x10] ss:$2 sm:$0xff] %v665_v26  ;;  %v2311_v26 = vld [vmem:[%s3031_s1 + $0x8] sm:$0xff]  ;;  %v2342_v34 = vld [vmem:[%s3033_s3 + $0x4] sm:$0xf]  ;;  %1315 = vperm.xlu2 %2396, %v1277_v43  }
  0x96   : > { %1094 = vmatpush.bf16.msra.mxu0 %v2311_v26  ;;  %1265 = vmatpush.bf16.msra.mxu3 %v2337_v35  ;;  %v1461_v26 = vld [vmem:[%s3038_s8] sm:$0x3] }
  0x97   : > { %1253 = vmatpush.bf16.msra.mxu2 %v2328_v44  ;;  %v1284_v44 = vld [vmem:[%s3039_s9 + $0x24] sm:$0xf] }
  0x9a   : > { %1095 = vmatpush.bf16.msra.mxu0 %v2310_v39  ;;  %1266 = vmatpush.bf16.msra.mxu3 %v2336_v46  ;;  %v1281_v39 = vld [vmem:[%s3039_s9 + $0x18] sm:$0xf] }
  0x9b   : > { %v2575_v40 = vld.sshfl [vmem:[#allocation1] sm:$0xff pattern:$0x75316420]  ;;  %v2577_v41 = vld.sshfl [vmem:[#allocation1 + $0x8] sm:$0xff pattern:$0x75316420]  ;;  %1254 = vmatpush.bf16.msra.mxu2 %v2327_v56 }
  0x9c   : > { %v2579_v42 = vld.sshfl [vmem:[#allocation1 + $0x10] sm:$0xff pattern:$0x75316420]  ;;  %723 = vst [vmem:[#allocation1] ss:$2 sm:$0xff] %v714_v37  ;;  %v840_v37 = vunpack.c.l.bf16 %v839_v5 }
  0x9d   : > { %725 = vst [vmem:[#allocation1 + $0x10] ss:$2 sm:$0xff] %v715_v36  ;;  %v877_v36 = vld [vmem:[#allocation2 + $0x2] sm:$0x3f] }
  0x9e   : > { %v879_v45 = vunpack.c.h.bf16 %v877_v36  ;;  %v848_v47 = vmul.f32 %v845_v38, %v840_v37  ;;  %v878_v60 = vunpack.c.l.bf16 %v877_v36  ;;  %1267 = vmatpush.bf16.msra.mxu3 %v2335_v58  ;;  %v2286_v36 = vld [vmem:[%s3033_s3 + $0x8] sm:$0xf0]  ;;  %v1279_v38 = vld [vmem:[%s3039_s9 + $0x10] sm:$0xf] }
  0x9f   : > { %1255 = vmatpush.bf16.msra.mxu2 %v2326_v61  ;;  %v2289_v37 = vor.u32 %v2342_v34, %v2286_v36 }
  0xa1   : > { %1455 = vmatpush.bf16.msrb.mxu1 %v2289_v37 }
  0xa2   : > { %1268 = vmatpush.bf16.msra.mxu3 %v2334_v63 }
  0xa3   : > { %v2594_v53 = vld.sshfl [vmem:[#allocation1] sm:$0xff pattern:$0x75316420]  ;;  %v2596_v54 = vld.sshfl [vmem:[#allocation1 + $0x8] sm:$0xff pattern:$0x75316420]  ;;  %1484 = vmatpush.bf16.msrb.mxu2 %v2295_v6 }
  0xa4   : > { %v2598_v55 = vld.sshfl [vmem:[#allocation1 + $0x10] sm:$0xff pattern:$0x75316420]  ;;  %763 = vst [vmem:[#allocation1] ss:$2 sm:$0xff] %v754_v51 }
  0xa5   : > { %765 = vst [vmem:[#allocation1 + $0x10] ss:$2 sm:$0xff] %v755_v48  ;;  %v908_v48 = vld [vmem:[#allocation2 + $0x2] sm:$0x3f] }
  0xa6   : > { %v910_v57 = vunpack.c.h.bf16 %v908_v48  ;;  %v909_v5 = vunpack.c.l.bf16 %v908_v48  ;;  %1497 = vmatpush.bf16.msrb.mxu3 %v2299_v14 }
  0xa8   : > { %v918_v62 = vmul.f32 %v913_v59, %v910_v57  ;;  %v917_v15 = vmul.f32 %v914_v12, %v909_v5  ;;  %v1282_v57 = vld [vmem:[%s3039_s9 + $0x1c] sm:$0xf] }
  0xab   : > { %v2624_v7 = vld.sshfl [vmem:[#allocation1] sm:$0xff pattern:$0x75316420]  ;;  %v2626_v8 = vld.sshfl [vmem:[#allocation1 + $0x8] sm:$0xff pattern:$0x75316420] }
  0xac   : > { %v2628_v9 = vld.sshfl [vmem:[#allocation1 + $0x10] sm:$0xff pattern:$0x75316420]  ;;  %792 = vst [vmem:[#allocation1] ss:$2 sm:$0xff] %v785_v0 }
  0xad   : > { %821 = vst [vmem:[#allocation1 + $0x10] ss:$2 sm:$0xff] %v811_v1 }
  0xb3   : > { %v2661_v29 = vld.sshfl [vmem:[#allocation1] sm:$0xff pattern:$0x75316420]  ;;  %v2663_v32 = vld.sshfl [vmem:[#allocation1 + $0x8] sm:$0xff pattern:$0x75316420] }
  0xb4   : > { %819 = vst [vmem:[#allocation1] ss:$2 sm:$0xff] %v810_v25  ;;  %v2665_v33 = vld.sshfl [vmem:[#allocation1 + $0x10] sm:$0xff pattern:$0x75316420] }
  0xb5   : > { %859 = vst [vmem:[#allocation1 + $0x10] ss:$2 sm:$0xff] %v849_v23  ;;  %v1276_v25 = vld [vmem:[%s3039_s9 + $0x4] sm:$0xf] }
  0xb6   : > { %1304 = vperm.xlu1 %2395, %v1276_v25  }
  0xbb   : > { %v2686_v49 = vld.sshfl [vmem:[#allocation1] sm:$0xff pattern:$0x75316420]  ;;  %v2688_v50 = vld.sshfl [vmem:[#allocation1 + $0x8] sm:$0xff pattern:$0x75316420] }
  0xbc   : > { %857 = vst [vmem:[#allocation1] ss:$2 sm:$0xff] %v848_v47  ;;  %v2690_v51 = vld.sshfl [vmem:[#allocation1 + $0x10] sm:$0xff pattern:$0x75316420] }
  0xbd   : > { %889 = vst [vmem:[#allocation1 + $0x10] ss:$2 sm:$0xff] %v879_v45  ;;  %v1280_v45 = vld [vmem:[%s3039_s9 + $0x14] sm:$0xf] }
  0xbe   : > { %1337 = vperm.xlu1 %2395, %v1279_v38   ;;  %1348 = vperm.xlu2 %2396, %v1280_v45  }
  0xc3   : > { %v2704_v0 = vld.sshfl [vmem:[#allocation1] sm:$0xff pattern:$0x75316420]  ;;  %v2706_v1 = vld.sshfl [vmem:[#allocation1 + $0x8] sm:$0xff pattern:$0x75316420] }
  0xc4   : > { %v2708_v2 = vld.sshfl [vmem:[#allocation1 + $0x10] sm:$0xff pattern:$0x75316420]  ;;  %887 = vst [vmem:[#allocation1] ss:$2 sm:$0xff] %v878_v60 }
  0xc5   : > { %928 = vst [vmem:[#allocation1 + $0x10] ss:$2 sm:$0xff] %v918_v62  ;;  %v1285_v60 = vld [vmem:[%s3039_s9 + $0x28] sm:$0xf] }
  0xc6   : > { %1359 = vperm.xlu1 %2395, %v1281_v39   ;;  %1370 = vperm.xlu2 %2396, %v1282_v57  }
  0xcb   : > { %v2723_v16 = vld.sshfl [vmem:[#allocation1] sm:$0xff pattern:$0x75316420]  ;;  %v2725_v17 = vld.sshfl [vmem:[#allocation1 + $0x8] sm:$0xff pattern:$0x75316420] }
  0xcc   : > { %926 = vst [vmem:[#allocation1] ss:$2 sm:$0xff] %v917_v15  ;;  %v2727_v18 = vld.sshfl [vmem:[#allocation1 + $0x10] sm:$0xff pattern:$0x75316420] }
  0xce   : > { %1392 = vperm.xlu1 %2395, %v1284_v44   ;;  %1403 = vperm.xlu2 %2396, %v1285_v60  }
  0xd3   : > { %v2729_v19 = vld.sshfl [vmem:[#allocation1] sm:$0xff pattern:$0x75316420]  ;;  %v2731_v20 = vld.sshfl [vmem:[#allocation1 + $0x8] sm:$0xff pattern:$0x75316420] }
  0xd4   : > { %987 = vst [vmem:[#allocation1] ss:$4 sm:$0xff] %v2564_v13 }
  0xdb   : > { %v988_v21 = vld.sshfl [vmem:[#allocation1] sm:$0xff pattern:$0x73625140]  ;;  %v989_v22 = vld.sshfl [vmem:[#allocation1 + $0x8] sm:$0xff pattern:$0x73625140] }
  0xdc   : > { %1096 = vmatmul.bf16.vlgmr.msra.gmra.mxu0 %v988_v21  ;;  %1109 = vmatmul.bf16.vlgmr.msra.gmra.mxu1 %v989_v22  ;;  %1147 = vst [vmem:[#allocation1] ss:$4 sm:$0xff] %v2564_v13  ;;  %v2284_v13 = vld [vmem:[%s3033_s3] sm:$0xf] }
  0xdd   : > { %v2285_v35 = vor.u32 %v2343_v28, %v2284_v13  ;;  %1530 = vmatpush.bf16.msra.mxu1 %v2299_v14  ;;  %v2438_v14 = vmov 0.0  }
  0xde   : > { %1287 = vst.msk [vmem:[#allocation3] sm:$0xf] %vm1286_vm8, %v2438_v14  ;;  %v1553_v14 = vld [vmem:[%s3041_s11 + $0x8] sm:$0xf] }
  0xdf   : > { %1442 = vmatpush.bf16.msrb.mxu0 %v2285_v35 }
  0xe3   : > { %v1148_v23 = vld.sshfl [vmem:[#allocation1] sm:$0xff pattern:$0x73625140]  ;;  %v1149_v24 = vld.sshfl [vmem:[#allocation1 + $0x8] sm:$0xff pattern:$0x73625140]  ;;  %1517 = vmatpush.bf16.msra.mxu0 %v2295_v6 }
  0xe4   : > { %1256 = vmatmul.bf16.vlgmr.msra.gmra.mxu2 %v1148_v23  ;;  %1269 = vmatmul.bf16.vlgmr.msra.gmra.mxu3 %v1149_v24  ;;  %v1278_v6 = vld [vmem:[%s3039_s9 + $0xc] sm:$0xf] }
  0xef   : > { %v1316_v34 = vpop.permute.xlu2 %1315 }
  0xf4   : > { %2300 = vmatmul.msk.bf16.vlgmr.msrb.gmra.mxu2 %vm685_vm7, %v1461_v26  ;;  %2301 = vmatmul.msk.bf16.vlgmr.msrb.gmra.mxu3 %vm685_vm7, %v1461_v26 }
 0x128   : > { %v1305_v23 = vpop.permute.xlu1 %1304 }
 0x130   : > { %v1338_v35 = vpop.permute.xlu1 %1337 }
 0x159   : > { %v1097_v46 = vpop.f32.mrf.mxu0  ;;  %v1110_v47 = vpop.f32.mrf.mxu1 }
 0x15a   : > { %v1111_v48 = vadd.f32 %v1110_v47, %v1097_v46  ;;  %v1349_v46 = vpop.permute.xlu2 %1348  ;;  %v1360_v47 = vpop.permute.xlu1 %1359 }
 0x15c   : > { %v1114_v52 = vmul.f32 0.0625, %v1111_v48 }
 0x15e   : > { %v1419_v56 = vpack.c.bf16 %v1114_v52, %v1114_v52 }
 0x160   : > { %2290 = vmatmul.msk.bf16.vlgmr.msrb.gmra.mxu0 %vm685_vm7, %v1419_v56  ;;  %2291 = vmatmul.msk.bf16.vlgmr.msrb.gmra.mxu1 %vm685_vm7, %v1419_v56 }
 0x161   : > { %v1099_v58 = vpop.f32.mrf.mxu0  ;;  %v1112_v59 = vpop.f32.mrf.mxu1 }
 0x162   : > { %v1371_v57 = vpop.permute.xlu2 %1370  ;;  %v1393_v59 = vpop.permute.xlu1 %1392 }
 0x167   : > { %v1257_v61 = vpop.f32.mrf.mxu2  ;;  %v1270_v62 = vpop.f32.mrf.mxu3 }
 0x168   : > { %v1271_v63 = vadd.f32 %v1270_v62, %v1257_v61 }
 0x16a   : > { %v1274_v3 = vmul.f32 0.0625, %v1271_v63  ;;  %v1404_v63 = vpop.permute.xlu2 %1403 }
 0x16c   : > { %1289 = vrot.lane.b32.xlu0 %v1274_v3, %s2437_s17  ;;  %s2442_s17 = smov 122   ;;  %v1412_v3 = vld [vmem:[%s3040_s10] sm:$0xf] }
 0x16f   : > { %v1259_v4 = vpop.f32.mrf.mxu2  ;;  %v1272_v5 = vpop.f32.mrf.mxu3 }
 0x170   : > { %v602_v5 = vld [vmem:[%s3036_s6] sm:$0xf] }
 0x174   : > { %1326 = vperm.xlu0 %2397, %v1278_v6   ;;  %v603_v6 = vld [vmem:[%s3036_s6 + $0x4] sm:$0xf] }
 0x177   : > { %v1486_v12 = vpop.f32.mrf.mxu2  ;;  %v1499_v15 = vpop.f32.mrf.mxu3 }
 0x17c   : > { %1381 = vperm.xlu0 %2397, %v1283_v10  }
 0x17f   : > { %v1488_v21 = vpop.f32.mrf.mxu2  ;;  %v1501_v22 = vpop.f32.mrf.mxu3 }
 0x184   : > { %1297 = vperm.xlu0 %2397, %v1275_v11   ;;  %v1554_v11 = vld [vmem:[%s3041_s11 + $0xc] sm:$0xf] }
 0x1dd   : > { %v1444_v24 = vpop.f32.mrf.mxu0  ;;  %v1457_v25 = vpop.f32.mrf.mxu1 }
 0x1de   : > { %v2787_v26 = vmul.f32 %v1486_v12, %v1444_v24  ;;  %v2789_v13 = vmul.f32 %v1499_v15, %v1457_v25  ;;  %v1290_v28 = vpop.permute.xlu0 %1289  ;;  %v1557_v25 = vld [vmem:[%s3041_s11 + $0x18] sm:$0xf] }
 0x1df   : > { %1293 = vst.msk [vmem:[#allocation3] sm:$0xf] %vm1292_vm9, %v1290_v28 }
 0x1e5   : > { %v1446_v36 = vpop.f32.mrf.mxu0  ;;  %v1459_v37 = vpop.f32.mrf.mxu1 }
 0x1e6   : > { %v2791_v38 = vld [vmem:[#allocation3] sm:$0xf]  ;;  %v1327_v39 = vpop.permute.xlu0 %1326 }
 0x1e7   : > { %v1329_v43 = vmul.f32 %v1327_v39, %v2791_v38  ;;  %v1318_v44 = vmul.f32 %v1316_v34, %v2791_v38  ;;  %v1307_v45 = vmul.f32 %v1305_v23, %v2791_v38  ;;  %v1351_v48 = vmul.f32 %v1349_v46, %v2791_v38  ;;  %v1556_v34 = vld [vmem:[%s3041_s11 + $0x14] sm:$0xf] }
 0x1e8   : > { %v1362_v52 = vmul.f32 %v1360_v47, %v2791_v38  ;;  %v1340_v56 = vmul.f32 %v1338_v35, %v2791_v38  ;;  %v1395_v60 = vmul.f32 %v1393_v59, %v2791_v38  ;;  %v1373_v62 = vmul.f32 %v1371_v57, %v2791_v38  ;;  %v604_v47 = vld [vmem:[%s3036_s6 + $0x8] sm:$0xf]  ;;  %v1558_v57 = vld [vmem:[%s3041_s11 + $0x1c] sm:$0xf] }
 0x1e9   : > { %1320 = vrot.lane.b32.xlu2 %v1318_v44, %s2439_s20  ;;  %1331 = vrot.lane.b32.xlu0 %v1329_v43, %s2440_s30  ;;  %v1406_v4 = vmul.f32 %v1404_v63, %v2791_v38  ;;  %s2447_s20 = smov 118   ;;  %v1560_v43 = vld [vmem:[%s3041_s11 + $0x24] sm:$0xf] }
 0x1ea   : > { %1309 = vrot.lane.b32.xlu1 %v1307_v45, %s3053_s15  ;;  %v1559_v45 = vld [vmem:[%s3041_s11 + $0x20] sm:$0xf] }
 0x1ee   : > { %v1382_v58 = vpop.permute.xlu0 %1381 }
 0x1ef   : > { %v1384_v61 = vmul.f32 %v1382_v58, %v2791_v38 }
 0x1f1   : > { %1353 = vrot.lane.b32.xlu2 %v1351_v48, %s2441_s21  ;;  %1364 = vrot.lane.b32.xlu0 %v1362_v52, %s2442_s17  ;;  %s3059_s21 = smov 111   ;;  %s3060_s17 = smov 16   ;;  %v607_v48 = vld [vmem:[%s3036_s6 + $0x14] sm:$0xf] }
 0x1f2   : > { %1342 = vrot.lane.b32.xlu1 %v1340_v56, %s2443_s18 }
 0x1f9   : > { %1397 = vrot.lane.b32.xlu0 %v1395_v60, %s2444_s22  ;;  %1386 = vrot.lane.b32.xlu2 %v1384_v61, %s2445_s23  ;;  %s3055_s23 = smov 16   ;;  %s3058_s22 = smov 113  }
 0x1fa   : > { %1375 = vrot.lane.b32.xlu1 %v1373_v62, %s2446_s24 }
 0x201   : > { %1415 = vperm.xlu2 %2396, %v1412_v3  }
 0x202   : > { %1408 = vrot.lane.b32.xlu1 %v1406_v4, %s2447_s20  ;;  %s3051_s20 = smov 112  }
 0x209   : > { %648 = vrot.lane.b32.xlu2 %v2570_v30, %s2435_s19  ;;  %v605_v30 = vld [vmem:[%s3036_s6 + $0xc] sm:$0xf] }
 0x20a   : > { %637 = vperm.xlu1 %2395, %v602_v5  }
 0x211   : > { %668 = vperm.xlu2 %2396, %v603_v6  }
 0x212   : > { %652 = vrot.lane.b32.xlu1 %v2568_v27, %s2435_s19  ;;  %v606_v27 = vld [vmem:[%s3036_s6 + $0x10] sm:$0xf] }
 0x219   : > { %683 = vrot.lane.b32.xlu2 %v2579_v42, %s3055_s23  ;;  %v609_v42 = vld [vmem:[%s3036_s6 + $0x1c] sm:$0xf] }
 0x21a   : > { %681 = vrot.lane.b32.xlu1 %v2577_v41, %s3055_s23  ;;  %v608_v41 = vld [vmem:[%s3036_s6 + $0x18] sm:$0xf]  ;;  %s2451_s23 = smov 64  }
 0x221   : > { %731 = vrot.lane.b32.xlu2 %v2596_v54, %s3054_s16 }
 0x222   : > { %729 = vrot.lane.b32.xlu1 %v2594_v53, %s3054_s16  ;;  %v1298_v53 = vpop.permute.xlu0 %1297 }
 0x229   : > { %769 = vrot.lane.b32.xlu2 %v2624_v7, %s3057_s14  ;;  %v1300_v7 = vmul.f32 %v1298_v53, %v2791_v38 }
 0x22a   : > { %758 = vperm.xlu1 %2395, %v605_v30  }
 0x231   : > { %788 = vperm.xlu2 %2396, %v606_v27  }
 0x232   : > { %773 = vrot.lane.b32.xlu1 %v2628_v9, %s3057_s14 }
 0x239   : > { %827 = vrot.lane.b32.xlu2 %v2688_v50, %s3053_s15 }
 0x23a   : > { %825 = vrot.lane.b32.xlu1 %v2686_v49, %s3053_s15  ;;  %s3061_s15 = smov 15  }
 0x241   : > { %863 = vrot.lane.b32.xlu2 %v2704_v0, %s3058_s22 }
 0x242   : > { %852 = vperm.xlu1 %2395, %v608_v41  }
 0x243   : > { %v1321_v54 = vpop.permute.xlu2 %1320 }
 0x249   : > { %882 = vperm.xlu2 %2396, %v609_v42  }
 0x24a   : > { %867 = vrot.lane.b32.xlu1 %v2690_v51, %s3058_s22  ;;  %v1551_v51 = vld [vmem:[%s3041_s11] sm:$0xf] }
 0x251   : > { %897 = vrot.lane.b32.xlu2 %v2708_v2, %s3051_s20  ;;  %v946_v2 = vld [vmem:[%s3037_s7] sm:$0xf] }
 0x252   : > { %895 = vrot.lane.b32.xlu1 %v2725_v17, %s3051_s20  ;;  %v1354_v17 = vpop.permute.xlu2 %1353  ;;  %s2453_s20 = smov 32  }
 0x259   : > { %934 = vrot.lane.b32.xlu2 %v2731_v20, %s3059_s21 }
 0x25a   : > { %932 = vrot.lane.b32.xlu1 %v2729_v19, %s3059_s21  ;;  %v1387_v22 = vpop.permute.xlu2 %1386 }
 0x25b   : > { %v1332_v50 = vpop.permute.xlu0 %1331 }
 0x25c   : > { %v1310_v9 = vpop.permute.xlu1 %1309 }
 0x25d   : > { %v1312_v49 = vadd.f32 %v1310_v9, %v1300_v7 }
 0x25f   : > { %v1323_v0 = vadd.f32 %v1321_v54, %v1312_v49 }
 0x261   : > { %1567 = vperm.xlu2 %2396, %v1551_v51   ;;  %v1334_v20 = vadd.f32 %v1332_v50, %v1323_v0 }
 0x262   : > { %949 = vperm.xlu1 %2395, %v946_v2   ;;  %v1416_v39 = vpop.permute.xlu2 %1415 }
 0x263   : > { %v1365_v15 = vpop.permute.xlu0 %1364 }
 0x264   : > { %v1343_v10 = vpop.permute.xlu1 %1342 }
 0x265   : > { %v1345_v19 = vadd.f32 %v1343_v10, %v1334_v20 }
 0x267   : > { %v1356_v12 = vadd.f32 %v1354_v17, %v1345_v19 }
 0x269   : > { %1660 = vperm.xlu2 %2396, %v1554_v11   ;;  %v1367_v21 = vadd.f32 %v1365_v15, %v1356_v12 }
 0x26a   : > { %1629 = vperm.xlu1 %2395, %v1553_v14  }
 0x26b   : > { %v1398_v35 = vpop.permute.xlu0 %1397 }
 0x26c   : > { %v1376_v23 = vpop.permute.xlu1 %1375 }
 0x26d   : > { %v1378_v24 = vadd.f32 %v1376_v23, %v1367_v21 }
 0x26f   : > { %v1389_v28 = vadd.f32 %v1387_v22, %v1378_v24 }
 0x271   : > { %1738 = vperm.xlu2 %2396, %v1557_v25   ;;  %v1400_v36 = vadd.f32 %v1398_v35, %v1389_v28 }
 0x272   : > { %1720 = vperm.xlu1 %2395, %v1556_v34  }
 0x274   : > { %v1409_v37 = vpop.permute.xlu1 %1408 }
 0x275   : > { %v1411_v38 = vadd.f32 %v1409_v37, %v1400_v36 }
 0x277   : > { %v1418_v44 = vadd.f32 %v1416_v39, %v1411_v38 }
 0x279   : > { %v1503_v46 = vpack.c.bf16 %v1418_v44, %v1418_v44  ;;  %1829 = vperm.xlu2 %2396, %v1560_v43  }
 0x27a   : > { %1799 = vperm.xlu1 %2395, %v1559_v45  }
 0x27b   : > { %1505 = vrot.lane.b32.xlu0 %v1503_v46, %s2440_s30  ;;  %s3063_s30 = smov 112  }
 0x283   : > { %650 = vrot.lane.b32.xlu0 %v2572_v31, %s2435_s19  ;;  %s3062_s19 = smov 127   ;;  %v610_v31 = vld [vmem:[%s3036_s6 + $0x20] sm:$0xf] }
 0x28b   : > { %679 = vrot.lane.b32.xlu0 %v2575_v40, %s3060_s17  ;;  %v638_v40 = vpop.permute.xlu1 %637 }
 0x293   : > { %718 = vperm.xlu0 %2397, %v604_v47  }
 0x29b   : > { %733 = vrot.lane.b32.xlu0 %v2598_v55, %s3061_s15  ;;  %v649_v55 = vpop.permute.xlu2 %648 }
 0x2a3   : > { %771 = vrot.lane.b32.xlu0 %v2626_v8, %s3057_s14  ;;  %v1552_v8 = vld [vmem:[%s3041_s11 + $0x4] sm:$0xf] }
 0x2ab   : > { %814 = vperm.xlu0 %2397, %v607_v48  }
 0x2b3   : > { %829 = vrot.lane.b32.xlu0 %v2665_v33, %s3062_s19  ;;  %v653_v33 = vpop.permute.xlu1 %652  ;;  %s2452_s19 = smov 48  }
 0x2bb   : > { %865 = vrot.lane.b32.xlu0 %v2706_v1, %s3058_s22  ;;  %v669_v1 = vpop.permute.xlu2 %668  ;;  %v682_v52 = vpop.permute.xlu1 %681  ;;  %s3064_s22 = sshll.u32 %s3070_s25, 2 }
 0x2bc   : > { %s595_s16 = scalar_lea.vmem %s3043_s13, %s3064_s22 }
 0x2c3   : > { %893 = vrot.lane.b32.xlu0 %v2723_v16, %s3063_s30  ;;  %v1555_v16 = vld [vmem:[%s3041_s11 + $0x10] sm:$0xf]  ;;  %v684_v56 = vpop.permute.xlu2 %683  ;;  %v730_v58 = vpop.permute.xlu1 %729 }
 0x2c4   : > { %v687_v60 = vsel %vm685_vm7, %v682_v52, %v684_v56 }
 0x2c5   : > { %v691_v63 = vmul.f32 %v687_v60, %v669_v1 }
 0x2cb   : > { %921 = vperm.xlu0 %2397, %v610_v31   ;;  %v732_v59 = vpop.permute.xlu2 %731  ;;  %v759_v4 = vpop.permute.xlu1 %758 }
 0x2cc   : > { %v736_v49 = vsel %vm735_vm5, %v730_v58, %v732_v59 }
 0x2d3   : > { %936 = vrot.lane.b32.xlu0 %v2727_v18, %s3059_s21  ;;  %v770_v6 = vpop.permute.xlu2 %769  ;;  %v774_v7 = vpop.permute.xlu1 %773  ;;  %s2450_s21 = smov 80  }
 0x2db   : > { %1598 = vperm.xlu0 %2397, %v1552_v8   ;;  %v789_v9 = vpop.permute.xlu2 %788  ;;  %v826_v2 = vpop.permute.xlu1 %825 }
 0x2dc   : > { %v797_v24 = vmul.f32 %v2661_v29, %v789_v9  ;;  %v798_v25 = vmul.f32 %v2663_v32, %v789_v9 }
 0x2e3   : > { %1691 = vperm.xlu0 %2397, %v1555_v16   ;;  %v828_v10 = vpop.permute.xlu2 %827  ;;  %v853_v21 = vpop.permute.xlu1 %852 }
 0x2e4   : > { %v831_v38 = vsel %vm750_vm3, %v826_v2, %v828_v10 }
 0x2eb   : > { %1768 = vperm.xlu0 %2397, %v1558_v57   ;;  %v864_v28 = vpop.permute.xlu2 %863  ;;  %v868_v45 = vpop.permute.xlu1 %867 }
 0x2ed   : > { %v1506_v18 = vpop.permute.xlu0 %1505 }
 0x2ee   : > { %2302 = vmatmul.msk.bf16.vlgmr.msra.gmra.mxu0 %vm685_vm7, %v1506_v18  ;;  %2303 = vmatmul.msk.bf16.vlgmr.msra.gmra.mxu1 %vm685_vm7, %v1506_v18 }
 0x2f3   : > { %v883_v46 = vpop.permute.xlu2 %882  ;;  %v896_v29 = vpop.permute.xlu1 %895 }
 0x2f5   : > { %v651_v61 = vpop.permute.xlu0 %650 }
 0x2f6   : > { %v656_v62 = vsel %vm654_vm6, %v651_v61, %v653_v33  ;;  %v655_v30 = vsel %vm654_vm6, %v649_v55, %v651_v61 }
 0x2f7   : > { %v660_v3 = vmul.f32 %v656_v62, %v638_v40  ;;  %v659_v42 = vmul.f32 %v655_v30, %v638_v40 }
 0x2f9   : > { %v693_v5 = vadd.f32 %v691_v63, %v660_v3 }
 0x2fb   : > { %v898_v32 = vpop.permute.xlu2 %897  ;;  %v933_v63 = vpop.permute.xlu1 %932 }
 0x2fc   : > { %v901_v8 = vsel %vm899_vm10, %v896_v29, %v898_v32 }
 0x2fd   : > { %v680_v27 = vpop.permute.xlu0 %679  ;;  %v905_v56 = vmul.f32 %v901_v8, %v883_v46 }
 0x2fe   : > { %v686_v41 = vsel %vm685_vm7, %v680_v27, %v682_v52 }
 0x2ff   : > { %v690_v53 = vmul.f32 %v686_v41, %v669_v1 }
 0x301   : > { %v692_v54 = vadd.f32 %v690_v53, %v659_v42 }
 0x303   : > { %v935_v3 = vpop.permute.xlu2 %934 }
 0x305   : > { %v719_v50 = vpop.permute.xlu0 %718 }
 0x306   : > { %v740_v51 = vmul.f32 %v736_v49, %v719_v50 }
 0x308   : > { %v742_v0 = vadd.f32 %v740_v51, %v692_v54 }
 0x30d   : > { %v734_v17 = vpop.permute.xlu0 %733 }
 0x30e   : > { %v737_v20 = vsel %vm735_vm5, %v732_v59, %v734_v17 }
 0x30f   : > { %v741_v19 = vmul.f32 %v737_v20, %v719_v50 }
 0x311   : > { %v743_v11 = vadd.f32 %v741_v19, %v693_v5 }
 0x315   : > { %v772_v12 = vpop.permute.xlu0 %771 }
 0x316   : > { %v776_v14 = vsel %vm775_vm4, %v770_v6, %v772_v12  ;;  %v777_v15 = vsel %vm775_vm4, %v772_v12, %v774_v7 }
 0x317   : > { %v780_v22 = vmul.f32 %v776_v14, %v759_v4  ;;  %v781_v23 = vmul.f32 %v777_v15, %v759_v4  ;;  %v938_v4 = vsel %vm629_vm1, %v933_v63, %v935_v3 }
 0x319   : > { %v782_v34 = vadd.f32 %v780_v22, %v742_v0  ;;  %v783_v35 = vadd.f32 %v781_v23, %v743_v11 }
 0x31b   : > { %v799_v36 = vadd.f32 %v797_v24, %v782_v34  ;;  %v800_v37 = vadd.f32 %v798_v25, %v783_v35 }
 0x31d   : > { %v815_v39 = vpop.permute.xlu0 %814 }
 0x31e   : > { %v835_v43 = vmul.f32 %v831_v38, %v815_v39 }
 0x320   : > { %v837_v44 = vadd.f32 %v835_v43, %v799_v36 }
 0x325   : > { %v830_v47 = vpop.permute.xlu0 %829 }
 0x326   : > { %v832_v48 = vsel %vm750_vm3, %v828_v10, %v830_v47 }
 0x327   : > { %v836_v31 = vmul.f32 %v832_v48, %v815_v39 }
 0x329   : > { %v838_v40 = vadd.f32 %v836_v31, %v800_v37 }
 0x32d   : > { %v866_v55 = vpop.permute.xlu0 %865 }
 0x32e   : > { %v869_v33 = vsel %vm710_vm2, %v864_v28, %v866_v55  ;;  %v870_v1 = vsel %vm710_vm2, %v866_v55, %v868_v45 }
 0x32f   : > { %v873_v16 = vmul.f32 %v869_v33, %v853_v21  ;;  %v874_v52 = vmul.f32 %v870_v1, %v853_v21 }
 0x331   : > { %v875_v57 = vadd.f32 %v873_v16, %v837_v44  ;;  %v876_v18 = vadd.f32 %v874_v52, %v838_v40 }
 0x333   : > { %v907_v58 = vadd.f32 %v905_v56, %v876_v18 }
 0x335   : > { %v894_v59 = vpop.permute.xlu0 %893 }
 0x336   : > { %v900_v60 = vsel %vm899_vm10, %v894_v59, %v896_v29 }
 0x337   : > { %v904_v61 = vmul.f32 %v900_v60, %v883_v46 }
 0x339   : > { %v906_v62 = vadd.f32 %v904_v61, %v875_v57 }
 0x33d   : > { %v922_v5 = vpop.permute.xlu0 %921 }
 0x33e   : > { %v942_v6 = vmul.f32 %v938_v4, %v922_v5 }
 0x340   : > { %v2937_v30 = vadd.f32 %v942_v6, %v906_v62 }
 0x345   : > { %v937_v27 = vpop.permute.xlu0 %936 }
 0x346   : > { %v939_v41 = vsel %vm629_vm1, %v935_v3, %v937_v27 }
 0x347   : > { %v943_v42 = vmul.f32 %v939_v41, %v922_v5 }
 0x349   : > { %v2940_v53 = vadd.f32 %v943_v42, %v907_v58 }
 0x36b   : > { %v1519_v54 = vpop.f32.mrf.mxu0  ;;  %v1532_v7 = vpop.f32.mrf.mxu1 }
 0x36c   : > { %v1538_v9 = vadd.f32 %v2787_v26, %v1519_v54  ;;  %v1539_v49 = vadd.f32 %v2789_v13, %v1532_v7 }
 0x36e   : > { %v1540_v50 = vmax.f32 %v1538_v9, 0.0  ;;  %v1541_v51 = vmax.f32 %v1539_v49, 0.0 }
 0x370   : > { %v1542_v0 = vpack.c.bf16 %v1541_v51, %v1540_v50 }
 0x372   : > { %v1544_v2 = vrot.slane %v1542_v0, 2 }
 0x373   : > { %v1521_v17 = vpop.f32.mrf.mxu0  ;;  %v1534_v20 = vpop.f32.mrf.mxu1 }
 0x374   : > { %v1548_v10 = vsel %vm1545_vm11, %v1542_v0, %v1544_v2 }
 0x375   : > { %1550 = vst [vmem:[#allocation2 + $0x2] sm:$0xf] %v1548_v10  ;;  %v1568_v10 = vpop.permute.xlu2 %1567 }
 0x37c   : > { %v1562_v19 = vld [vmem:[#allocation2] sm:$0x3f] }
 0x37d   : > { %v1563_v11 = vunpack.c.l.bf16 %v1562_v19  ;;  %v1564_v12 = vunpack.c.h.bf16 %v1562_v19  ;;  %v1593_v14 = vld [vmem:[#allocation2] sm:$0x3f]  ;;  %v2970_v19 = vpop.permute.xlu1 %949 }
 0x37e   : > { %v1594_v15 = vunpack.c.l.bf16 %v1593_v14  ;;  %v1595_v26 = vunpack.c.h.bf16 %v1593_v14  ;;  %v1624_v23 = vld [vmem:[#allocation2] sm:$0x3f] }
 0x37f   : > { %1572 = vst [vmem:[#allocation1] ss:$2 sm:$0xff] %v1563_v11  ;;  %v1625_v24 = vunpack.c.l.bf16 %v1624_v23  ;;  %v1626_v25 = vunpack.c.h.bf16 %v1624_v23  ;;  %v1655_v36 = vld [vmem:[#allocation2] sm:$0x3f] }
 0x380   : > { %1574 = vst [vmem:[#allocation1 + $0x10] ss:$2 sm:$0xff] %v1564_v12  ;;  %v1656_v37 = vunpack.c.l.bf16 %v1655_v36  ;;  %v1657_v38 = vunpack.c.h.bf16 %v1655_v36  ;;  %v1686_v45 = vld [vmem:[#allocation2] sm:$0x3f] }
 0x381   : > { %v1687_v46 = vunpack.c.l.bf16 %v1686_v45  ;;  %v1688_v47 = vunpack.c.h.bf16 %v1686_v45  ;;  %v1716_v29 = vld [vmem:[#allocation2 + $0x2] sm:$0xf] }
 0x382   : > { %v1733_v32 = vld [vmem:[#allocation2 + $0x2] sm:$0x3f]  ;;  %v1717_v55 = vunpack.c.l.bf16 %v1716_v29 }
 0x383   : > { %v1735_v8 = vunpack.c.h.bf16 %v1733_v32  ;;  %v1763_v52 = vld [vmem:[#allocation2 + $0x2] sm:$0x3f]  ;;  %v1734_v56 = vunpack.c.l.bf16 %v1733_v32 }
 0x384   : > { %v1765_v57 = vunpack.c.h.bf16 %v1763_v52  ;;  %v1794_v60 = vld [vmem:[#allocation2 + $0x2] sm:$0x3f]  ;;  %v1764_v61 = vunpack.c.l.bf16 %v1763_v52 }
 0x385   : > { %v1796_v62 = vunpack.c.h.bf16 %v1794_v60  ;;  %v1824_v5 = vld [vmem:[#allocation2 + $0x2] sm:$0x3f]  ;;  %v1795_v6 = vunpack.c.l.bf16 %v1794_v60 }
 0x386   : > { %v1576_v21 = vld.sshfl [vmem:[#allocation1 + $0x8] sm:$0xff pattern:$0x75316420]  ;;  %v1575_v13 = vld.sshfl [vmem:[#allocation1] sm:$0xff pattern:$0x75316420]  ;;  %v1826_v27 = vunpack.c.h.bf16 %v1824_v5  ;;  %v1825_v9 = vunpack.c.l.bf16 %v1824_v5 }
 0x387   : > { %v1577_v22 = vld.sshfl [vmem:[#allocation1 + $0x10] sm:$0xff pattern:$0x75316420]  ;;  %1580 = vrot.lane.b32.xlu1 %v1576_v21, %s2450_s21  ;;  %1578 = vrot.lane.b32.xlu0 %v1575_v13, %s2450_s21  ;;  %1603 = vst [vmem:[#allocation1] ss:$2 sm:$0xff] %v1594_v15  ;;  %v1661_v15 = vpop.permute.xlu2 %1660  ;;  %v1630_v21 = vpop.permute.xlu1 %1629 }
 0x388   : > { %1582 = vrot.lane.b32.xlu2 %v1577_v22, %s2450_s21  ;;  %1605 = vst [vmem:[#allocation1 + $0x10] ss:$2 sm:$0xff] %v1595_v26  ;;  %v1854_v7 = vld [vmem:[#allocation2 + $0x2] sm:$0x3f]  ;;  %v1884_v26 = vld [vmem:[%s3042_s12] sm:$0xf]  ;;  %v1599_v13 = vpop.permute.xlu0 %1598 }
 0x389   : > { %v1856_v49 = vunpack.c.h.bf16 %v1854_v7  ;;  %v1855_v2 = vunpack.c.l.bf16 %v1854_v7  ;;  %v1561_v22 = vld [vmem:[%s3041_s11 + $0x28] sm:$0xf] }
 0x38e   : > { %v1607_v28 = vld.sshfl [vmem:[#allocation1 + $0x8] sm:$0xff pattern:$0x75316420]  ;;  %v1606_v34 = vld.sshfl [vmem:[#allocation1] sm:$0xff pattern:$0x75316420] }
 0x38f   : > { %v1608_v35 = vld.sshfl [vmem:[#allocation1 + $0x10] sm:$0xff pattern:$0x75316420]  ;;  %1609 = vrot.lane.b32.xlu1 %v1606_v34, %s2451_s23  ;;  %1634 = vst [vmem:[#allocation1] ss:$2 sm:$0xff] %v1625_v24  ;;  %v1739_v23 = vpop.permute.xlu2 %1738  ;;  %v1721_v24 = vpop.permute.xlu1 %1720 }
 0x390   : > { %1613 = vrot.lane.b32.xlu0 %v1608_v35, %s2451_s23  ;;  %1636 = vst [vmem:[#allocation1 + $0x10] ss:$2 sm:$0xff] %v1626_v25  ;;  %1611 = vrot.lane.b32.xlu2 %v1607_v28, %s2451_s23  ;;  %v1692_v25 = vpop.permute.xlu0 %1691 }
 0x396   : > { %v1638_v39 = vld.sshfl [vmem:[#allocation1 + $0x8] sm:$0xff pattern:$0x75316420]  ;;  %v1637_v43 = vld.sshfl [vmem:[#allocation1] sm:$0xff pattern:$0x75316420] }
 0x397   : > { %v1639_v44 = vld.sshfl [vmem:[#allocation1 + $0x10] sm:$0xff pattern:$0x75316420]  ;;  %1665 = vst [vmem:[#allocation1] ss:$2 sm:$0xff] %v1656_v37  ;;  %v2981_v28 = vpop.permute.xlu2 %1829  ;;  %v2983_v34 = vpop.permute.xlu1 %1799 }
 0x398   : > { %1644 = vrot.lane.b32.xlu1 %v1639_v44, %s2452_s19  ;;  %1667 = vst [vmem:[#allocation1 + $0x10] ss:$2 sm:$0xff] %v1657_v38  ;;  %1642 = vrot.lane.b32.xlu0 %v1638_v39, %s2452_s19  ;;  %v2985_v35 = vpop.permute.xlu0 %1768 }
 0x399   : > { %1640 = vrot.lane.b32.xlu2 %v1637_v43, %s2452_s19 }
 0x39e   : > { %v1669_v48 = vld.sshfl [vmem:[#allocation1 + $0x8] sm:$0xff pattern:$0x75316420]  ;;  %v1668_v31 = vld.sshfl [vmem:[#allocation1] sm:$0xff pattern:$0x75316420] }
 0x39f   : > { %v1670_v40 = vld.sshfl [vmem:[#allocation1 + $0x10] sm:$0xff pattern:$0x75316420]  ;;  %1696 = vst [vmem:[#allocation1] ss:$2 sm:$0xff] %v1687_v46 }
 0x3a0   : > { %1698 = vst [vmem:[#allocation1 + $0x10] ss:$2 sm:$0xff] %v1688_v47  ;;  %1673 = vrot.lane.b32.xlu1 %v1669_v48, %s2453_s20  ;;  %1671 = vrot.lane.b32.xlu0 %v1668_v31, %s2453_s20 }
 0x3a1   : > { %1675 = vrot.lane.b32.xlu2 %v1670_v40, %s2453_s20 }
 0x3a6   : > { %v1700_v33 = vld.sshfl [vmem:[#allocation1 + $0x8] sm:$0xff pattern:$0x75316420]  ;;  %v1699_v1 = vld.sshfl [vmem:[#allocation1] sm:$0xff pattern:$0x75316420] }
 0x3a7   : > { %v1701_v16 = vld.sshfl [vmem:[#allocation1 + $0x10] sm:$0xff pattern:$0x75316420]  ;;  %1724 = vst [vmem:[#allocation1] ss:$2 sm:$0xff] %v1717_v55 }
 0x3a8   : > { %1706 = vrot.lane.b32.xlu0 %v1701_v16, %s3060_s17  ;;  %1745 = vst [vmem:[#allocation1 + $0x10] ss:$2 sm:$0xff] %v1735_v8  ;;  %1702 = vrot.lane.b32.xlu1 %v1699_v1, %s3060_s17 }
 0x3a9   : > { %1704 = vrot.lane.b32.xlu2 %v1700_v33, %s3060_s17  ;;  %s2454_s17 = smov 96  }
 0x3ae   : > { %v2957_v18 = vld.sshfl [vmem:[#allocation1] sm:$0xff pattern:$0x75316420]  ;;  %v2959_v58 = vld.sshfl [vmem:[#allocation1 + $0x8] sm:$0xff pattern:$0x75316420] }
 0x3af   : > { %v1748_v59 = vld.sshfl [vmem:[#allocation1 + $0x10] sm:$0xff pattern:$0x75316420]  ;;  %1743 = vst [vmem:[#allocation1] ss:$2 sm:$0xff] %v1734_v56 }
 0x3b0   : > { %1753 = vrot.lane.b32.xlu1 %v1748_v59, %s3063_s30  ;;  %1775 = vst [vmem:[#allocation1 + $0x10] ss:$2 sm:$0xff] %v1765_v57 }
 0x3b6   : > { %v1747_v63 = vld.sshfl [vmem:[#allocation1 + $0x8] sm:$0xff pattern:$0x75316420]  ;;  %v1746_v3 = vld.sshfl [vmem:[#allocation1] sm:$0xff pattern:$0x75316420] }
 0x3b7   : > { %1751 = vrot.lane.b32.xlu0 %v1747_v63, %s3063_s30  ;;  %1749 = vrot.lane.b32.xlu2 %v1746_v3, %s3063_s30  ;;  %1773 = vst [vmem:[#allocation1] ss:$2 sm:$0xff] %v1764_v61  ;;  %v1778_v4 = vld.sshfl [vmem:[#allocation1 + $0x10] sm:$0xff pattern:$0x75316420] }
 0x3b8   : > { %1806 = vst [vmem:[#allocation1 + $0x10] ss:$2 sm:$0xff] %v1796_v62 }
 0x3be   : > { %v1777_v41 = vld.sshfl [vmem:[#allocation1 + $0x8] sm:$0xff pattern:$0x75316420]  ;;  %v1776_v42 = vld.sshfl [vmem:[#allocation1] sm:$0xff pattern:$0x75316420] }
 0x3bf   : > { %1783 = vrot.lane.b32.xlu2 %v1778_v4, %s2454_s17  ;;  %1781 = vrot.lane.b32.xlu1 %v1777_v41, %s2454_s17  ;;  %1804 = vst [vmem:[#allocation1] ss:$2 sm:$0xff] %v1795_v6  ;;  %v1809_v54 = vld.sshfl [vmem:[#allocation1 + $0x10] sm:$0xff pattern:$0x75316420] }
 0x3c0   : > { %1779 = vrot.lane.b32.xlu0 %v1776_v42, %s2454_s17  ;;  %1836 = vst [vmem:[#allocation1 + $0x10] ss:$2 sm:$0xff] %v1826_v27 }
 0x3c6   : > { %v1808_v50 = vld.sshfl [vmem:[#allocation1 + $0x8] sm:$0xff pattern:$0x75316420]  ;;  %v1807_v51 = vld.sshfl [vmem:[#allocation1] sm:$0xff pattern:$0x75316420] }
 0x3c7   : > { %1812 = vrot.lane.b32.xlu2 %v1808_v50, %s2450_s21  ;;  %1810 = vrot.lane.b32.xlu1 %v1807_v51, %s2450_s21  ;;  %1834 = vst [vmem:[#allocation1] ss:$2 sm:$0xff] %v1825_v9  ;;  %v1839_v0 = vld.sshfl [vmem:[#allocation1 + $0x10] sm:$0xff pattern:$0x75316420] }
 0x3c8   : > { %1814 = vrot.lane.b32.xlu0 %v1809_v54, %s2450_s21  ;;  %1866 = vst [vmem:[#allocation1 + $0x10] ss:$2 sm:$0xff] %v1856_v49 }
 0x3ce   : > { %v1838_v17 = vld.sshfl [vmem:[#allocation1 + $0x8] sm:$0xff pattern:$0x75316420]  ;;  %v1837_v20 = vld.sshfl [vmem:[#allocation1] sm:$0xff pattern:$0x75316420] }
 0x3cf   : > { %1844 = vrot.lane.b32.xlu1 %v1839_v0, %s2451_s23  ;;  %1840 = vrot.lane.b32.xlu2 %v1837_v20, %s2451_s23  ;;  %1864 = vst [vmem:[#allocation1] ss:$2 sm:$0xff] %v1855_v2  ;;  %v1869_v11 = vld.sshfl [vmem:[#allocation1 + $0x10] sm:$0xff pattern:$0x75316420] }
 0x3d0   : > { %1842 = vrot.lane.b32.xlu0 %v1838_v17, %s2451_s23 }
 0x3d6   : > { %v1868_v12 = vld.sshfl [vmem:[#allocation1 + $0x8] sm:$0xff pattern:$0x75316420]  ;;  %v1867_v14 = vld.sshfl [vmem:[#allocation1] sm:$0xff pattern:$0x75316420] }
 0x3d7   : > { %1874 = vrot.lane.b32.xlu2 %v1869_v11, %s2452_s19  ;;  %1872 = vrot.lane.b32.xlu1 %v1868_v12, %s2452_s19 }
 0x3d8   : > { %1870 = vrot.lane.b32.xlu0 %v1867_v14, %s2452_s19 }
 0x3df   : > { %1887 = vperm.xlu1 %2395, %v1884_v26   ;;  %v1730_v26 = vmul.f32 %v2959_v58, %v1721_v24 }
 0x3e0   : > { %1859 = vperm.xlu0 %2397, %v1561_v22  }
 0x3e2   : > { %v1583_v36 = vpop.permute.xlu2 %1582 }
 0x3ea   : > { %v1612_v39 = vpop.permute.xlu2 %1611 }
 0x3f3   : > { %v1641_v45 = vpop.permute.xlu2 %1640 }
 0x3f9   : > { %v1581_v37 = vpop.permute.xlu1 %1580  ;;  %v1579_v38 = vpop.permute.xlu0 %1578 }
 0x3fa   : > { %v1586_v1 = vsel %vm1584_vm13, %v1581_v37, %v1583_v36  ;;  %v1585_v52 = vsel %vm1584_vm13, %v1579_v38, %v1581_v37 }
 0x3fb   : > { %v1676_v48 = vpop.permute.xlu2 %1675  ;;  %v1590_v61 = vmul.f32 %v1586_v1, %v1568_v10  ;;  %v1589_v3 = vmul.f32 %v1585_v52, %v1568_v10 }
 0x401   : > { %v1610_v43 = vpop.permute.xlu1 %1609 }
 0x402   : > { %v1614_v44 = vpop.permute.xlu0 %1613  ;;  %v1616_v8 = vsel %vm1615_vm12, %v1610_v43, %v1612_v39 }
 0x403   : > { %v1705_v29 = vpop.permute.xlu2 %1704  ;;  %v1617_v55 = vsel %vm1615_vm12, %v1612_v39, %v1614_v44  ;;  %v1620_v59 = vmul.f32 %v1616_v8, %v1599_v13 }
 0x404   : > { %v1621_v56 = vmul.f32 %v1617_v55, %v1599_v13 }
 0x405   : > { %v1622_v54 = vadd.f32 %v1620_v59, %v1589_v3 }
 0x406   : > { %v1623_v6 = vadd.f32 %v1621_v56, %v1590_v61 }
 0x40a   : > { %v1645_v46 = vpop.permute.xlu1 %1644  ;;  %v1643_v47 = vpop.permute.xlu0 %1642 }
 0x40b   : > { %v1648_v16 = vsel %vm1646_vm14, %v1643_v47, %v1645_v46  ;;  %v1647_v57 = vsel %vm1646_vm14, %v1641_v45, %v1643_v47 }
 0x40c   : > { %v1652_v62 = vmul.f32 %v1648_v16, %v1630_v21  ;;  %v1651_v4 = vmul.f32 %v1647_v57, %v1630_v21 }
 0x40e   : > { %v1654_v9 = vadd.f32 %v1652_v62, %v1623_v6  ;;  %v1653_v0 = vadd.f32 %v1651_v4, %v1622_v54 }
 0x411   : > { %v1750_v41 = vpop.permute.xlu2 %1749 }
 0x412   : > { %v1674_v31 = vpop.permute.xlu1 %1673  ;;  %v1672_v40 = vpop.permute.xlu0 %1671 }
 0x413   : > { %v1679_v60 = vsel %vm1677_vm15, %v1674_v31, %v1676_v48  ;;  %v1678_v63 = vsel %vm1677_vm15, %v1672_v40, %v1674_v31 }
 0x414   : > { %v1683_v27 = vmul.f32 %v1679_v60, %v1661_v15  ;;  %v1682_v7 = vmul.f32 %v1678_v63, %v1661_v15  ;;  %v1729_v15 = vmul.f32 %v2957_v18, %v1721_v24 }
 0x416   : > { %v1685_v17 = vadd.f32 %v1683_v27, %v1654_v9  ;;  %v1684_v20 = vadd.f32 %v1682_v7, %v1653_v0 }
 0x419   : > { %v1784_v22 = vpop.permute.xlu2 %1783 }
 0x41a   : > { %v1703_v32 = vpop.permute.xlu1 %1702  ;;  %v1707_v33 = vpop.permute.xlu0 %1706 }
 0x41b   : > { %v1709_v5 = vsel %vm685_vm7, %v1705_v29, %v1707_v33  ;;  %v1708_v42 = vsel %vm685_vm7, %v1703_v32, %v1705_v29 }
 0x41c   : > { %v1713_v49 = vmul.f32 %v1709_v5, %v1692_v25  ;;  %v1712_v2 = vmul.f32 %v1708_v42, %v1692_v25 }
 0x41e   : > { %v1715_v11 = vadd.f32 %v1713_v49, %v1685_v17  ;;  %v1714_v14 = vadd.f32 %v1712_v2, %v1684_v20 }
 0x420   : > { %v1732_v36 = vadd.f32 %v1730_v26, %v1715_v11  ;;  %v1731_v38 = vadd.f32 %v1729_v15, %v1714_v14 }
 0x421   : > { %v1813_v29 = vpop.permute.xlu2 %1812 }
 0x422   : > { %v1754_v50 = vpop.permute.xlu1 %1753 }
 0x429   : > { %v1752_v51 = vpop.permute.xlu0 %1751  ;;  %v1841_v24 = vpop.permute.xlu2 %1840 }
 0x42a   : > { %v1756_v10 = vsel %vm899_vm10, %v1752_v51, %v1754_v50  ;;  %v1755_v12 = vsel %vm899_vm10, %v1750_v41, %v1752_v51 }
 0x42b   : > { %v1760_v21 = vmul.f32 %v1756_v10, %v1739_v23  ;;  %v1759_v13 = vmul.f32 %v1755_v12, %v1739_v23 }
 0x42d   : > { %v1762_v43 = vadd.f32 %v1760_v21, %v1732_v36  ;;  %v1761_v46 = vadd.f32 %v1759_v13, %v1731_v38 }
 0x431   : > { %v1782_v37 = vpop.permute.xlu1 %1781  ;;  %v1875_v59 = vpop.permute.xlu2 %1874 }
 0x432   : > { %v1787_v25 = vsel %vm1785_vm0, %v1782_v37, %v1784_v22  ;;  %v1780_v39 = vpop.permute.xlu0 %1779 }
 0x433   : > { %v1791_v44 = vmul.f32 %v1787_v25, %v2985_v35  ;;  %v1786_v45 = vsel %vm1785_vm0, %v1780_v39, %v1782_v37  ;;  %v952_v25 = vadd.f32 %v2970_v19, %v2937_v30 }
 0x434   : > { %v1790_v47 = vmul.f32 %v1786_v45, %v2985_v35 }
 0x435   : > { %v1793_v48 = vadd.f32 %v1791_v44, %v1762_v43  ;;  %v953_v44 = vadd.f32 %v2970_v19, %v2940_v53 }
 0x436   : > { %v1792_v58 = vadd.f32 %v1790_v47, %v1761_v46 }
 0x439   : > { %v1811_v31 = vpop.permute.xlu1 %1810 }
 0x43a   : > { %v1815_v40 = vpop.permute.xlu0 %1814  ;;  %v1816_v55 = vsel %vm1584_vm13, %v1811_v31, %v1813_v29 }
 0x43b   : > { %v1817_v32 = vsel %vm1584_vm13, %v1813_v29, %v1815_v40  ;;  %v1820_v52 = vmul.f32 %v1816_v55, %v2983_v34 }
 0x43c   : > { %v1821_v35 = vmul.f32 %v1817_v32, %v2983_v34 }
 0x43d   : > { %v1822_v61 = vadd.f32 %v1820_v52, %v1792_v58 }
 0x43e   : > { %v1823_v60 = vadd.f32 %v1821_v35, %v1793_v48 }
 0x441   : > { %v1845_v18 = vpop.permute.xlu1 %1844 }
 0x442   : > { %v1843_v23 = vpop.permute.xlu0 %1842 }
 0x443   : > { %v1846_v33 = vsel %vm1615_vm12, %v1841_v24, %v1843_v23  ;;  %v1847_v1 = vsel %vm1615_vm12, %v1843_v23, %v1845_v18 }
 0x444   : > { %v1850_v56 = vmul.f32 %v1846_v33, %v2981_v28  ;;  %v1851_v57 = vmul.f32 %v1847_v1, %v2981_v28 }
 0x446   : > { %v1853_v4 = vadd.f32 %v1851_v57, %v1823_v60  ;;  %v1852_v5 = vadd.f32 %v1850_v56, %v1822_v61 }
 0x449   : > { %v1873_v16 = vpop.permute.xlu1 %1872 }
 0x44a   : > { %v1871_v8 = vpop.permute.xlu0 %1870  ;;  %v1877_v63 = vsel %vm1646_vm14, %v1873_v16, %v1875_v59 }
 0x44b   : > { %v1876_v62 = vsel %vm1646_vm14, %v1871_v8, %v1873_v16 }
 0x451   : > { %v1888_v54 = vpop.permute.xlu1 %1887 }
 0x452   : > { %v1860_v3 = vpop.permute.xlu0 %1859 }
 0x453   : > { %v1880_v6 = vmul.f32 %v1876_v62, %v1860_v3  ;;  %v1881_v27 = vmul.f32 %v1877_v63, %v1860_v3 }
 0x455   : > { %v1882_v41 = vadd.f32 %v1880_v6, %v1852_v5  ;;  %v1883_v42 = vadd.f32 %v1881_v27, %v1853_v4 }
 0x457   : > { %v1890_v34 = vadd.f32 %v1888_v54, %v1882_v41  ;;  %v1891_v7 = vadd.f32 %v1888_v54, %v1883_v42 }
 0x459   : > { %v2304_v9 = vmul.f32 -1.442695, %v1890_v34  ;;  %v2305_v49 = vmul.f32 -1.442695, %v1891_v7 }
 0x45b   : > { %2398 = vpow2.f32 %v2304_v9 }
 0x45c   : > { %2400 = vpow2.f32 %v2305_v49 }
 0x461   : > { %v2399_v28 = vpop.eup %2398 }
 0x462   : > { %v2401_v50 = vpop.eup %2400  ;;  %v1898_v51 = vadd.f32 1.0, %v2399_v28 }
 0x463   : > { %v1899_v0 = vadd.f32 1.0, %v2401_v50 }
 0x464   : > { %2402 = vrcp.f32 %v1898_v51  ;;  %v1911_v12 = vand.u32 2147483648, %v1898_v51  ;;  %v1909_v21 = vand.u32 2147483647, %v1898_v51  ;;  %vm1905_vm3 = vweird.f32 %v1898_v51 }
 0x465   : > { %2404 = vrcp.f32 %v1899_v0  ;;  %v1926_v15 = vand.u32 2147483648, %v1899_v0  ;;  %v1924_v22 = vand.u32 2147483647, %v1899_v0  ;;  %vm1920_vm5 = vweird.f32 %v1899_v0 }
 0x466   : > { %v1912_v37 = vor.u32 1.1754944e-38, %v1911_v12  ;;  %vm1910_vm6 = vcmp.eq.f32.partialorder %v1909_v21, 8.507059e+37 }
 0x467   : > { %v1927_v43 = vor.u32 1.1754944e-38, %v1926_v15  ;;  %vm1925_vm8 = vcmp.eq.f32.partialorder %v1924_v22, 8.507059e+37 }
 0x46a   : > { %v2403_v2 = vpop.eup %2402 }
 0x46b   : > { %v2405_v17 = vpop.eup %2404  ;;  %v1901_v20 = vmul.f32 %v2403_v2, %v1898_v51  ;;  %vm1906_vm1 = vweird.f32 %v2403_v2 }
 0x46c   : > { %v1916_v10 = vmul.f32 %v2405_v17, %v1899_v0  ;;  %vm1921_vm2 = vweird.f32 %v2405_v17  ;;  %vm1907_vm4 = vmor %vm1905_vm3, %vm1906_vm1 }
 0x46d   : > { %v1902_v11 = vsub.f32 1.0, %v1901_v20  ;;  %vm1922_vm7 = vmor %vm1920_vm5, %vm1921_vm2 }
 0x46e   : > { %v1917_v14 = vsub.f32 1.0, %v1916_v10 }
 0x46f   : > { %v1903_v26 = vmul.f32 %v2403_v2, %v1902_v11 }
 0x470   : > { %v1918_v13 = vmul.f32 %v2405_v17, %v1917_v14 }
 0x471   : > { %v1904_v36 = vadd.f32 %v2403_v2, %v1903_v26 }
 0x472   : > { %v1919_v38 = vadd.f32 %v2405_v17, %v1918_v13 }
 0x473   : > { %v1908_v39 = vsel %vm1907_vm4, %v2403_v2, %v1904_v36 }
 0x474   : > { %v1913_v45 = vsel %vm1910_vm6, %v1912_v37, %v1908_v39  ;;  %v1923_v46 = vsel %vm1922_vm7, %v2405_v17, %v1919_v38 }
 0x475   : > { %v1928_v47 = vsel %vm1925_vm8, %v1927_v43, %v1923_v46  ;;  %v1930_v48 = vmul.f32 %v1913_v45, %v952_v25 }
 0x476   : > { %v1931_v58 = vmul.f32 %v1928_v47, %v953_v44 }
 0x478   : > { %v1932_v31 = vpack.c.bf16 %v1931_v58, %v1930_v48 }
 0x47a   : > { %v1934_v30 = vrot.slane %v1932_v31, 2 }
 0x47c   : > { %v1937_v40 = vsel %vm1545_vm11, %v1932_v31, %v1934_v30 }
 0x47d   : > { %1939 = vst [vmem:[%s595_s16] sm:$0xf] %v1937_v40 }
 0x47e PF: > { %s23_s27 = sadd.s32 1, %s2428_s27   ;;  %s3065_s25 = smov %s2424_s26 }
 0x47f   : > { %p20_p5 = scmp.ge.s32.totalorder %s23_s27, 4   ;;  %s3066_s26 = smov %s3068_s28 }
 0x481   :  { %22 = sbr.rel (!%p20_p5) target bundleno = 2 (0x2), region = 141 }

</bundles_post_ra>
